<compile_context>
chip_gen: v7x
topology: tpu7x:2x2x1
jax: 0.10.0
libtpu: 0.0.40
codegen_flags: <defaults>
</compile_context>

<pallas_src>
import functools

import jax
import jax.numpy as jnp
from jax.experimental import pallas as pl
from jax.experimental.pallas import tpu as pltpu


# ---------------------------------------------------------------------------
# Fused kernel: conv(3x3, valid) + ReLU + flatten + Linear + ReLU, all in VMEM.
# ---------------------------------------------------------------------------
def make_fused_kernel(N, H, W, C_out, KH, KW, U):
    HO, WO = H - KH + 1, W - KW + 1

    def kernel(x_ref, cw_ref, cb_ref, fcw_hbm, fcb_ref, o_ref,
               ch_ref, fcw_vmem, fcw_sem):
        # ---- Kick off the FC-weight HBM->VMEM DMA first ---------------------
        # It overlaps with the conv + ReLU work below and we only wait right
        # before the MXU dots.
        fcw_copy = pltpu.make_async_copy(fcw_hbm, fcw_vmem, fcw_sem)
        fcw_copy.start()

        # ---- Conv2d (valid, stride 1, C_in=1) on the VPU --------------------
        # kx-outer: only KW (=3) lane-offset slices are materialized; the ky
        # offsets are cheap sublane selects on the hoisted slice.
        accs = [None] * C_out
        for kx in range(KW):
            x_kx = x_ref[:, :, kx:kx + WO]                    # (N, H, WO) lane slice
            for ky in range(KH):
                tap = x_kx[:, ky:ky + HO, :]                  # (N, HO, WO)
                for co in range(C_out):
                    w = cw_ref[co * (KH * KW) + ky * KW + kx]  # SMEM scalar
                    term = tap * w
                    accs[co] = term if accs[co] is None else accs[co] + term

        # ReLU + "flatten": channel co occupies lanes [co*WO, (co+1)*WO) of the
        # scratch, i.e. flatten order (ho, co, wo).  The FC weight was permuted
        # to the same order at init, so no in-kernel transpose/reshape needed.
        for co in range(C_out):
            ch = jnp.maximum(accs[co] + cb_ref[co], 0.0)      # (N, HO, WO)
            ch_ref[:, :, co * WO:(co + 1) * WO] = ch

        # ---- Linear(2704, U) + ReLU on the MXU ------------------------------
        fcw_copy.wait()
        # Independent per-row dots (bf16 x bf16 -> f32) + balanced tree sum:
        # no serial accumulator chain, so the MXU pushes/pops can pipeline.
        partials = []
        for ho in range(HO):
            lhs = ch_ref[:, ho, :].astype(jnp.bfloat16)       # (N, C_out*WO)
            partials.append(jnp.dot(lhs, fcw_vmem[ho],
                                    preferred_element_type=jnp.float32))
        while len(partials) > 1:
            nxt = [partials[i] + partials[i + 1]
                   for i in range(0, len(partials) - 1, 2)]
            if len(partials) % 2 == 1:
                nxt.append(partials[-1])
            partials = nxt
        acc = partials[0] + fcb_ref[...]                      # (N, U) + (1, U)
        o_ref[...] = jnp.maximum(acc, 0.0).astype(o_ref.dtype)

    return kernel


# ---------------------------------------------------------------------------
# One-time weight prep (outside the kernel): fold the NCHW flatten permutation
# and the fc_w transpose into the weight layout the fused kernel expects.
# fc weights are stored as bf16 (halves HBM bytes; MXU-native inputs).
# ---------------------------------------------------------------------------
def prepare_params(conv_w, conv_b, fc_w, fc_b, H, W):
    C_out, C_in, KH, KW = conv_w.shape
    assert C_in == 1, "fused kernel assumes a single input channel"
    HO, WO = H - KH + 1, W - KW + 1
    U = fc_b.shape[0]
    assert fc_w.shape == (U, C_out * HO * WO)

    cw_flat = conv_w.reshape(-1).astype(jnp.float32)          # (C_out*KH*KW,)
    cb = conv_b.astype(jnp.float32)                           # (C_out,)
    # fc_w[u, co*HO*WO + ho*WO + wo]  ->  fcw_prep[ho, co*WO + wo, u]
    fcw_prep = (fc_w.reshape(U, C_out, HO, WO)
                    .transpose(2, 1, 3, 0)
                    .reshape(HO, C_out * WO, U)
                    .astype(jnp.bfloat16))
    fcb2 = fc_b.reshape(1, U).astype(jnp.float32)
    return cw_flat, cb, fcw_prep, fcb2


def fused_forward(x_nhwc, cw_flat, conv_b, fcw_prep, fcb2, *, kernel_size):
    N, H, W, C_in = x_nhwc.shape
    assert C_in == 1
    C_out = conv_b.shape[0]
    KH = KW = kernel_size
    HO, WO = H - KH + 1, W - KW + 1
    U = fcb2.shape[-1]

    x3 = x_nhwc.reshape(N, H, W).astype(jnp.float32)  # drop size-1 channel dim

    kernel = make_fused_kernel(N, H, W, C_out, KH, KW, U)
    return pl.pallas_call(
        kernel,
        out_shape=jax.ShapeDtypeStruct((N, U), jnp.float32),
        in_specs=[
            pl.BlockSpec((N, H, W), lambda: (0, 0, 0)),            # input (VMEM)
            pl.BlockSpec(memory_space=pltpu.MemorySpace.SMEM),     # conv weights
            pl.BlockSpec(memory_space=pltpu.MemorySpace.SMEM),     # conv bias
            pl.BlockSpec(memory_space=pl.ANY),                     # fc weights (HBM, manual DMA)
            pl.BlockSpec((1, U), lambda: (0, 0)),                  # fc bias
        ],
        out_specs=pl.BlockSpec((N, U), lambda: (0, 0)),
        scratch_shapes=[
            pltpu.VMEM((N, HO, C_out * WO), jnp.float32),          # flattened activations
            pltpu.VMEM((HO, C_out * WO, U), jnp.bfloat16),         # fc weights landing buffer
            pltpu.SemaphoreType.DMA(()),                           # fc-weight DMA semaphore
        ],
    )(x3, cw_flat, conv_b, fcw_prep, fcb2)


# ---------------------------------------------------------------------------
# Pure-JAX f32 reference of Model.forward (correctness check only).
# ---------------------------------------------------------------------------
def reference_forward(x_nhwc, conv_w, conv_b, fc_w, fc_b):
    N, H, W, C = x_nhwc.shape
    C_out, _, KH, KW = conv_w.shape
    HO, WO = H - KH + 1, W - KW + 1
    cols = [x_nhwc[:, ky:ky + HO, kx:kx + WO, :]
            for ky in range(KH) for kx in range(KW)]
    patches = jnp.stack(cols, axis=3).reshape(N * HO * WO, KH * KW * C)
    w_col = jnp.transpose(conv_w, (2, 3, 1, 0)).reshape(KH * KW * C, C_out)
    conv = jnp.maximum(patches @ w_col + conv_b[None, :], 0.0)
    conv = conv.reshape(N, HO, WO, C_out)
    flat = jnp.transpose(conv, (0, 3, 1, 2)).reshape(N, -1)       # NCHW flatten
    return jnp.maximum(flat @ fc_w.T + fc_b[None, :], 0.0)


if __name__ == "__main__":
    # Hyper-parameters implied by in_features=2704 = 4 * 26 * 26:
    num_filters_1 = 4
    kernel_size = 3
    input_shape = (28, 28, 1)      # (H, W, C_in), NHWC
    num_units = 32
    batch = 2

    H, W, C_in = input_shape

    key = jax.random.PRNGKey(0)
    k_x, k_cw, k_cb, k_fw, k_fb = jax.random.split(key, 5)

    x = jax.random.normal(k_x, (batch, H, W, C_in), dtype=jnp.float32)

    fan_in_conv = C_in * kernel_size * kernel_size
    conv_w = jax.random.uniform(
        k_cw, (num_filters_1, C_in, kernel_size, kernel_size),
        minval=-1.0, maxval=1.0, dtype=jnp.float32) / jnp.sqrt(fan_in_conv)
    conv_b = jax.random.uniform(
        k_cb, (num_filters_1,), minval=-1.0, maxval=1.0,
        dtype=jnp.float32) / jnp.sqrt(fan_in_conv)

    fc_in = num_filters_1 * (H - kernel_size + 1) * (W - kernel_size + 1)  # 2704
    fc_w = jax.random.uniform(
        k_fw, (num_units, fc_in), minval=-1.0, maxval=1.0,
        dtype=jnp.float32) / jnp.sqrt(fc_in)
    fc_b = jax.random.uniform(
        k_fb, (num_units,), minval=-1.0, maxval=1.0,
        dtype=jnp.float32) / jnp.sqrt(fc_in)

    # One-time weight prep (folds NCHW flatten + fc_w.T into the layout).
    cw_flat, cb, fcw_prep, fcb2 = prepare_params(conv_w, conv_b, fc_w, fc_b, H, W)

    fwd = jax.jit(functools.partial(fused_forward, kernel_size=kernel_size))
    out = fwd(x, cw_flat, cb, fcw_prep, fcb2)
    jax.block_until_ready(out)

    assert out.shape == (batch, num_units), out.shape
    assert out.dtype == jnp.float32
    assert bool(jnp.all(out >= 0.0))          # ReLU output

    ref = reference_forward(x, conv_w, conv_b, fc_w, fc_b)
    # Tolerance relaxed vs the all-f32 version because the FC weights and FC
    # LHS are bf16 (MXU-native); accumulation is still f32.
    assert jnp.allclose(out, ref, rtol=3e-2, atol=3e-2), \
        float(jnp.max(jnp.abs(out - ref)))

    print("KERNEL_OK")
</pallas_src>

<mosaic_0001>
module attributes {stable_mosaic.version = 11 : i64} {
  func.func @kernel(%arg0: memref<2x28x28xf32, #tpu.memory_space<vmem>>, %arg1: memref<36xf32, #tpu.memory_space<smem>>, %arg2: memref<4xf32, #tpu.memory_space<smem>>, %arg3: memref<26x104x32xbf16, #tpu.memory_space<any>>, %arg4: memref<1x32xf32, #tpu.memory_space<vmem>>, %arg5: memref<2x32xf32, #tpu.memory_space<vmem>>, %arg6: memref<2x26x104xf32, #tpu.memory_space<vmem>>, %arg7: memref<26x104x32xbf16, #tpu.memory_space<vmem>>, %arg8: memref<!tpu.dma_semaphore, #tpu.memory_space<semaphore_mem>>) attributes {dimension_semantics = [], scalar_prefetch = 0 : i64, scratch_operands = 3 : i64, tpu.core_type = #tpu.core_type<tc>} {
    tpu.enqueue_dma source(%arg3 : memref<26x104x32xbf16, #tpu.memory_space<any>>) target(%arg7 : memref<26x104x32xbf16, #tpu.memory_space<vmem>>) target_semaphore(%arg8 : memref<!tpu.dma_semaphore, #tpu.memory_space<semaphore_mem>>)
    %c0 = arith.constant 0 : index
    %c0_0 = arith.constant 0 : index
    %c0_1 = arith.constant 0 : index
    %0 = vector.load %arg0[%c0, %c0_0, %c0_1] : memref<2x28x28xf32, #tpu.memory_space<vmem>>, vector<2x28x26xf32>
    %1 = vector.extract_strided_slice %0 {offsets = [0, 0, 0], sizes = [2, 26, 26], strides = [1, 1, 1]} : vector<2x28x26xf32> to vector<2x26x26xf32>
    %c0_2 = arith.constant 0 : index
    %2 = memref.load %arg1[%c0_2] : memref<36xf32, #tpu.memory_space<smem>>
    %3 = vector.broadcast %2 : f32 to vector<2x26x26xf32>
    %4 = arith.mulf %1, %3 : vector<2x26x26xf32>
    %c9 = arith.constant 9 : index
    %5 = memref.load %arg1[%c9] : memref<36xf32, #tpu.memory_space<smem>>
    %6 = vector.broadcast %5 : f32 to vector<2x26x26xf32>
    %7 = arith.mulf %1, %6 : vector<2x26x26xf32>
    %c18 = arith.constant 18 : index
    %8 = memref.load %arg1[%c18] : memref<36xf32, #tpu.memory_space<smem>>
    %9 = vector.broadcast %8 : f32 to vector<2x26x26xf32>
    %10 = arith.mulf %1, %9 : vector<2x26x26xf32>
    %c27 = arith.constant 27 : index
    %11 = memref.load %arg1[%c27] : memref<36xf32, #tpu.memory_space<smem>>
    %12 = vector.broadcast %11 : f32 to vector<2x26x26xf32>
    %13 = arith.mulf %1, %12 : vector<2x26x26xf32>
    %14 = vector.extract_strided_slice %0 {offsets = [0, 1, 0], sizes = [2, 26, 26], strides = [1, 1, 1]} : vector<2x28x26xf32> to vector<2x26x26xf32>
    %c3 = arith.constant 3 : index
    %15 = memref.load %arg1[%c3] : memref<36xf32, #tpu.memory_space<smem>>
    %16 = vector.broadcast %15 : f32 to vector<2x26x26xf32>
    %17 = arith.mulf %14, %16 : vector<2x26x26xf32>
    %18 = arith.addf %4, %17 : vector<2x26x26xf32>
    %c12 = arith.constant 12 : index
    %19 = memref.load %arg1[%c12] : memref<36xf32, #tpu.memory_space<smem>>
    %20 = vector.broadcast %19 : f32 to vector<2x26x26xf32>
    %21 = arith.mulf %14, %20 : vector<2x26x26xf32>
    %22 = arith.addf %7, %21 : vector<2x26x26xf32>
    %c21 = arith.constant 21 : index
    %23 = memref.load %arg1[%c21] : memref<36xf32, #tpu.memory_space<smem>>
    %24 = vector.broadcast %23 : f32 to vector<2x26x26xf32>
    %25 = arith.mulf %14, %24 : vector<2x26x26xf32>
    %26 = arith.addf %10, %25 : vector<2x26x26xf32>
    %c30 = arith.constant 30 : index
    %27 = memref.load %arg1[%c30] : memref<36xf32, #tpu.memory_space<smem>>
    %28 = vector.broadcast %27 : f32 to vector<2x26x26xf32>
    %29 = arith.mulf %14, %28 : vector<2x26x26xf32>
    %30 = arith.addf %13, %29 : vector<2x26x26xf32>
    %31 = vector.extract_strided_slice %0 {offsets = [0, 2, 0], sizes = [2, 26, 26], strides = [1, 1, 1]} : vector<2x28x26xf32> to vector<2x26x26xf32>
    %c6 = arith.constant 6 : index
    %32 = memref.load %arg1[%c6] : memref<36xf32, #tpu.memory_space<smem>>
    %33 = vector.broadcast %32 : f32 to vector<2x26x26xf32>
    %34 = arith.mulf %31, %33 : vector<2x26x26xf32>
    %35 = arith.addf %18, %34 : vector<2x26x26xf32>
    %c15 = arith.constant 15 : index
    %36 = memref.load %arg1[%c15] : memref<36xf32, #tpu.memory_space<smem>>
    %37 = vector.broadcast %36 : f32 to vector<2x26x26xf32>
    %38 = arith.mulf %31, %37 : vector<2x26x26xf32>
    %39 = arith.addf %22, %38 : vector<2x26x26xf32>
    %c24 = arith.constant 24 : index
    %40 = memref.load %arg1[%c24] : memref<36xf32, #tpu.memory_space<smem>>
    %41 = vector.broadcast %40 : f32 to vector<2x26x26xf32>
    %42 = arith.mulf %31, %41 : vector<2x26x26xf32>
    %43 = arith.addf %26, %42 : vector<2x26x26xf32>
    %c33 = arith.constant 33 : index
    %44 = memref.load %arg1[%c33] : memref<36xf32, #tpu.memory_space<smem>>
    %45 = vector.broadcast %44 : f32 to vector<2x26x26xf32>
    %46 = arith.mulf %31, %45 : vector<2x26x26xf32>
    %47 = arith.addf %30, %46 : vector<2x26x26xf32>
    %c0_3 = arith.constant 0 : index
    %c0_4 = arith.constant 0 : index
    %c1 = arith.constant 1 : index
    %48 = vector.load %arg0[%c0_3, %c0_4, %c1] : memref<2x28x28xf32, #tpu.memory_space<vmem>>, vector<2x28x26xf32>
    %49 = vector.extract_strided_slice %48 {offsets = [0, 0, 0], sizes = [2, 26, 26], strides = [1, 1, 1]} : vector<2x28x26xf32> to vector<2x26x26xf32>
    %c1_5 = arith.constant 1 : index
    %50 = memref.load %arg1[%c1_5] : memref<36xf32, #tpu.memory_space<smem>>
    %51 = vector.broadcast %50 : f32 to vector<2x26x26xf32>
    %52 = arith.mulf %49, %51 : vector<2x26x26xf32>
    %53 = arith.addf %35, %52 : vector<2x26x26xf32>
    %c10 = arith.constant 10 : index
    %54 = memref.load %arg1[%c10] : memref<36xf32, #tpu.memory_space<smem>>
    %55 = vector.broadcast %54 : f32 to vector<2x26x26xf32>
    %56 = arith.mulf %49, %55 : vector<2x26x26xf32>
    %57 = arith.addf %39, %56 : vector<2x26x26xf32>
    %c19 = arith.constant 19 : index
    %58 = memref.load %arg1[%c19] : memref<36xf32, #tpu.memory_space<smem>>
    %59 = vector.broadcast %58 : f32 to vector<2x26x26xf32>
    %60 = arith.mulf %49, %59 : vector<2x26x26xf32>
    %61 = arith.addf %43, %60 : vector<2x26x26xf32>
    %c28 = arith.constant 28 : index
    %62 = memref.load %arg1[%c28] : memref<36xf32, #tpu.memory_space<smem>>
    %63 = vector.broadcast %62 : f32 to vector<2x26x26xf32>
    %64 = arith.mulf %49, %63 : vector<2x26x26xf32>
    %65 = arith.addf %47, %64 : vector<2x26x26xf32>
    %66 = vector.extract_strided_slice %48 {offsets = [0, 1, 0], sizes = [2, 26, 26], strides = [1, 1, 1]} : vector<2x28x26xf32> to vector<2x26x26xf32>
    %c4 = arith.constant 4 : index
    %67 = memref.load %arg1[%c4] : memref<36xf32, #tpu.memory_space<smem>>
    %68 = vector.broadcast %67 : f32 to vector<2x26x26xf32>
    %69 = arith.mulf %66, %68 : vector<2x26x26xf32>
    %70 = arith.addf %53, %69 : vector<2x26x26xf32>
    %c13 = arith.constant 13 : index
    %71 = memref.load %arg1[%c13] : memref<36xf32, #tpu.memory_space<smem>>
    %72 = vector.broadcast %71 : f32 to vector<2x26x26xf32>
    %73 = arith.mulf %66, %72 : vector<2x26x26xf32>
    %74 = arith.addf %57, %73 : vector<2x26x26xf32>
    %c22 = arith.constant 22 : index
    %75 = memref.load %arg1[%c22] : memref<36xf32, #tpu.memory_space<smem>>
    %76 = vector.broadcast %75 : f32 to vector<2x26x26xf32>
    %77 = arith.mulf %66, %76 : vector<2x26x26xf32>
    %78 = arith.addf %61, %77 : vector<2x26x26xf32>
    %c31 = arith.constant 31 : index
    %79 = memref.load %arg1[%c31] : memref<36xf32, #tpu.memory_space<smem>>
    %80 = vector.broadcast %79 : f32 to vector<2x26x26xf32>
    %81 = arith.mulf %66, %80 : vector<2x26x26xf32>
    %82 = arith.addf %65, %81 : vector<2x26x26xf32>
    %83 = vector.extract_strided_slice %48 {offsets = [0, 2, 0], sizes = [2, 26, 26], strides = [1, 1, 1]} : vector<2x28x26xf32> to vector<2x26x26xf32>
    %c7 = arith.constant 7 : index
    %84 = memref.load %arg1[%c7] : memref<36xf32, #tpu.memory_space<smem>>
    %85 = vector.broadcast %84 : f32 to vector<2x26x26xf32>
    %86 = arith.mulf %83, %85 : vector<2x26x26xf32>
    %87 = arith.addf %70, %86 : vector<2x26x26xf32>
    %c16 = arith.constant 16 : index
    %88 = memref.load %arg1[%c16] : memref<36xf32, #tpu.memory_space<smem>>
    %89 = vector.broadcast %88 : f32 to vector<2x26x26xf32>
    %90 = arith.mulf %83, %89 : vector<2x26x26xf32>
    %91 = arith.addf %74, %90 : vector<2x26x26xf32>
    %c25 = arith.constant 25 : index
    %92 = memref.load %arg1[%c25] : memref<36xf32, #tpu.memory_space<smem>>
    %93 = vector.broadcast %92 : f32 to vector<2x26x26xf32>
    %94 = arith.mulf %83, %93 : vector<2x26x26xf32>
    %95 = arith.addf %78, %94 : vector<2x26x26xf32>
    %c34 = arith.constant 34 : index
    %96 = memref.load %arg1[%c34] : memref<36xf32, #tpu.memory_space<smem>>
    %97 = vector.broadcast %96 : f32 to vector<2x26x26xf32>
    %98 = arith.mulf %83, %97 : vector<2x26x26xf32>
    %99 = arith.addf %82, %98 : vector<2x26x26xf32>
    %c0_6 = arith.constant 0 : index
    %c0_7 = arith.constant 0 : index
    %c2 = arith.constant 2 : index
    %100 = vector.load %arg0[%c0_6, %c0_7, %c2] : memref<2x28x28xf32, #tpu.memory_space<vmem>>, vector<2x28x26xf32>
    %101 = vector.extract_strided_slice %100 {offsets = [0, 0, 0], sizes = [2, 26, 26], strides = [1, 1, 1]} : vector<2x28x26xf32> to vector<2x26x26xf32>
    %c2_8 = arith.constant 2 : index
    %102 = memref.load %arg1[%c2_8] : memref<36xf32, #tpu.memory_space<smem>>
    %103 = vector.broadcast %102 : f32 to vector<2x26x26xf32>
    %104 = arith.mulf %101, %103 : vector<2x26x26xf32>
    %105 = arith.addf %87, %104 : vector<2x26x26xf32>
    %c11 = arith.constant 11 : index
    %106 = memref.load %arg1[%c11] : memref<36xf32, #tpu.memory_space<smem>>
    %107 = vector.broadcast %106 : f32 to vector<2x26x26xf32>
    %108 = arith.mulf %101, %107 : vector<2x26x26xf32>
    %109 = arith.addf %91, %108 : vector<2x26x26xf32>
    %c20 = arith.constant 20 : index
    %110 = memref.load %arg1[%c20] : memref<36xf32, #tpu.memory_space<smem>>
    %111 = vector.broadcast %110 : f32 to vector<2x26x26xf32>
    %112 = arith.mulf %101, %111 : vector<2x26x26xf32>
    %113 = arith.addf %95, %112 : vector<2x26x26xf32>
    %c29 = arith.constant 29 : index
    %114 = memref.load %arg1[%c29] : memref<36xf32, #tpu.memory_space<smem>>
    %115 = vector.broadcast %114 : f32 to vector<2x26x26xf32>
    %116 = arith.mulf %101, %115 : vector<2x26x26xf32>
    %117 = arith.addf %99, %116 : vector<2x26x26xf32>
    %118 = vector.extract_strided_slice %100 {offsets = [0, 1, 0], sizes = [2, 26, 26], strides = [1, 1, 1]} : vector<2x28x26xf32> to vector<2x26x26xf32>
    %c5 = arith.constant 5 : index
    %119 = memref.load %arg1[%c5] : memref<36xf32, #tpu.memory_space<smem>>
    %120 = vector.broadcast %119 : f32 to vector<2x26x26xf32>
    %121 = arith.mulf %118, %120 : vector<2x26x26xf32>
    %122 = arith.addf %105, %121 : vector<2x26x26xf32>
    %c14 = arith.constant 14 : index
    %123 = memref.load %arg1[%c14] : memref<36xf32, #tpu.memory_space<smem>>
    %124 = vector.broadcast %123 : f32 to vector<2x26x26xf32>
    %125 = arith.mulf %118, %124 : vector<2x26x26xf32>
    %126 = arith.addf %109, %125 : vector<2x26x26xf32>
    %c23 = arith.constant 23 : index
    %127 = memref.load %arg1[%c23] : memref<36xf32, #tpu.memory_space<smem>>
    %128 = vector.broadcast %127 : f32 to vector<2x26x26xf32>
    %129 = arith.mulf %118, %128 : vector<2x26x26xf32>
    %130 = arith.addf %113, %129 : vector<2x26x26xf32>
    %c32 = arith.constant 32 : index
    %131 = memref.load %arg1[%c32] : memref<36xf32, #tpu.memory_space<smem>>
    %132 = vector.broadcast %131 : f32 to vector<2x26x26xf32>
    %133 = arith.mulf %118, %132 : vector<2x26x26xf32>
    %134 = arith.addf %117, %133 : vector<2x26x26xf32>
    %135 = vector.extract_strided_slice %100 {offsets = [0, 2, 0], sizes = [2, 26, 26], strides = [1, 1, 1]} : vector<2x28x26xf32> to vector<2x26x26xf32>
    %c8 = arith.constant 8 : index
    %136 = memref.load %arg1[%c8] : memref<36xf32, #tpu.memory_space<smem>>
    %137 = vector.broadcast %136 : f32 to vector<2x26x26xf32>
    %138 = arith.mulf %135, %137 : vector<2x26x26xf32>
    %139 = arith.addf %122, %138 : vector<2x26x26xf32>
    %c17 = arith.constant 17 : index
    %140 = memref.load %arg1[%c17] : memref<36xf32, #tpu.memory_space<smem>>
    %141 = vector.broadcast %140 : f32 to vector<2x26x26xf32>
    %142 = arith.mulf %135, %141 : vector<2x26x26xf32>
    %143 = arith.addf %126, %142 : vector<2x26x26xf32>
    %c26 = arith.constant 26 : index
    %144 = memref.load %arg1[%c26] : memref<36xf32, #tpu.memory_space<smem>>
    %145 = vector.broadcast %144 : f32 to vector<2x26x26xf32>
    %146 = arith.mulf %135, %145 : vector<2x26x26xf32>
    %147 = arith.addf %130, %146 : vector<2x26x26xf32>
    %c35 = arith.constant 35 : index
    %148 = memref.load %arg1[%c35] : memref<36xf32, #tpu.memory_space<smem>>
    %149 = vector.broadcast %148 : f32 to vector<2x26x26xf32>
    %150 = arith.mulf %135, %149 : vector<2x26x26xf32>
    %151 = arith.addf %134, %150 : vector<2x26x26xf32>
    %c0_9 = arith.constant 0 : index
    %152 = memref.load %arg2[%c0_9] : memref<4xf32, #tpu.memory_space<smem>>
    %153 = vector.broadcast %152 : f32 to vector<2x26x26xf32>
    %154 = arith.addf %139, %153 : vector<2x26x26xf32>
    %cst = arith.constant 0.000000e+00 : f32
    %155 = vector.broadcast %cst : f32 to vector<2x26x26xf32>
    %156 = arith.maximumf %154, %155 : vector<2x26x26xf32>
    %c0_10 = arith.constant 0 : index
    %c0_11 = arith.constant 0 : index
    %c0_12 = arith.constant 0 : index
    %157 = vector.load %arg6[%c0_10, %c0_11, %c0_12] : memref<2x26x104xf32, #tpu.memory_space<vmem>>, vector<2x26x26xf32>
    tpu.vector_store %arg6[%c0_10, %c0_11, %c0_12], %156 {strides = array<i32>} : memref<2x26x104xf32, #tpu.memory_space<vmem>>, vector<2x26x26xf32>,
    %c1_13 = arith.constant 1 : index
    %158 = memref.load %arg2[%c1_13] : memref<4xf32, #tpu.memory_space<smem>>
    %159 = vector.broadcast %158 : f32 to vector<2x26x26xf32>
    %160 = arith.addf %143, %159 : vector<2x26x26xf32>
    %cst_14 = arith.constant 0.000000e+00 : f32
    %161 = vector.broadcast %cst_14 : f32 to vector<2x26x26xf32>
    %162 = arith.maximumf %160, %161 : vector<2x26x26xf32>
    %c0_15 = arith.constant 0 : index
    %c0_16 = arith.constant 0 : index
    %c26_17 = arith.constant 26 : index
    %163 = vector.load %arg6[%c0_15, %c0_16, %c26_17] : memref<2x26x104xf32, #tpu.memory_space<vmem>>, vector<2x26x26xf32>
    tpu.vector_store %arg6[%c0_15, %c0_16, %c26_17], %162 {strides = array<i32>} : memref<2x26x104xf32, #tpu.memory_space<vmem>>, vector<2x26x26xf32>,
    %c2_18 = arith.constant 2 : index
    %164 = memref.load %arg2[%c2_18] : memref<4xf32, #tpu.memory_space<smem>>
    %165 = vector.broadcast %164 : f32 to vector<2x26x26xf32>
    %166 = arith.addf %147, %165 : vector<2x26x26xf32>
    %cst_19 = arith.constant 0.000000e+00 : f32
    %167 = vector.broadcast %cst_19 : f32 to vector<2x26x26xf32>
    %168 = arith.maximumf %166, %167 : vector<2x26x26xf32>
    %c0_20 = arith.constant 0 : index
    %c0_21 = arith.constant 0 : index
    %c52 = arith.constant 52 : index
    %169 = vector.load %arg6[%c0_20, %c0_21, %c52] : memref<2x26x104xf32, #tpu.memory_space<vmem>>, vector<2x26x26xf32>
    tpu.vector_store %arg6[%c0_20, %c0_21, %c52], %168 {strides = array<i32>} : memref<2x26x104xf32, #tpu.memory_space<vmem>>, vector<2x26x26xf32>,
    %c3_22 = arith.constant 3 : index
    %170 = memref.load %arg2[%c3_22] : memref<4xf32, #tpu.memory_space<smem>>
    %171 = vector.broadcast %170 : f32 to vector<2x26x26xf32>
    %172 = arith.addf %151, %171 : vector<2x26x26xf32>
    %cst_23 = arith.constant 0.000000e+00 : f32
    %173 = vector.broadcast %cst_23 : f32 to vector<2x26x26xf32>
    %174 = arith.maximumf %172, %173 : vector<2x26x26xf32>
    %c0_24 = arith.constant 0 : index
    %c0_25 = arith.constant 0 : index
    %c78 = arith.constant 78 : index
    %175 = vector.load %arg6[%c0_24, %c0_25, %c78] : memref<2x26x104xf32, #tpu.memory_space<vmem>>, vector<2x26x26xf32>
    tpu.vector_store %arg6[%c0_24, %c0_25, %c78], %174 {strides = array<i32>} : memref<2x26x104xf32, #tpu.memory_space<vmem>>, vector<2x26x26xf32>,
    tpu.wait_dma2 semaphore(%arg8 : memref<!tpu.dma_semaphore, #tpu.memory_space<semaphore_mem>>) src(%arg3 : memref<26x104x32xbf16, #tpu.memory_space<any>>) dst(%arg7 : memref<26x104x32xbf16, #tpu.memory_space<vmem>>)
    %c0_26 = arith.constant 0 : index
    %c0_27 = arith.constant 0 : index
    %c0_28 = arith.constant 0 : index
    %176 = vector.load %arg6[%c0_26, %c0_27, %c0_28] : memref<2x26x104xf32, #tpu.memory_space<vmem>>, vector<2x1x104xf32>
    %177 = vector.shape_cast %176 : vector<2x1x104xf32> to vector<2x104xf32>
    %178 = arith.truncf %177 : vector<2x104xf32> to vector<2x104xbf16>
    %c0_29 = arith.constant 0 : index
    %c0_30 = arith.constant 0 : index
    %c0_31 = arith.constant 0 : index
    %179 = vector.load %arg7[%c0_29, %c0_30, %c0_31] : memref<26x104x32xbf16, #tpu.memory_space<vmem>>, vector<1x104x32xbf16>
    %180 = vector.shape_cast %179 : vector<1x104x32xbf16> to vector<104x32xbf16>
    %cst_32 = arith.constant dense<0.000000e+00> : vector<2x32xf32>
    %181 = tpu.matmul %178, %180, %cst_32 {dimension_numbers = #tpu.dot_dimension_numbers<[1], [0], [0], [1], [0, 0, 1, 1], [], []>} : vector<2x104xbf16>, vector<104x32xbf16>, vector<2x32xf32> -> vector<2x32xf32>
    %c0_33 = arith.constant 0 : index
    %c1_34 = arith.constant 1 : index
    %c0_35 = arith.constant 0 : index
    %182 = vector.load %arg6[%c0_33, %c1_34, %c0_35] : memref<2x26x104xf32, #tpu.memory_space<vmem>>, vector<2x1x104xf32>
    %183 = vector.shape_cast %182 : vector<2x1x104xf32> to vector<2x104xf32>
    %184 = arith.truncf %183 : vector<2x104xf32> to vector<2x104xbf16>
    %c1_36 = arith.constant 1 : index
    %c0_37 = arith.constant 0 : index
    %c0_38 = arith.constant 0 : index
    %185 = vector.load %arg7[%c1_36, %c0_37, %c0_38] : memref<26x104x32xbf16, #tpu.memory_space<vmem>>, vector<1x104x32xbf16>
    %186 = vector.shape_cast %185 : vector<1x104x32xbf16> to vector<104x32xbf16>
    %cst_39 = arith.constant dense<0.000000e+00> : vector<2x32xf32>
    %187 = tpu.matmul %184, %186, %cst_39 {dimension_numbers = #tpu.dot_dimension_numbers<[1], [0], [0], [1], [0, 0, 1, 1], [], []>} : vector<2x104xbf16>, vector<104x32xbf16>, vector<2x32xf32> -> vector<2x32xf32>
    %c0_40 = arith.constant 0 : index
    %c2_41 = arith.constant 2 : index
    %c0_42 = arith.constant 0 : index
    %188 = vector.load %arg6[%c0_40, %c2_41, %c0_42] : memref<2x26x104xf32, #tpu.memory_space<vmem>>, vector<2x1x104xf32>
    %189 = vector.shape_cast %188 : vector<2x1x104xf32> to vector<2x104xf32>
    %190 = arith.truncf %189 : vector<2x104xf32> to vector<2x104xbf16>
    %c2_43 = arith.constant 2 : index
    %c0_44 = arith.constant 0 : index
    %c0_45 = arith.constant 0 : index
    %191 = vector.load %arg7[%c2_43, %c0_44, %c0_45] : memref<26x104x32xbf16, #tpu.memory_space<vmem>>, vector<1x104x32xbf16>
    %192 = vector.shape_cast %191 : vector<1x104x32xbf16> to vector<104x32xbf16>
    %cst_46 = arith.constant dense<0.000000e+00> : vector<2x32xf32>
    %193 = tpu.matmul %190, %192, %cst_46 {dimension_numbers = #tpu.dot_dimension_numbers<[1], [0], [0], [1], [0, 0, 1, 1], [], []>} : vector<2x104xbf16>, vector<104x32xbf16>, vector<2x32xf32> -> vector<2x32xf32>
    %c0_47 = arith.constant 0 : index
    %c3_48 = arith.constant 3 : index
    %c0_49 = arith.constant 0 : index
    %194 = vector.load %arg6[%c0_47, %c3_48, %c0_49] : memref<2x26x104xf32, #tpu.memory_space<vmem>>, vector<2x1x104xf32>
    %195 = vector.shape_cast %194 : vector<2x1x104xf32> to vector<2x104xf32>
    %196 = arith.truncf %195 : vector<2x104xf32> to vector<2x104xbf16>
    %c3_50 = arith.constant 3 : index
    %c0_51 = arith.constant 0 : index
    %c0_52 = arith.constant 0 : index
    %197 = vector.load %arg7[%c3_50, %c0_51, %c0_52] : memref<26x104x32xbf16, #tpu.memory_space<vmem>>, vector<1x104x32xbf16>
    %198 = vector.shape_cast %197 : vector<1x104x32xbf16> to vector<104x32xbf16>
    %cst_53 = arith.constant dense<0.000000e+00> : vector<2x32xf32>
    %199 = tpu.matmul %196, %198, %cst_53 {dimension_numbers = #tpu.dot_dimension_numbers<[1], [0], [0], [1], [0, 0, 1, 1], [], []>} : vector<2x104xbf16>, vector<104x32xbf16>, vector<2x32xf32> -> vector<2x32xf32>
    %c0_54 = arith.constant 0 : index
    %c4_55 = arith.constant 4 : index
    %c0_56 = arith.constant 0 : index
    %200 = vector.load %arg6[%c0_54, %c4_55, %c0_56] : memref<2x26x104xf32, #tpu.memory_space<vmem>>, vector<2x1x104xf32>
    %201 = vector.shape_cast %200 : vector<2x1x104xf32> to vector<2x104xf32>
    %202 = arith.truncf %201 : vector<2x104xf32> to vector<2x104xbf16>
    %c4_57 = arith.constant 4 : index
    %c0_58 = arith.constant 0 : index
    %c0_59 = arith.constant 0 : index
    %203 = vector.load %arg7[%c4_57, %c0_58, %c0_59] : memref<26x104x32xbf16, #tpu.memory_space<vmem>>, vector<1x104x32xbf16>
    %204 = vector.shape_cast %203 : vector<1x104x32xbf16> to vector<104x32xbf16>
    %cst_60 = arith.constant dense<0.000000e+00> : vector<2x32xf32>
    %205 = tpu.matmul %202, %204, %cst_60 {dimension_numbers = #tpu.dot_dimension_numbers<[1], [0], [0], [1], [0, 0, 1, 1], [], []>} : vector<2x104xbf16>, vector<104x32xbf16>, vector<2x32xf32> -> vector<2x32xf32>
    %c0_61 = arith.constant 0 : index
    %c5_62 = arith.constant 5 : index
    %c0_63 = arith.constant 0 : index
    %206 = vector.load %arg6[%c0_61, %c5_62, %c0_63] : memref<2x26x104xf32, #tpu.memory_space<vmem>>, vector<2x1x104xf32>
    %207 = vector.shape_cast %206 : vector<2x1x104xf32> to vector<2x104xf32>
    %208 = arith.truncf %207 : vector<2x104xf32> to vector<2x104xbf16>
    %c5_64 = arith.constant 5 : index
    %c0_65 = arith.constant 0 : index
    %c0_66 = arith.constant 0 : index
    %209 = vector.load %arg7[%c5_64, %c0_65, %c0_66] : memref<26x104x32xbf16, #tpu.memory_space<vmem>>, vector<1x104x32xbf16>
    %210 = vector.shape_cast %209 : vector<1x104x32xbf16> to vector<104x32xbf16>
    %cst_67 = arith.constant dense<0.000000e+00> : vector<2x32xf32>
    %211 = tpu.matmul %208, %210, %cst_67 {dimension_numbers = #tpu.dot_dimension_numbers<[1], [0], [0], [1], [0, 0, 1, 1], [], []>} : vector<2x104xbf16>, vector<104x32xbf16>, vector<2x32xf32> -> vector<2x32xf32>
    %c0_68 = arith.constant 0 : index
    %c6_69 = arith.constant 6 : index
    %c0_70 = arith.constant 0 : index
    %212 = vector.load %arg6[%c0_68, %c6_69, %c0_70] : memref<2x26x104xf32, #tpu.memory_space<vmem>>, vector<2x1x104xf32>
    %213 = vector.shape_cast %212 : vector<2x1x104xf32> to vector<2x104xf32>
    %214 = arith.truncf %213 : vector<2x104xf32> to vector<2x104xbf16>
    %c6_71 = arith.constant 6 : index
    %c0_72 = arith.constant 0 : index
    %c0_73 = arith.constant 0 : index
    %215 = vector.load %arg7[%c6_71, %c0_72, %c0_73] : memref<26x104x32xbf16, #tpu.memory_space<vmem>>, vector<1x104x32xbf16>
    %216 = vector.shape_cast %215 : vector<1x104x32xbf16> to vector<104x32xbf16>
    %cst_74 = arith.constant dense<0.000000e+00> : vector<2x32xf32>
    %217 = tpu.matmul %214, %216, %cst_74 {dimension_numbers = #tpu.dot_dimension_numbers<[1], [0], [0], [1], [0, 0, 1, 1], [], []>} : vector<2x104xbf16>, vector<104x32xbf16>, vector<2x32xf32> -> vector<2x32xf32>
    %c0_75 = arith.constant 0 : index
    %c7_76 = arith.constant 7 : index
    %c0_77 = arith.constant 0 : index
    %218 = vector.load %arg6[%c0_75, %c7_76, %c0_77] : memref<2x26x104xf32, #tpu.memory_space<vmem>>, vector<2x1x104xf32>
    %219 = vector.shape_cast %218 : vector<2x1x104xf32> to vector<2x104xf32>
    %220 = arith.truncf %219 : vector<2x104xf32> to vector<2x104xbf16>
    %c7_78 = arith.constant 7 : index
    %c0_79 = arith.constant 0 : index
    %c0_80 = arith.constant 0 : index
    %221 = vector.load %arg7[%c7_78, %c0_79, %c0_80] : memref<26x104x32xbf16, #tpu.memory_space<vmem>>, vector<1x104x32xbf16>
    %222 = vector.shape_cast %221 : vector<1x104x32xbf16> to vector<104x32xbf16>
    %cst_81 = arith.constant dense<0.000000e+00> : vector<2x32xf32>
    %223 = tpu.matmul %220, %222, %cst_81 {dimension_numbers = #tpu.dot_dimension_numbers<[1], [0], [0], [1], [0, 0, 1, 1], [], []>} : vector<2x104xbf16>, vector<104x32xbf16>, vector<2x32xf32> -> vector<2x32xf32>
    %c0_82 = arith.constant 0 : index
    %c8_83 = arith.constant 8 : index
    %c0_84 = arith.constant 0 : index
    %224 = vector.load %arg6[%c0_82, %c8_83, %c0_84] : memref<2x26x104xf32, #tpu.memory_space<vmem>>, vector<2x1x104xf32>
    %225 = vector.shape_cast %224 : vector<2x1x104xf32> to vector<2x104xf32>
    %226 = arith.truncf %225 : vector<2x104xf32> to vector<2x104xbf16>
    %c8_85 = arith.constant 8 : index
    %c0_86 = arith.constant 0 : index
    %c0_87 = arith.constant 0 : index
    %227 = vector.load %arg7[%c8_85, %c0_86, %c0_87] : memref<26x104x32xbf16, #tpu.memory_space<vmem>>, vector<1x104x32xbf16>
    %228 = vector.shape_cast %227 : vector<1x104x32xbf16> to vector<104x32xbf16>
    %cst_88 = arith.constant dense<0.000000e+00> : vector<2x32xf32>
    %229 = tpu.matmul %226, %228, %cst_88 {dimension_numbers = #tpu.dot_dimension_numbers<[1], [0], [0], [1], [0, 0, 1, 1], [], []>} : vector<2x104xbf16>, vector<104x32xbf16>, vector<2x32xf32> -> vector<2x32xf32>
    %c0_89 = arith.constant 0 : index
    %c9_90 = arith.constant 9 : index
    %c0_91 = arith.constant 0 : index
    %230 = vector.load %arg6[%c0_89, %c9_90, %c0_91] : memref<2x26x104xf32, #tpu.memory_space<vmem>>, vector<2x1x104xf32>
    %231 = vector.shape_cast %230 : vector<2x1x104xf32> to vector<2x104xf32>
    %232 = arith.truncf %231 : vector<2x104xf32> to vector<2x104xbf16>
    %c9_92 = arith.constant 9 : index
    %c0_93 = arith.constant 0 : index
    %c0_94 = arith.constant 0 : index
    %233 = vector.load %arg7[%c9_92, %c0_93, %c0_94] : memref<26x104x32xbf16, #tpu.memory_space<vmem>>, vector<1x104x32xbf16>
    %234 = vector.shape_cast %233 : vector<1x104x32xbf16> to vector<104x32xbf16>
    %cst_95 = arith.constant dense<0.000000e+00> : vector<2x32xf32>
    %235 = tpu.matmul %232, %234, %cst_95 {dimension_numbers = #tpu.dot_dimension_numbers<[1], [0], [0], [1], [0, 0, 1, 1], [], []>} : vector<2x104xbf16>, vector<104x32xbf16>, vector<2x32xf32> -> vector<2x32xf32>
    %c0_96 = arith.constant 0 : index
    %c10_97 = arith.constant 10 : index
    %c0_98 = arith.constant 0 : index
    %236 = vector.load %arg6[%c0_96, %c10_97, %c0_98] : memref<2x26x104xf32, #tpu.memory_space<vmem>>, vector<2x1x104xf32>
    %237 = vector.shape_cast %236 : vector<2x1x104xf32> to vector<2x104xf32>
    %238 = arith.truncf %237 : vector<2x104xf32> to vector<2x104xbf16>
    %c10_99 = arith.constant 10 : index
    %c0_100 = arith.constant 0 : index
    %c0_101 = arith.constant 0 : index
    %239 = vector.load %arg7[%c10_99, %c0_100, %c0_101] : memref<26x104x32xbf16, #tpu.memory_space<vmem>>, vector<1x104x32xbf16>
    %240 = vector.shape_cast %239 : vector<1x104x32xbf16> to vector<104x32xbf16>
    %cst_102 = arith.constant dense<0.000000e+00> : vector<2x32xf32>
    %241 = tpu.matmul %238, %240, %cst_102 {dimension_numbers = #tpu.dot_dimension_numbers<[1], [0], [0], [1], [0, 0, 1, 1], [], []>} : vector<2x104xbf16>, vector<104x32xbf16>, vector<2x32xf32> -> vector<2x32xf32>
    %c0_103 = arith.constant 0 : index
    %c11_104 = arith.constant 11 : index
    %c0_105 = arith.constant 0 : index
    %242 = vector.load %arg6[%c0_103, %c11_104, %c0_105] : memref<2x26x104xf32, #tpu.memory_space<vmem>>, vector<2x1x104xf32>
    %243 = vector.shape_cast %242 : vector<2x1x104xf32> to vector<2x104xf32>
    %244 = arith.truncf %243 : vector<2x104xf32> to vector<2x104xbf16>
    %c11_106 = arith.constant 11 : index
    %c0_107 = arith.constant 0 : index
    %c0_108 = arith.constant 0 : index
    %245 = vector.load %arg7[%c11_106, %c0_107, %c0_108] : memref<26x104x32xbf16, #tpu.memory_space<vmem>>, vector<1x104x32xbf16>
    %246 = vector.shape_cast %245 : vector<1x104x32xbf16> to vector<104x32xbf16>
    %cst_109 = arith.constant dense<0.000000e+00> : vector<2x32xf32>
    %247 = tpu.matmul %244, %246, %cst_109 {dimension_numbers = #tpu.dot_dimension_numbers<[1], [0], [0], [1], [0, 0, 1, 1], [], []>} : vector<2x104xbf16>, vector<104x32xbf16>, vector<2x32xf32> -> vector<2x32xf32>
    %c0_110 = arith.constant 0 : index
    %c12_111 = arith.constant 12 : index
    %c0_112 = arith.constant 0 : index
    %248 = vector.load %arg6[%c0_110, %c12_111, %c0_112] : memref<2x26x104xf32, #tpu.memory_space<vmem>>, vector<2x1x104xf32>
    %249 = vector.shape_cast %248 : vector<2x1x104xf32> to vector<2x104xf32>
    %250 = arith.truncf %249 : vector<2x104xf32> to vector<2x104xbf16>
    %c12_113 = arith.constant 12 : index
    %c0_114 = arith.constant 0 : index
    %c0_115 = arith.constant 0 : index
    %251 = vector.load %arg7[%c12_113, %c0_114, %c0_115] : memref<26x104x32xbf16, #tpu.memory_space<vmem>>, vector<1x104x32xbf16>
    %252 = vector.shape_cast %251 : vector<1x104x32xbf16> to vector<104x32xbf16>
    %cst_116 = arith.constant dense<0.000000e+00> : vector<2x32xf32>
    %253 = tpu.matmul %250, %252, %cst_116 {dimension_numbers = #tpu.dot_dimension_numbers<[1], [0], [0], [1], [0, 0, 1, 1], [], []>} : vector<2x104xbf16>, vector<104x32xbf16>, vector<2x32xf32> -> vector<2x32xf32>
    %c0_117 = arith.constant 0 : index
    %c13_118 = arith.constant 13 : index
    %c0_119 = arith.constant 0 : index
    %254 = vector.load %arg6[%c0_117, %c13_118, %c0_119] : memref<2x26x104xf32, #tpu.memory_space<vmem>>, vector<2x1x104xf32>
    %255 = vector.shape_cast %254 : vector<2x1x104xf32> to vector<2x104xf32>
    %256 = arith.truncf %255 : vector<2x104xf32> to vector<2x104xbf16>
    %c13_120 = arith.constant 13 : index
    %c0_121 = arith.constant 0 : index
    %c0_122 = arith.constant 0 : index
    %257 = vector.load %arg7[%c13_120, %c0_121, %c0_122] : memref<26x104x32xbf16, #tpu.memory_space<vmem>>, vector<1x104x32xbf16>
    %258 = vector.shape_cast %257 : vector<1x104x32xbf16> to vector<104x32xbf16>
    %cst_123 = arith.constant dense<0.000000e+00> : vector<2x32xf32>
    %259 = tpu.matmul %256, %258, %cst_123 {dimension_numbers = #tpu.dot_dimension_numbers<[1], [0], [0], [1], [0, 0, 1, 1], [], []>} : vector<2x104xbf16>, vector<104x32xbf16>, vector<2x32xf32> -> vector<2x32xf32>
    %c0_124 = arith.constant 0 : index
    %c14_125 = arith.constant 14 : index
    %c0_126 = arith.constant 0 : index
    %260 = vector.load %arg6[%c0_124, %c14_125, %c0_126] : memref<2x26x104xf32, #tpu.memory_space<vmem>>, vector<2x1x104xf32>
    %261 = vector.shape_cast %260 : vector<2x1x104xf32> to vector<2x104xf32>
    %262 = arith.truncf %261 : vector<2x104xf32> to vector<2x104xbf16>
    %c14_127 = arith.constant 14 : index
    %c0_128 = arith.constant 0 : index
    %c0_129 = arith.constant 0 : index
    %263 = vector.load %arg7[%c14_127, %c0_128, %c0_129] : memref<26x104x32xbf16, #tpu.memory_space<vmem>>, vector<1x104x32xbf16>
    %264 = vector.shape_cast %263 : vector<1x104x32xbf16> to vector<104x32xbf16>
    %cst_130 = arith.constant dense<0.000000e+00> : vector<2x32xf32>
    %265 = tpu.matmul %262, %264, %cst_130 {dimension_numbers = #tpu.dot_dimension_numbers<[1], [0], [0], [1], [0, 0, 1, 1], [], []>} : vector<2x104xbf16>, vector<104x32xbf16>, vector<2x32xf32> -> vector<2x32xf32>
    %c0_131 = arith.constant 0 : index
    %c15_132 = arith.constant 15 : index
    %c0_133 = arith.constant 0 : index
    %266 = vector.load %arg6[%c0_131, %c15_132, %c0_133] : memref<2x26x104xf32, #tpu.memory_space<vmem>>, vector<2x1x104xf32>
    %267 = vector.shape_cast %266 : vector<2x1x104xf32> to vector<2x104xf32>
    %268 = arith.truncf %267 : vector<2x104xf32> to vector<2x104xbf16>
    %c15_134 = arith.constant 15 : index
    %c0_135 = arith.constant 0 : index
    %c0_136 = arith.constant 0 : index
    %269 = vector.load %arg7[%c15_134, %c0_135, %c0_136] : memref<26x104x32xbf16, #tpu.memory_space<vmem>>, vector<1x104x32xbf16>
    %270 = vector.shape_cast %269 : vector<1x104x32xbf16> to vector<104x32xbf16>
    %cst_137 = arith.constant dense<0.000000e+00> : vector<2x32xf32>
    %271 = tpu.matmul %268, %270, %cst_137 {dimension_numbers = #tpu.dot_dimension_numbers<[1], [0], [0], [1], [0, 0, 1, 1], [], []>} : vector<2x104xbf16>, vector<104x32xbf16>, vector<2x32xf32> -> vector<2x32xf32>
    %c0_138 = arith.constant 0 : index
    %c16_139 = arith.constant 16 : index
    %c0_140 = arith.constant 0 : index
    %272 = vector.load %arg6[%c0_138, %c16_139, %c0_140] : memref<2x26x104xf32, #tpu.memory_space<vmem>>, vector<2x1x104xf32>
    %273 = vector.shape_cast %272 : vector<2x1x104xf32> to vector<2x104xf32>
    %274 = arith.truncf %273 : vector<2x104xf32> to vector<2x104xbf16>
    %c16_141 = arith.constant 16 : index
    %c0_142 = arith.constant 0 : index
    %c0_143 = arith.constant 0 : index
    %275 = vector.load %arg7[%c16_141, %c0_142, %c0_143] : memref<26x104x32xbf16, #tpu.memory_space<vmem>>, vector<1x104x32xbf16>
    %276 = vector.shape_cast %275 : vector<1x104x32xbf16> to vector<104x32xbf16>
    %cst_144 = arith.constant dense<0.000000e+00> : vector<2x32xf32>
    %277 = tpu.matmul %274, %276, %cst_144 {dimension_numbers = #tpu.dot_dimension_numbers<[1], [0], [0], [1], [0, 0, 1, 1], [], []>} : vector<2x104xbf16>, vector<104x32xbf16>, vector<2x32xf32> -> vector<2x32xf32>
    %c0_145 = arith.constant 0 : index
    %c17_146 = arith.constant 17 : index
    %c0_147 = arith.constant 0 : index
    %278 = vector.load %arg6[%c0_145, %c17_146, %c0_147] : memref<2x26x104xf32, #tpu.memory_space<vmem>>, vector<2x1x104xf32>
    %279 = vector.shape_cast %278 : vector<2x1x104xf32> to vector<2x104xf32>
    %280 = arith.truncf %279 : vector<2x104xf32> to vector<2x104xbf16>
    %c17_148 = arith.constant 17 : index
    %c0_149 = arith.constant 0 : index
    %c0_150 = arith.constant 0 : index
    %281 = vector.load %arg7[%c17_148, %c0_149, %c0_150] : memref<26x104x32xbf16, #tpu.memory_space<vmem>>, vector<1x104x32xbf16>
    %282 = vector.shape_cast %281 : vector<1x104x32xbf16> to vector<104x32xbf16>
    %cst_151 = arith.constant dense<0.000000e+00> : vector<2x32xf32>
    %283 = tpu.matmul %280, %282, %cst_151 {dimension_numbers = #tpu.dot_dimension_numbers<[1], [0], [0], [1], [0, 0, 1, 1], [], []>} : vector<2x104xbf16>, vector<104x32xbf16>, vector<2x32xf32> -> vector<2x32xf32>
    %c0_152 = arith.constant 0 : index
    %c18_153 = arith.constant 18 : index
    %c0_154 = arith.constant 0 : index
    %284 = vector.load %arg6[%c0_152, %c18_153, %c0_154] : memref<2x26x104xf32, #tpu.memory_space<vmem>>, vector<2x1x104xf32>
    %285 = vector.shape_cast %284 : vector<2x1x104xf32> to vector<2x104xf32>
    %286 = arith.truncf %285 : vector<2x104xf32> to vector<2x104xbf16>
    %c18_155 = arith.constant 18 : index
    %c0_156 = arith.constant 0 : index
    %c0_157 = arith.constant 0 : index
    %287 = vector.load %arg7[%c18_155, %c0_156, %c0_157] : memref<26x104x32xbf16, #tpu.memory_space<vmem>>, vector<1x104x32xbf16>
    %288 = vector.shape_cast %287 : vector<1x104x32xbf16> to vector<104x32xbf16>
    %cst_158 = arith.constant dense<0.000000e+00> : vector<2x32xf32>
    %289 = tpu.matmul %286, %288, %cst_158 {dimension_numbers = #tpu.dot_dimension_numbers<[1], [0], [0], [1], [0, 0, 1, 1], [], []>} : vector<2x104xbf16>, vector<104x32xbf16>, vector<2x32xf32> -> vector<2x32xf32>
    %c0_159 = arith.constant 0 : index
    %c19_160 = arith.constant 19 : index
    %c0_161 = arith.constant 0 : index
    %290 = vector.load %arg6[%c0_159, %c19_160, %c0_161] : memref<2x26x104xf32, #tpu.memory_space<vmem>>, vector<2x1x104xf32>
    %291 = vector.shape_cast %290 : vector<2x1x104xf32> to vector<2x104xf32>
    %292 = arith.truncf %291 : vector<2x104xf32> to vector<2x104xbf16>
    %c19_162 = arith.constant 19 : index
    %c0_163 = arith.constant 0 : index
    %c0_164 = arith.constant 0 : index
    %293 = vector.load %arg7[%c19_162, %c0_163, %c0_164] : memref<26x104x32xbf16, #tpu.memory_space<vmem>>, vector<1x104x32xbf16>
    %294 = vector.shape_cast %293 : vector<1x104x32xbf16> to vector<104x32xbf16>
    %cst_165 = arith.constant dense<0.000000e+00> : vector<2x32xf32>
    %295 = tpu.matmul %292, %294, %cst_165 {dimension_numbers = #tpu.dot_dimension_numbers<[1], [0], [0], [1], [0, 0, 1, 1], [], []>} : vector<2x104xbf16>, vector<104x32xbf16>, vector<2x32xf32> -> vector<2x32xf32>
    %c0_166 = arith.constant 0 : index
    %c20_167 = arith.constant 20 : index
    %c0_168 = arith.constant 0 : index
    %296 = vector.load %arg6[%c0_166, %c20_167, %c0_168] : memref<2x26x104xf32, #tpu.memory_space<vmem>>, vector<2x1x104xf32>
    %297 = vector.shape_cast %296 : vector<2x1x104xf32> to vector<2x104xf32>
    %298 = arith.truncf %297 : vector<2x104xf32> to vector<2x104xbf16>
    %c20_169 = arith.constant 20 : index
    %c0_170 = arith.constant 0 : index
    %c0_171 = arith.constant 0 : index
    %299 = vector.load %arg7[%c20_169, %c0_170, %c0_171] : memref<26x104x32xbf16, #tpu.memory_space<vmem>>, vector<1x104x32xbf16>
    %300 = vector.shape_cast %299 : vector<1x104x32xbf16> to vector<104x32xbf16>
    %cst_172 = arith.constant dense<0.000000e+00> : vector<2x32xf32>
    %301 = tpu.matmul %298, %300, %cst_172 {dimension_numbers = #tpu.dot_dimension_numbers<[1], [0], [0], [1], [0, 0, 1, 1], [], []>} : vector<2x104xbf16>, vector<104x32xbf16>, vector<2x32xf32> -> vector<2x32xf32>
    %c0_173 = arith.constant 0 : index
    %c21_174 = arith.constant 21 : index
    %c0_175 = arith.constant 0 : index
    %302 = vector.load %arg6[%c0_173, %c21_174, %c0_175] : memref<2x26x104xf32, #tpu.memory_space<vmem>>, vector<2x1x104xf32>
    %303 = vector.shape_cast %302 : vector<2x1x104xf32> to vector<2x104xf32>
    %304 = arith.truncf %303 : vector<2x104xf32> to vector<2x104xbf16>
    %c21_176 = arith.constant 21 : index
    %c0_177 = arith.constant 0 : index
    %c0_178 = arith.constant 0 : index
    %305 = vector.load %arg7[%c21_176, %c0_177, %c0_178] : memref<26x104x32xbf16, #tpu.memory_space<vmem>>, vector<1x104x32xbf16>
    %306 = vector.shape_cast %305 : vector<1x104x32xbf16> to vector<104x32xbf16>
    %cst_179 = arith.constant dense<0.000000e+00> : vector<2x32xf32>
    %307 = tpu.matmul %304, %306, %cst_179 {dimension_numbers = #tpu.dot_dimension_numbers<[1], [0], [0], [1], [0, 0, 1, 1], [], []>} : vector<2x104xbf16>, vector<104x32xbf16>, vector<2x32xf32> -> vector<2x32xf32>
    %c0_180 = arith.constant 0 : index
    %c22_181 = arith.constant 22 : index
    %c0_182 = arith.constant 0 : index
    %308 = vector.load %arg6[%c0_180, %c22_181, %c0_182] : memref<2x26x104xf32, #tpu.memory_space<vmem>>, vector<2x1x104xf32>
    %309 = vector.shape_cast %308 : vector<2x1x104xf32> to vector<2x104xf32>
    %310 = arith.truncf %309 : vector<2x104xf32> to vector<2x104xbf16>
    %c22_183 = arith.constant 22 : index
    %c0_184 = arith.constant 0 : index
    %c0_185 = arith.constant 0 : index
    %311 = vector.load %arg7[%c22_183, %c0_184, %c0_185] : memref<26x104x32xbf16, #tpu.memory_space<vmem>>, vector<1x104x32xbf16>
    %312 = vector.shape_cast %311 : vector<1x104x32xbf16> to vector<104x32xbf16>
    %cst_186 = arith.constant dense<0.000000e+00> : vector<2x32xf32>
    %313 = tpu.matmul %310, %312, %cst_186 {dimension_numbers = #tpu.dot_dimension_numbers<[1], [0], [0], [1], [0, 0, 1, 1], [], []>} : vector<2x104xbf16>, vector<104x32xbf16>, vector<2x32xf32> -> vector<2x32xf32>
    %c0_187 = arith.constant 0 : index
    %c23_188 = arith.constant 23 : index
    %c0_189 = arith.constant 0 : index
    %314 = vector.load %arg6[%c0_187, %c23_188, %c0_189] : memref<2x26x104xf32, #tpu.memory_space<vmem>>, vector<2x1x104xf32>
    %315 = vector.shape_cast %314 : vector<2x1x104xf32> to vector<2x104xf32>
    %316 = arith.truncf %315 : vector<2x104xf32> to vector<2x104xbf16>
    %c23_190 = arith.constant 23 : index
    %c0_191 = arith.constant 0 : index
    %c0_192 = arith.constant 0 : index
    %317 = vector.load %arg7[%c23_190, %c0_191, %c0_192] : memref<26x104x32xbf16, #tpu.memory_space<vmem>>, vector<1x104x32xbf16>
    %318 = vector.shape_cast %317 : vector<1x104x32xbf16> to vector<104x32xbf16>
    %cst_193 = arith.constant dense<0.000000e+00> : vector<2x32xf32>
    %319 = tpu.matmul %316, %318, %cst_193 {dimension_numbers = #tpu.dot_dimension_numbers<[1], [0], [0], [1], [0, 0, 1, 1], [], []>} : vector<2x104xbf16>, vector<104x32xbf16>, vector<2x32xf32> -> vector<2x32xf32>
    %c0_194 = arith.constant 0 : index
    %c24_195 = arith.constant 24 : index
    %c0_196 = arith.constant 0 : index
    %320 = vector.load %arg6[%c0_194, %c24_195, %c0_196] : memref<2x26x104xf32, #tpu.memory_space<vmem>>, vector<2x1x104xf32>
    %321 = vector.shape_cast %320 : vector<2x1x104xf32> to vector<2x104xf32>
    %322 = arith.truncf %321 : vector<2x104xf32> to vector<2x104xbf16>
    %c24_197 = arith.constant 24 : index
    %c0_198 = arith.constant 0 : index
    %c0_199 = arith.constant 0 : index
    %323 = vector.load %arg7[%c24_197, %c0_198, %c0_199] : memref<26x104x32xbf16, #tpu.memory_space<vmem>>, vector<1x104x32xbf16>
    %324 = vector.shape_cast %323 : vector<1x104x32xbf16> to vector<104x32xbf16>
    %cst_200 = arith.constant dense<0.000000e+00> : vector<2x32xf32>
    %325 = tpu.matmul %322, %324, %cst_200 {dimension_numbers = #tpu.dot_dimension_numbers<[1], [0], [0], [1], [0, 0, 1, 1], [], []>} : vector<2x104xbf16>, vector<104x32xbf16>, vector<2x32xf32> -> vector<2x32xf32>
    %c0_201 = arith.constant 0 : index
    %c25_202 = arith.constant 25 : index
    %c0_203 = arith.constant 0 : index
    %326 = vector.load %arg6[%c0_201, %c25_202, %c0_203] : memref<2x26x104xf32, #tpu.memory_space<vmem>>, vector<2x1x104xf32>
    %327 = vector.shape_cast %326 : vector<2x1x104xf32> to vector<2x104xf32>
    %328 = arith.truncf %327 : vector<2x104xf32> to vector<2x104xbf16>
    %c25_204 = arith.constant 25 : index
    %c0_205 = arith.constant 0 : index
    %c0_206 = arith.constant 0 : index
    %329 = vector.load %arg7[%c25_204, %c0_205, %c0_206] : memref<26x104x32xbf16, #tpu.memory_space<vmem>>, vector<1x104x32xbf16>
    %330 = vector.shape_cast %329 : vector<1x104x32xbf16> to vector<104x32xbf16>
    %cst_207 = arith.constant dense<0.000000e+00> : vector<2x32xf32>
    %331 = tpu.matmul %328, %330, %cst_207 {dimension_numbers = #tpu.dot_dimension_numbers<[1], [0], [0], [1], [0, 0, 1, 1], [], []>} : vector<2x104xbf16>, vector<104x32xbf16>, vector<2x32xf32> -> vector<2x32xf32>
    %332 = arith.addf %181, %187 : vector<2x32xf32>
    %333 = arith.addf %193, %199 : vector<2x32xf32>
    %334 = arith.addf %205, %211 : vector<2x32xf32>
    %335 = arith.addf %217, %223 : vector<2x32xf32>
    %336 = arith.addf %229, %235 : vector<2x32xf32>
    %337 = arith.addf %241, %247 : vector<2x32xf32>
    %338 = arith.addf %253, %259 : vector<2x32xf32>
    %339 = arith.addf %265, %271 : vector<2x32xf32>
    %340 = arith.addf %277, %283 : vector<2x32xf32>
    %341 = arith.addf %289, %295 : vector<2x32xf32>
    %342 = arith.addf %301, %307 : vector<2x32xf32>
    %343 = arith.addf %313, %319 : vector<2x32xf32>
    %344 = arith.addf %325, %331 : vector<2x32xf32>
    %345 = arith.addf %332, %333 : vector<2x32xf32>
    %346 = arith.addf %334, %335 : vector<2x32xf32>
    %347 = arith.addf %336, %337 : vector<2x32xf32>
    %348 = arith.addf %338, %339 : vector<2x32xf32>
    %349 = arith.addf %340, %341 : vector<2x32xf32>
    %350 = arith.addf %342, %343 : vector<2x32xf32>
    %351 = arith.addf %345, %346 : vector<2x32xf32>
    %352 = arith.addf %347, %348 : vector<2x32xf32>
    %353 = arith.addf %349, %350 : vector<2x32xf32>
    %354 = arith.addf %351, %352 : vector<2x32xf32>
    %355 = arith.addf %353, %344 : vector<2x32xf32>
    %356 = arith.addf %354, %355 : vector<2x32xf32>
    %c0_208 = arith.constant 0 : index
    %c0_209 = arith.constant 0 : index
    %357 = vector.load %arg4[%c0_208, %c0_209] : memref<1x32xf32, #tpu.memory_space<vmem>>, vector<1x32xf32>
    %358 = vector.broadcast %357 : vector<1x32xf32> to vector<2x32xf32>
    %359 = arith.addf %356, %358 : vector<2x32xf32>
    %cst_210 = arith.constant 0.000000e+00 : f32
    %360 = vector.broadcast %cst_210 : f32 to vector<2x32xf32>
    %361 = arith.maximumf %359, %360 : vector<2x32xf32>
    %c0_211 = arith.constant 0 : index
    %c0_212 = arith.constant 0 : index
    %362 = vector.load %arg5[%c0_211, %c0_212] : memref<2x32xf32, #tpu.memory_space<vmem>>, vector<2x32xf32>
    tpu.vector_store %arg5[%c0_211, %c0_212], %361 {strides = array<i32>} : memref<2x32xf32, #tpu.memory_space<vmem>>, vector<2x32xf32>,
    return
  }
}

</mosaic_0001>

<bundles_post_ra>
// kernel: fused_forward.1
= control target key start
LH: loop header
LB: loop body
LE: loop exit
PB: predicated region body
PF: predicated region fallthrough
CT: control target
= control target key end

     0   :  { %10 = vsyncpa [#allocation7], 0  ;;  %s9142_s0 = inlined_call_operand.vmem [shape: f32[2,28,28], index: 0, kind: input, shape index: {}]   ;;  %s9143_s1 = inlined_call_operand.vmem [shape: f32[36], index: 1, kind: input, shape index: {}]   ;;  %s9144_s2 = inlined_call_operand.vmem [shape: f32[4], index: 2, kind: input, shape index: {}]   ;;  %s9145_s3 = inlined_call_operand.vmem [shape: bf16[26,104,32], index: 3, kind: input, shape index: {}]   ;;  %s9146_s4 = inlined_call_operand.vmem [shape: f32[1,32], index: 4, kind: input, shape index: {}]   ;;  %s9147_s5 = inlined_call_operand.hbm [shape: f32[2,32], index: 5, kind: output, shape index: {}]  }
   0x1   :  { %11 = vsyncpa [#allocation9], 0 }
   0x2   :  { %12 = vsyncpa [#allocation6], 0  ;;  %s21_s20 = sshll.u32 %s9143_s1, 4  ;;  %s31_s23 = sshll.u32 %s9144_s2, 4  ;;  %s22_s20 = int_to_ptr.vmem [resolvable:$true] %s21_s20  ;;  %s32_s23 = int_to_ptr.vmem [resolvable:$true] %s31_s23 }
   0x3   :  { %s6540_s24 = scalar_lea.vmem %s22_s20, 16  ;;  %p6545_p1 = scmp.lt.s32.totalorder %s22_s20, %s22_s20 }
   0x4   :  { %p6541_p0 = scmp.ne.s32.totalorder %s22_s20, %s6540_s24  ;;  %p6546_p2 = scmp.lt.s32.totalorder %s6540_s24, %s6540_s24 }
   0x6   :  { %p6547_p3 = por %p6546_p2, %p6545_p1 }
   0x8   :  { %p6548_p4 = pnand %p6547_p3, %p6541_p0 }
   0xa   :  { %6551 = shalt.err (!%p6548_p4)
}
   0xb   :  { %s6594_s25 = smov [#allocation5]   ;;  %s6552_s26 = scalar_lea.vmem %s32_s23, 16 }
   0xc   :  { %24 = dma.vmem_to_smem %s22_s20, 16, %s6594_s25, [#allocation7]  }
   0xd   :  { %p6553_p5 = scmp.ne.s32.totalorder %s32_s23, %s6552_s26  ;;  %p6557_p6 = scmp.lt.s32.totalorder %s32_s23, %s32_s23 }
   0xe   :  { %p6558_p7 = scmp.lt.s32.totalorder %s6552_s26, %s6552_s26 }
  0x10   :  { %p6559_p8 = por %p6558_p7, %p6557_p6 }
  0x12   :  { %p6560_p9 = pnand %p6559_p8, %p6553_p5 }
  0x14   :  { %6563 = shalt.err (!%p6560_p9)
}
  0x15   :  { %s6595_s1 = smov [#allocation8]  }
  0x16   :  { %34 = dma.vmem_to_smem %s32_s23, 16, %s6595_s1, [#allocation9]  }
  0x17   :  { %6586 = dma.done.wait [#allocation7], 16  }
  0x18   :  { %6587 = vsyncadd [#allocation7], 4294967280 }
  0x19   :  { %6588 = dma.done.wait [#allocation9], 16  }
  0x1a   :  { %6589 = vsyncadd [#allocation9], 4294967280 }
  0x1b   :  { %43 = sfence }
  0x1c   :  { %v77_v0 = vld [vmem:[%s9145_s3] sm:$0xff]  ;;  %v79_v1 = vld [vmem:[%s9145_s3 + $0x8] sm:$0xff]  ;;  %v81_v2 = vld [vmem:[%s9145_s3 + $0x10] sm:$0xff]  ;;  %s5420_s15 = sld [smem:[#allocation5 + $0x1]] }
  0x1d   :  { %78 = vst [vmem:[#allocation3] sm:$0xff] %v77_v0  ;;  %80 = vst [vmem:[#allocation3 + $0x8] sm:$0xff] %v79_v1  ;;  %v83_v3 = vld [vmem:[%s9145_s3 + $0x18] sm:$0xff]  ;;  %v85_v4 = vld [vmem:[%s9145_s3 + $0x20] sm:$0xff] }
  0x1e   :  { %82 = vst [vmem:[#allocation3 + $0x10] sm:$0xff] %v81_v2  ;;  %v87_v5 = vld [vmem:[%s9145_s3 + $0x28] sm:$0xff]  ;;  %84 = vst [vmem:[#allocation3 + $0x18] sm:$0xff] %v83_v3  ;;  %v89_v6 = vld [vmem:[%s9145_s3 + $0x30] sm:$0xff] }
  0x1f   :  { %86 = vst [vmem:[#allocation3 + $0x20] sm:$0xff] %v85_v4  ;;  %88 = vst [vmem:[#allocation3 + $0x28] sm:$0xff] %v87_v5  ;;  %v91_v7 = vld [vmem:[%s9145_s3 + $0x38] sm:$0xff]  ;;  %v93_v8 = vld [vmem:[%s9145_s3 + $0x40] sm:$0xff] }
  0x20   :  { %90 = vst [vmem:[#allocation3 + $0x30] sm:$0xff] %v89_v6  ;;  %92 = vst [vmem:[#allocation3 + $0x38] sm:$0xff] %v91_v7  ;;  %v95_v9 = vld [vmem:[%s9145_s3 + $0x48] sm:$0xff]  ;;  %v97_v10 = vld [vmem:[%s9145_s3 + $0x50] sm:$0xff] }
  0x21   :  { %94 = vst [vmem:[#allocation3 + $0x40] sm:$0xff] %v93_v8  ;;  %v99_v11 = vld [vmem:[%s9145_s3 + $0x58] sm:$0xff]  ;;  %96 = vst [vmem:[#allocation3 + $0x48] sm:$0xff] %v95_v9  ;;  %v101_v12 = vld [vmem:[%s9145_s3 + $0x60] sm:$0xff] }
  0x22   :  { %98 = vst [vmem:[#allocation3 + $0x50] sm:$0xff] %v97_v10  ;;  %100 = vst [vmem:[#allocation3 + $0x58] sm:$0xff] %v99_v11  ;;  %v103_v13 = vld [vmem:[%s9145_s3 + $0x68] sm:$0xff]  ;;  %v105_v14 = vld [vmem:[%s9145_s3 + $0x70] sm:$0xff] }
  0x23   :  { %102 = vst [vmem:[#allocation3 + $0x60] sm:$0xff] %v101_v12  ;;  %104 = vst [vmem:[#allocation3 + $0x68] sm:$0xff] %v103_v13  ;;  %v107_v15 = vld [vmem:[%s9145_s3 + $0x78] sm:$0xff]  ;;  %v109_v16 = vld [vmem:[%s9145_s3 + $0x80] sm:$0xff] }
  0x24   :  { %106 = vst [vmem:[#allocation3 + $0x70] sm:$0xff] %v105_v14  ;;  %v111_v17 = vld [vmem:[%s9145_s3 + $0x88] sm:$0xff]  ;;  %108 = vst [vmem:[#allocation3 + $0x78] sm:$0xff] %v107_v15  ;;  %v113_v18 = vld [vmem:[%s9145_s3 + $0x90] sm:$0xff] }
  0x25   :  { %110 = vst [vmem:[#allocation3 + $0x80] sm:$0xff] %v109_v16  ;;  %112 = vst [vmem:[#allocation3 + $0x88] sm:$0xff] %v111_v17  ;;  %v115_v19 = vld [vmem:[%s9145_s3 + $0x98] sm:$0xff]  ;;  %v117_v20 = vld [vmem:[%s9145_s3 + $0xa0] sm:$0xff] }
  0x26   :  { %114 = vst [vmem:[#allocation3 + $0x90] sm:$0xff] %v113_v18  ;;  %116 = vst [vmem:[#allocation3 + $0x98] sm:$0xff] %v115_v19  ;;  %v119_v21 = vld [vmem:[%s9145_s3 + $0xa8] sm:$0xff]  ;;  %v121_v22 = vld [vmem:[%s9145_s3 + $0xb0] sm:$0xff] }
  0x27   :  { %118 = vst [vmem:[#allocation3 + $0xa0] sm:$0xff] %v117_v20  ;;  %v123_v23 = vld [vmem:[%s9145_s3 + $0xb8] sm:$0xff]  ;;  %120 = vst [vmem:[#allocation3 + $0xa8] sm:$0xff] %v119_v21  ;;  %v125_v24 = vld [vmem:[%s9145_s3 + $0xc0] sm:$0xff] }
  0x28   :  { %122 = vst [vmem:[#allocation3 + $0xb0] sm:$0xff] %v121_v22  ;;  %124 = vst [vmem:[#allocation3 + $0xb8] sm:$0xff] %v123_v23  ;;  %v127_v25 = vld [vmem:[%s9145_s3 + $0xc8] sm:$0xff]  ;;  %v129_v26 = vld [vmem:[%s9145_s3 + $0xd0] sm:$0xff] }
  0x29   :  { %126 = vst [vmem:[#allocation3 + $0xc0] sm:$0xff] %v125_v24  ;;  %128 = vst [vmem:[#allocation3 + $0xc8] sm:$0xff] %v127_v25  ;;  %v131_v27 = vld [vmem:[%s9145_s3 + $0xd8] sm:$0xff]  ;;  %v133_v28 = vld [vmem:[%s9145_s3 + $0xe0] sm:$0xff] }
  0x2a   :  { %130 = vst [vmem:[#allocation3 + $0xd0] sm:$0xff] %v129_v26  ;;  %v135_v29 = vld [vmem:[%s9145_s3 + $0xe8] sm:$0xff]  ;;  %132 = vst [vmem:[#allocation3 + $0xd8] sm:$0xff] %v131_v27  ;;  %v137_v30 = vld [vmem:[%s9145_s3 + $0xf0] sm:$0xff] }
  0x2b   :  { %134 = vst [vmem:[#allocation3 + $0xe0] sm:$0xff] %v133_v28  ;;  %136 = vst [vmem:[#allocation3 + $0xe8] sm:$0xff] %v135_v29  ;;  %v139_v31 = vld [vmem:[%s9145_s3 + $0xf8] sm:$0xff]  ;;  %v141_v32 = vld [vmem:[%s9145_s3 + $0x100] sm:$0xff] }
  0x2c   :  { %138 = vst [vmem:[#allocation3 + $0xf0] sm:$0xff] %v137_v30  ;;  %140 = vst [vmem:[#allocation3 + $0xf8] sm:$0xff] %v139_v31  ;;  %v143_v33 = vld [vmem:[%s9145_s3 + $0x108] sm:$0xff]  ;;  %v145_v34 = vld [vmem:[%s9145_s3 + $0x110] sm:$0xff] }
  0x2d   :  { %142 = vst [vmem:[#allocation3 + $0x100] sm:$0xff] %v141_v32  ;;  %v147_v35 = vld [vmem:[%s9145_s3 + $0x118] sm:$0xff]  ;;  %144 = vst [vmem:[#allocation3 + $0x108] sm:$0xff] %v143_v33  ;;  %v149_v36 = vld [vmem:[%s9145_s3 + $0x120] sm:$0xff] }
  0x2e   :  { %146 = vst [vmem:[#allocation3 + $0x110] sm:$0xff] %v145_v34  ;;  %148 = vst [vmem:[#allocation3 + $0x118] sm:$0xff] %v147_v35  ;;  %v151_v37 = vld [vmem:[%s9145_s3 + $0x128] sm:$0xff]  ;;  %v153_v38 = vld [vmem:[%s9145_s3 + $0x130] sm:$0xff] }
  0x2f   :  { %150 = vst [vmem:[#allocation3 + $0x120] sm:$0xff] %v149_v36  ;;  %152 = vst [vmem:[#allocation3 + $0x128] sm:$0xff] %v151_v37  ;;  %v155_v39 = vld [vmem:[%s9145_s3 + $0x138] sm:$0xff]  ;;  %v157_v40 = vld [vmem:[%s9145_s3 + $0x140] sm:$0xff] }
  0x30   :  { %154 = vst [vmem:[#allocation3 + $0x130] sm:$0xff] %v153_v38  ;;  %v159_v41 = vld [vmem:[%s9145_s3 + $0x148] sm:$0xff]  ;;  %156 = vst [vmem:[#allocation3 + $0x138] sm:$0xff] %v155_v39  ;;  %v161_v42 = vld [vmem:[%s9145_s3 + $0x150] sm:$0xff] }
  0x31   :  { %158 = vst [vmem:[#allocation3 + $0x140] sm:$0xff] %v157_v40  ;;  %160 = vst [vmem:[#allocation3 + $0x148] sm:$0xff] %v159_v41  ;;  %v163_v43 = vld [vmem:[%s9145_s3 + $0x158] sm:$0xff]  ;;  %v165_v44 = vld [vmem:[%s9145_s3 + $0x160] sm:$0xff] }
  0x32   :  { %162 = vst [vmem:[#allocation3 + $0x150] sm:$0xff] %v161_v42  ;;  %164 = vst [vmem:[#allocation3 + $0x158] sm:$0xff] %v163_v43  ;;  %v167_v45 = vld [vmem:[%s9145_s3 + $0x168] sm:$0xff]  ;;  %v169_v46 = vld [vmem:[%s9145_s3 + $0x170] sm:$0xff] }
  0x33   :  { %166 = vst [vmem:[#allocation3 + $0x160] sm:$0xff] %v165_v44  ;;  %v171_v47 = vld [vmem:[%s9145_s3 + $0x178] sm:$0xff]  ;;  %168 = vst [vmem:[#allocation3 + $0x168] sm:$0xff] %v167_v45  ;;  %v173_v48 = vld [vmem:[%s9145_s3 + $0x180] sm:$0xff] }
  0x34   :  { %170 = vst [vmem:[#allocation3 + $0x170] sm:$0xff] %v169_v46  ;;  %172 = vst [vmem:[#allocation3 + $0x178] sm:$0xff] %v171_v47  ;;  %v175_v49 = vld [vmem:[%s9145_s3 + $0x188] sm:$0xff]  ;;  %v177_v50 = vld [vmem:[%s9145_s3 + $0x190] sm:$0xff] }
  0x35   :  { %174 = vst [vmem:[#allocation3 + $0x180] sm:$0xff] %v173_v48  ;;  %176 = vst [vmem:[#allocation3 + $0x188] sm:$0xff] %v175_v49  ;;  %v179_v51 = vld [vmem:[%s9145_s3 + $0x198] sm:$0xff]  ;;  %v181_v52 = vld [vmem:[%s9145_s3 + $0x1a0] sm:$0xff] }
  0x36   :  { %178 = vst [vmem:[#allocation3 + $0x190] sm:$0xff] %v177_v50  ;;  %v183_v53 = vld [vmem:[%s9145_s3 + $0x1a8] sm:$0xff]  ;;  %180 = vst [vmem:[#allocation3 + $0x198] sm:$0xff] %v179_v51  ;;  %v185_v54 = vld [vmem:[%s9145_s3 + $0x1b0] sm:$0xff] }
  0x37   :  { %182 = vst [vmem:[#allocation3 + $0x1a0] sm:$0xff] %v181_v52  ;;  %184 = vst [vmem:[#allocation3 + $0x1a8] sm:$0xff] %v183_v53  ;;  %v187_v55 = vld [vmem:[%s9145_s3 + $0x1b8] sm:$0xff]  ;;  %v189_v56 = vld [vmem:[%s9145_s3 + $0x1c0] sm:$0xff] }
  0x38   :  { %186 = vst [vmem:[#allocation3 + $0x1b0] sm:$0xff] %v185_v54  ;;  %188 = vst [vmem:[#allocation3 + $0x1b8] sm:$0xff] %v187_v55  ;;  %v191_v57 = vld [vmem:[%s9145_s3 + $0x1c8] sm:$0xff]  ;;  %v193_v58 = vld [vmem:[%s9145_s3 + $0x1d0] sm:$0xff] }
  0x39   :  { %190 = vst [vmem:[#allocation3 + $0x1c0] sm:$0xff] %v189_v56  ;;  %v195_v59 = vld [vmem:[%s9145_s3 + $0x1d8] sm:$0xff]  ;;  %192 = vst [vmem:[#allocation3 + $0x1c8] sm:$0xff] %v191_v57  ;;  %v197_v60 = vld [vmem:[%s9145_s3 + $0x1e0] sm:$0xff] }
  0x3a   :  { %194 = vst [vmem:[#allocation3 + $0x1d0] sm:$0xff] %v193_v58  ;;  %196 = vst [vmem:[#allocation3 + $0x1d8] sm:$0xff] %v195_v59  ;;  %v199_v61 = vld [vmem:[%s9145_s3 + $0x1e8] sm:$0xff]  ;;  %v201_v62 = vld [vmem:[%s9145_s3 + $0x1f0] sm:$0xff] }
  0x3b   :  { %198 = vst [vmem:[#allocation3 + $0x1e0] sm:$0xff] %v197_v60  ;;  %200 = vst [vmem:[#allocation3 + $0x1e8] sm:$0xff] %v199_v61  ;;  %v203_v63 = vld [vmem:[%s9145_s3 + $0x1f8] sm:$0xff]  ;;  %v205_v0 = vld [vmem:[%s9145_s3 + $0x200] sm:$0xff] }
  0x3c   :  { %202 = vst [vmem:[#allocation3 + $0x1f0] sm:$0xff] %v201_v62  ;;  %v207_v1 = vld [vmem:[%s9145_s3 + $0x208] sm:$0xff]  ;;  %204 = vst [vmem:[#allocation3 + $0x1f8] sm:$0xff] %v203_v63  ;;  %v209_v2 = vld [vmem:[%s9145_s3 + $0x210] sm:$0xff] }
  0x3d   :  { %206 = vst [vmem:[#allocation3 + $0x200] sm:$0xff] %v205_v0  ;;  %208 = vst [vmem:[#allocation3 + $0x208] sm:$0xff] %v207_v1  ;;  %v211_v3 = vld [vmem:[%s9145_s3 + $0x218] sm:$0xff]  ;;  %v213_v4 = vld [vmem:[%s9145_s3 + $0x220] sm:$0xff] }
  0x3e   :  { %210 = vst [vmem:[#allocation3 + $0x210] sm:$0xff] %v209_v2  ;;  %212 = vst [vmem:[#allocation3 + $0x218] sm:$0xff] %v211_v3  ;;  %v215_v5 = vld [vmem:[%s9145_s3 + $0x228] sm:$0xff]  ;;  %v217_v6 = vld [vmem:[%s9145_s3 + $0x230] sm:$0xff] }
  0x3f   :  { %214 = vst [vmem:[#allocation3 + $0x220] sm:$0xff] %v213_v4  ;;  %v219_v7 = vld [vmem:[%s9145_s3 + $0x238] sm:$0xff]  ;;  %216 = vst [vmem:[#allocation3 + $0x228] sm:$0xff] %v215_v5  ;;  %v221_v8 = vld [vmem:[%s9145_s3 + $0x240] sm:$0xff] }
  0x40   :  { %218 = vst [vmem:[#allocation3 + $0x230] sm:$0xff] %v217_v6  ;;  %220 = vst [vmem:[#allocation3 + $0x238] sm:$0xff] %v219_v7  ;;  %v223_v9 = vld [vmem:[%s9145_s3 + $0x248] sm:$0xff]  ;;  %v225_v10 = vld [vmem:[%s9145_s3 + $0x250] sm:$0xff] }
  0x41   :  { %222 = vst [vmem:[#allocation3 + $0x240] sm:$0xff] %v221_v8  ;;  %224 = vst [vmem:[#allocation3 + $0x248] sm:$0xff] %v223_v9  ;;  %v227_v11 = vld [vmem:[%s9145_s3 + $0x258] sm:$0xff]  ;;  %v229_v12 = vld [vmem:[%s9145_s3 + $0x260] sm:$0xff] }
  0x42   :  { %226 = vst [vmem:[#allocation3 + $0x250] sm:$0xff] %v225_v10  ;;  %v231_v13 = vld [vmem:[%s9145_s3 + $0x268] sm:$0xff]  ;;  %228 = vst [vmem:[#allocation3 + $0x258] sm:$0xff] %v227_v11  ;;  %v233_v14 = vld [vmem:[%s9145_s3 + $0x270] sm:$0xff] }
  0x43   :  { %230 = vst [vmem:[#allocation3 + $0x260] sm:$0xff] %v229_v12  ;;  %232 = vst [vmem:[#allocation3 + $0x268] sm:$0xff] %v231_v13  ;;  %v235_v15 = vld [vmem:[%s9145_s3 + $0x278] sm:$0xff]  ;;  %v237_v16 = vld [vmem:[%s9145_s3 + $0x280] sm:$0xff] }
  0x44   :  { %234 = vst [vmem:[#allocation3 + $0x270] sm:$0xff] %v233_v14  ;;  %236 = vst [vmem:[#allocation3 + $0x278] sm:$0xff] %v235_v15  ;;  %v239_v17 = vld [vmem:[%s9145_s3 + $0x288] sm:$0xff]  ;;  %v241_v18 = vld [vmem:[%s9145_s3 + $0x290] sm:$0xff] }
  0x45   :  { %238 = vst [vmem:[#allocation3 + $0x280] sm:$0xff] %v237_v16  ;;  %v243_v19 = vld [vmem:[%s9145_s3 + $0x298] sm:$0xff]  ;;  %240 = vst [vmem:[#allocation3 + $0x288] sm:$0xff] %v239_v17  ;;  %v245_v20 = vld [vmem:[%s9145_s3 + $0x2a0] sm:$0xff] }
  0x46   :  { %242 = vst [vmem:[#allocation3 + $0x290] sm:$0xff] %v241_v18  ;;  %244 = vst [vmem:[#allocation3 + $0x298] sm:$0xff] %v243_v19  ;;  %v247_v21 = vld [vmem:[%s9145_s3 + $0x2a8] sm:$0xff]  ;;  %v249_v22 = vld [vmem:[%s9145_s3 + $0x2b0] sm:$0xff] }
  0x47   :  { %246 = vst [vmem:[#allocation3 + $0x2a0] sm:$0xff] %v245_v20  ;;  %248 = vst [vmem:[#allocation3 + $0x2a8] sm:$0xff] %v247_v21  ;;  %v251_v23 = vld [vmem:[%s9145_s3 + $0x2b8] sm:$0xff]  ;;  %v253_v24 = vld [vmem:[%s9145_s3 + $0x2c0] sm:$0xff] }
  0x48   :  { %250 = vst [vmem:[#allocation3 + $0x2b0] sm:$0xff] %v249_v22  ;;  %v255_v25 = vld [vmem:[%s9145_s3 + $0x2c8] sm:$0xff]  ;;  %252 = vst [vmem:[#allocation3 + $0x2b8] sm:$0xff] %v251_v23  ;;  %v257_v26 = vld [vmem:[%s9145_s3 + $0x2d0] sm:$0xff] }
  0x49   :  { %254 = vst [vmem:[#allocation3 + $0x2c0] sm:$0xff] %v253_v24  ;;  %256 = vst [vmem:[#allocation3 + $0x2c8] sm:$0xff] %v255_v25  ;;  %v259_v27 = vld [vmem:[%s9145_s3 + $0x2d8] sm:$0xff]  ;;  %v261_v28 = vld [vmem:[%s9145_s3 + $0x2e0] sm:$0xff] }
  0x4a   :  { %258 = vst [vmem:[#allocation3 + $0x2d0] sm:$0xff] %v257_v26  ;;  %260 = vst [vmem:[#allocation3 + $0x2d8] sm:$0xff] %v259_v27  ;;  %v263_v29 = vld [vmem:[%s9145_s3 + $0x2e8] sm:$0xff]  ;;  %v265_v30 = vld [vmem:[%s9145_s3 + $0x2f0] sm:$0xff] }
  0x4b   :  { %262 = vst [vmem:[#allocation3 + $0x2e0] sm:$0xff] %v261_v28  ;;  %v267_v31 = vld [vmem:[%s9145_s3 + $0x2f8] sm:$0xff]  ;;  %264 = vst [vmem:[#allocation3 + $0x2e8] sm:$0xff] %v263_v29  ;;  %v269_v32 = vld [vmem:[%s9145_s3 + $0x300] sm:$0xff] }
  0x4c   :  { %266 = vst [vmem:[#allocation3 + $0x2f0] sm:$0xff] %v265_v30  ;;  %268 = vst [vmem:[#allocation3 + $0x2f8] sm:$0xff] %v267_v31  ;;  %v271_v33 = vld [vmem:[%s9145_s3 + $0x308] sm:$0xff]  ;;  %v273_v34 = vld [vmem:[%s9145_s3 + $0x310] sm:$0xff] }
  0x4d   :  { %270 = vst [vmem:[#allocation3 + $0x300] sm:$0xff] %v269_v32  ;;  %272 = vst [vmem:[#allocation3 + $0x308] sm:$0xff] %v271_v33  ;;  %v275_v35 = vld [vmem:[%s9145_s3 + $0x318] sm:$0xff]  ;;  %v277_v36 = vld [vmem:[%s9145_s3 + $0x320] sm:$0xff] }
  0x4e   :  { %274 = vst [vmem:[#allocation3 + $0x310] sm:$0xff] %v273_v34  ;;  %v279_v37 = vld [vmem:[%s9145_s3 + $0x328] sm:$0xff]  ;;  %276 = vst [vmem:[#allocation3 + $0x318] sm:$0xff] %v275_v35  ;;  %v281_v38 = vld [vmem:[%s9145_s3 + $0x330] sm:$0xff] }
  0x4f   :  { %278 = vst [vmem:[#allocation3 + $0x320] sm:$0xff] %v277_v36  ;;  %280 = vst [vmem:[#allocation3 + $0x328] sm:$0xff] %v279_v37  ;;  %v283_v39 = vld [vmem:[%s9145_s3 + $0x338] sm:$0xff]  ;;  %v285_v40 = vld [vmem:[%s9145_s3 + $0x340] sm:$0xff] }
  0x50   :  { %282 = vst [vmem:[#allocation3 + $0x330] sm:$0xff] %v281_v38  ;;  %284 = vst [vmem:[#allocation3 + $0x338] sm:$0xff] %v283_v39  ;;  %v287_v41 = vld [vmem:[%s9145_s3 + $0x348] sm:$0xff]  ;;  %v289_v42 = vld [vmem:[%s9145_s3 + $0x350] sm:$0xff] }
  0x51   :  { %286 = vst [vmem:[#allocation3 + $0x340] sm:$0xff] %v285_v40  ;;  %v291_v43 = vld [vmem:[%s9145_s3 + $0x358] sm:$0xff]  ;;  %288 = vst [vmem:[#allocation3 + $0x348] sm:$0xff] %v287_v41  ;;  %v293_v44 = vld [vmem:[%s9145_s3 + $0x360] sm:$0xff] }
  0x52   :  { %290 = vst [vmem:[#allocation3 + $0x350] sm:$0xff] %v289_v42  ;;  %292 = vst [vmem:[#allocation3 + $0x358] sm:$0xff] %v291_v43  ;;  %v295_v45 = vld [vmem:[%s9145_s3 + $0x368] sm:$0xff]  ;;  %v297_v46 = vld [vmem:[%s9145_s3 + $0x370] sm:$0xff] }
  0x53   :  { %294 = vst [vmem:[#allocation3 + $0x360] sm:$0xff] %v293_v44  ;;  %296 = vst [vmem:[#allocation3 + $0x368] sm:$0xff] %v295_v45  ;;  %v299_v47 = vld [vmem:[%s9145_s3 + $0x378] sm:$0xff]  ;;  %v301_v48 = vld [vmem:[%s9145_s3 + $0x380] sm:$0xff] }
  0x54   :  { %298 = vst [vmem:[#allocation3 + $0x370] sm:$0xff] %v297_v46  ;;  %v303_v49 = vld [vmem:[%s9145_s3 + $0x388] sm:$0xff]  ;;  %300 = vst [vmem:[#allocation3 + $0x378] sm:$0xff] %v299_v47  ;;  %v305_v50 = vld [vmem:[%s9145_s3 + $0x390] sm:$0xff] }
  0x55   :  { %302 = vst [vmem:[#allocation3 + $0x380] sm:$0xff] %v301_v48  ;;  %304 = vst [vmem:[#allocation3 + $0x388] sm:$0xff] %v303_v49  ;;  %v307_v51 = vld [vmem:[%s9145_s3 + $0x398] sm:$0xff]  ;;  %v309_v52 = vld [vmem:[%s9145_s3 + $0x3a0] sm:$0xff] }
  0x56   :  { %306 = vst [vmem:[#allocation3 + $0x390] sm:$0xff] %v305_v50  ;;  %308 = vst [vmem:[#allocation3 + $0x398] sm:$0xff] %v307_v51  ;;  %v311_v53 = vld [vmem:[%s9145_s3 + $0x3a8] sm:$0xff]  ;;  %v313_v54 = vld [vmem:[%s9145_s3 + $0x3b0] sm:$0xff] }
  0x57   :  { %310 = vst [vmem:[#allocation3 + $0x3a0] sm:$0xff] %v309_v52  ;;  %v315_v55 = vld [vmem:[%s9145_s3 + $0x3b8] sm:$0xff]  ;;  %312 = vst [vmem:[#allocation3 + $0x3a8] sm:$0xff] %v311_v53  ;;  %v317_v56 = vld [vmem:[%s9145_s3 + $0x3c0] sm:$0xff] }
  0x58   :  { %314 = vst [vmem:[#allocation3 + $0x3b0] sm:$0xff] %v313_v54  ;;  %316 = vst [vmem:[#allocation3 + $0x3b8] sm:$0xff] %v315_v55  ;;  %v319_v57 = vld [vmem:[%s9145_s3 + $0x3c8] sm:$0xff]  ;;  %v321_v58 = vld [vmem:[%s9145_s3 + $0x3d0] sm:$0xff] }
  0x59   :  { %318 = vst [vmem:[#allocation3 + $0x3c0] sm:$0xff] %v317_v56  ;;  %320 = vst [vmem:[#allocation3 + $0x3c8] sm:$0xff] %v319_v57  ;;  %v323_v59 = vld [vmem:[%s9145_s3 + $0x3d8] sm:$0xff]  ;;  %v325_v60 = vld [vmem:[%s9145_s3 + $0x3e0] sm:$0xff] }
  0x5a   :  { %322 = vst [vmem:[#allocation3 + $0x3d0] sm:$0xff] %v321_v58  ;;  %v327_v61 = vld [vmem:[%s9145_s3 + $0x3e8] sm:$0xff]  ;;  %324 = vst [vmem:[#allocation3 + $0x3d8] sm:$0xff] %v323_v59  ;;  %v329_v62 = vld [vmem:[%s9145_s3 + $0x3f0] sm:$0xff] }
  0x5b   :  { %326 = vst [vmem:[#allocation3 + $0x3e0] sm:$0xff] %v325_v60  ;;  %328 = vst [vmem:[#allocation3 + $0x3e8] sm:$0xff] %v327_v61  ;;  %v331_v63 = vld [vmem:[%s9145_s3 + $0x3f8] sm:$0xff]  ;;  %v333_v0 = vld [vmem:[%s9145_s3 + $0x400] sm:$0xff] }
  0x5c   :  { %330 = vst [vmem:[#allocation3 + $0x3f0] sm:$0xff] %v329_v62  ;;  %332 = vst [vmem:[#allocation3 + $0x3f8] sm:$0xff] %v331_v63  ;;  %v335_v1 = vld [vmem:[%s9145_s3 + $0x408] sm:$0xff]  ;;  %v337_v2 = vld [vmem:[%s9145_s3 + $0x410] sm:$0xff] }
  0x5d   :  { %334 = vst [vmem:[#allocation3 + $0x400] sm:$0xff] %v333_v0  ;;  %v339_v3 = vld [vmem:[%s9145_s3 + $0x418] sm:$0xff]  ;;  %336 = vst [vmem:[#allocation3 + $0x408] sm:$0xff] %v335_v1  ;;  %v341_v4 = vld [vmem:[%s9145_s3 + $0x420] sm:$0xff] }
  0x5e   :  { %338 = vst [vmem:[#allocation3 + $0x410] sm:$0xff] %v337_v2  ;;  %340 = vst [vmem:[#allocation3 + $0x418] sm:$0xff] %v339_v3  ;;  %v343_v5 = vld [vmem:[%s9145_s3 + $0x428] sm:$0xff]  ;;  %v345_v6 = vld [vmem:[%s9145_s3 + $0x430] sm:$0xff] }
  0x5f   :  { %342 = vst [vmem:[#allocation3 + $0x420] sm:$0xff] %v341_v4  ;;  %344 = vst [vmem:[#allocation3 + $0x428] sm:$0xff] %v343_v5  ;;  %v347_v7 = vld [vmem:[%s9145_s3 + $0x438] sm:$0xff]  ;;  %v349_v8 = vld [vmem:[%s9145_s3 + $0x440] sm:$0xff] }
  0x60   :  { %346 = vst [vmem:[#allocation3 + $0x430] sm:$0xff] %v345_v6  ;;  %v351_v9 = vld [vmem:[%s9145_s3 + $0x448] sm:$0xff]  ;;  %348 = vst [vmem:[#allocation3 + $0x438] sm:$0xff] %v347_v7  ;;  %v353_v10 = vld [vmem:[%s9145_s3 + $0x450] sm:$0xff] }
  0x61   :  { %350 = vst [vmem:[#allocation3 + $0x440] sm:$0xff] %v349_v8  ;;  %352 = vst [vmem:[#allocation3 + $0x448] sm:$0xff] %v351_v9  ;;  %v355_v11 = vld [vmem:[%s9145_s3 + $0x458] sm:$0xff]  ;;  %v357_v12 = vld [vmem:[%s9145_s3 + $0x460] sm:$0xff] }
  0x62   :  { %354 = vst [vmem:[#allocation3 + $0x450] sm:$0xff] %v353_v10  ;;  %356 = vst [vmem:[#allocation3 + $0x458] sm:$0xff] %v355_v11  ;;  %v359_v13 = vld [vmem:[%s9145_s3 + $0x468] sm:$0xff]  ;;  %v361_v14 = vld [vmem:[%s9145_s3 + $0x470] sm:$0xff] }
  0x63   :  { %358 = vst [vmem:[#allocation3 + $0x460] sm:$0xff] %v357_v12  ;;  %v363_v15 = vld [vmem:[%s9145_s3 + $0x478] sm:$0xff]  ;;  %360 = vst [vmem:[#allocation3 + $0x468] sm:$0xff] %v359_v13  ;;  %v365_v16 = vld [vmem:[%s9145_s3 + $0x480] sm:$0xff] }
  0x64   :  { %362 = vst [vmem:[#allocation3 + $0x470] sm:$0xff] %v361_v14  ;;  %364 = vst [vmem:[#allocation3 + $0x478] sm:$0xff] %v363_v15  ;;  %v367_v17 = vld [vmem:[%s9145_s3 + $0x488] sm:$0xff]  ;;  %v369_v18 = vld [vmem:[%s9145_s3 + $0x490] sm:$0xff] }
  0x65   :  { %366 = vst [vmem:[#allocation3 + $0x480] sm:$0xff] %v365_v16  ;;  %368 = vst [vmem:[#allocation3 + $0x488] sm:$0xff] %v367_v17  ;;  %v371_v19 = vld [vmem:[%s9145_s3 + $0x498] sm:$0xff]  ;;  %v373_v20 = vld [vmem:[%s9145_s3 + $0x4a0] sm:$0xff] }
  0x66   :  { %370 = vst [vmem:[#allocation3 + $0x490] sm:$0xff] %v369_v18  ;;  %v375_v21 = vld [vmem:[%s9145_s3 + $0x4a8] sm:$0xff]  ;;  %372 = vst [vmem:[#allocation3 + $0x498] sm:$0xff] %v371_v19  ;;  %v377_v22 = vld [vmem:[%s9145_s3 + $0x4b0] sm:$0xff] }
  0x67   :  { %374 = vst [vmem:[#allocation3 + $0x4a0] sm:$0xff] %v373_v20  ;;  %376 = vst [vmem:[#allocation3 + $0x4a8] sm:$0xff] %v375_v21  ;;  %v379_v23 = vld [vmem:[%s9145_s3 + $0x4b8] sm:$0xff]  ;;  %v381_v24 = vld [vmem:[%s9145_s3 + $0x4c0] sm:$0xff] }
  0x68   :  { %378 = vst [vmem:[#allocation3 + $0x4b0] sm:$0xff] %v377_v22  ;;  %380 = vst [vmem:[#allocation3 + $0x4b8] sm:$0xff] %v379_v23  ;;  %v383_v25 = vld [vmem:[%s9145_s3 + $0x4c8] sm:$0xff]  ;;  %v385_v26 = vld [vmem:[%s9145_s3 + $0x4d0] sm:$0xff] }
  0x69   :  { %382 = vst [vmem:[#allocation3 + $0x4c0] sm:$0xff] %v381_v24  ;;  %v387_v27 = vld [vmem:[%s9145_s3 + $0x4d8] sm:$0xff]  ;;  %384 = vst [vmem:[#allocation3 + $0x4c8] sm:$0xff] %v383_v25  ;;  %v389_v28 = vld [vmem:[%s9145_s3 + $0x4e0] sm:$0xff] }
  0x6a   :  { %386 = vst [vmem:[#allocation3 + $0x4d0] sm:$0xff] %v385_v26  ;;  %388 = vst [vmem:[#allocation3 + $0x4d8] sm:$0xff] %v387_v27  ;;  %v391_v29 = vld [vmem:[%s9145_s3 + $0x4e8] sm:$0xff]  ;;  %v393_v30 = vld [vmem:[%s9145_s3 + $0x4f0] sm:$0xff] }
  0x6b   :  { %390 = vst [vmem:[#allocation3 + $0x4e0] sm:$0xff] %v389_v28  ;;  %392 = vst [vmem:[#allocation3 + $0x4e8] sm:$0xff] %v391_v29  ;;  %v395_v31 = vld [vmem:[%s9145_s3 + $0x4f8] sm:$0xff]  ;;  %v397_v32 = vld [vmem:[%s9145_s3 + $0x500] sm:$0xff] }
  0x6c   :  { %394 = vst [vmem:[#allocation3 + $0x4f0] sm:$0xff] %v393_v30  ;;  %v399_v33 = vld [vmem:[%s9145_s3 + $0x508] sm:$0xff]  ;;  %396 = vst [vmem:[#allocation3 + $0x4f8] sm:$0xff] %v395_v31  ;;  %v401_v34 = vld [vmem:[%s9145_s3 + $0x510] sm:$0xff] }
  0x6d   :  { %398 = vst [vmem:[#allocation3 + $0x500] sm:$0xff] %v397_v32  ;;  %400 = vst [vmem:[#allocation3 + $0x508] sm:$0xff] %v399_v33  ;;  %v403_v35 = vld [vmem:[%s9145_s3 + $0x518] sm:$0xff]  ;;  %v405_v36 = vld [vmem:[%s9145_s3 + $0x520] sm:$0xff] }
  0x6e   :  { %402 = vst [vmem:[#allocation3 + $0x510] sm:$0xff] %v401_v34  ;;  %404 = vst [vmem:[#allocation3 + $0x518] sm:$0xff] %v403_v35  ;;  %v407_v37 = vld [vmem:[%s9145_s3 + $0x528] sm:$0xff]  ;;  %v409_v38 = vld [vmem:[%s9145_s3 + $0x530] sm:$0xff] }
  0x6f   :  { %406 = vst [vmem:[#allocation3 + $0x520] sm:$0xff] %v405_v36  ;;  %v411_v39 = vld [vmem:[%s9145_s3 + $0x538] sm:$0xff]  ;;  %408 = vst [vmem:[#allocation3 + $0x528] sm:$0xff] %v407_v37  ;;  %v413_v40 = vld [vmem:[%s9145_s3 + $0x540] sm:$0xff] }
  0x70   :  { %410 = vst [vmem:[#allocation3 + $0x530] sm:$0xff] %v409_v38  ;;  %412 = vst [vmem:[#allocation3 + $0x538] sm:$0xff] %v411_v39  ;;  %v7150_v41 = vld [vmem:[%s9142_s0 + $0x10] sm:$0xff]  ;;  %v7155_v42 = vld [vmem:[%s9142_s0] sm:$0xff] }
  0x71   :  { %414 = vst [vmem:[#allocation3 + $0x540] sm:$0xff] %v413_v40 }
  0x72   :  { %422 = vsyncadd [#allocation4], 21632  ;;  %v858_v43 = vstv %s5420_s15  ;;  %v7160_v44 = vld [vmem:[%s9142_s0 + $0x18] sm:$0xf]  ;;  %v7165_v45 = vld [vmem:[%s9142_s0 + $0x8] sm:$0xff]  ;;  %s6596_s23 = smov 127  }
  0x73   :  { %v861_v46 = vmul.f32 %v858_v43, %v7150_v41  ;;  %v859_v47 = vmul.f32 %v858_v43, %v7155_v42  ;;  %v862_v48 = vmul.f32 %v858_v43, %v7160_v44  ;;  %v860_v49 = vmul.f32 %v858_v43, %v7165_v45  ;;  %v7176_v50 = vld [vmem:[%s9142_s0 + $0x28] sm:$0xff]  ;;  %v7181_v51 = vld [vmem:[%s9142_s0 + $0x20] sm:$0xff]  ;;  %s5421_s2 = sld [smem:[#allocation5 + $0xa]]  ;;  %v7190_v54 = vld [vmem:[%s9142_s0 + $0x38] sm:$0xf]  ;;  %s5422_s6 = sld [smem:[#allocation5 + $0x13]] }
  0x74   :  { %v864_v52 = vmul.f32 %v858_v43, %v7176_v50  ;;  %v863_v53 = vmul.f32 %v858_v43, %v7181_v51  ;;  %v7195_v55 = vld [vmem:[%s9142_s0 + $0x30] sm:$0xff]  ;;  %v866_v56 = vmul.f32 %v858_v43, %v7190_v54  ;;  %s5423_s7 = sld [smem:[#allocation5 + $0x1c]]  ;;  %s5425_s9 = sld [smem:[#allocation5 + $0xd]]  ;;  %vm489_vm0 = vcmask 1046528  }
  0x75   :  { %879 = vrot.lane.b32.xlu1 %v861_v46, %s6596_s23  ;;  %875 = vrot.lane.b32.xlu0 %v859_v47, %s6596_s23  ;;  %v865_v57 = vmul.f32 %v858_v43, %v7195_v55  ;;  %s5424_s8 = sld [smem:[#allocation5 + $0x4]]  ;;  %s5426_s10 = sld [smem:[#allocation5 + $0x16]]  ;;  %vm682_vm1 = vcmask 1045504   ;;  %vm2299_vm2 = vcmask 211968   ;;  %vm2303_vm3 = vcmask 205824  }
  0x76   :  { %s5427_s11 = sld [smem:[#allocation5 + $0x1f]]  ;;  %s5429_s13 = sld [smem:[#allocation5 + $0x10]]  ;;  %vm2359_vm4 = vcmask 425168   ;;  %vm2363_vm5 = vcmask 419024   ;;  %vm2419_vm6 = vcmask 638368   ;;  %vm2423_vm7 = vcmask 632224  }
  0x77   :  { %s5428_s12 = sld [smem:[#allocation5 + $0x7]]  ;;  %s5430_s14 = sld [smem:[#allocation5 + $0x19]]  ;;  %vm2479_vm8 = vcmask 851568   ;;  %vm2483_vm9 = vcmask 845424  }
  0x78   :  { %s5431_s15 = sld [smem:[#allocation5 + $0x22]]  ;;  %s6597_s17 = smov 126  }
  0x79   :  { %881 = vrot.lane.b32.xlu1 %v862_v48, %s6596_s23  ;;  %877 = vrot.lane.b32.xlu0 %v860_v49, %s6596_s23  ;;  %v908_v58 = vstv %s5421_s2  ;;  %v958_v3 = vstv %s5422_s6  ;;  %s5432_s16 = sld [smem:[#allocation5 + $0x2]]  ;;  %s5433_s18 = sld [smem:[#allocation5 + $0xb]] }
  0x7a   :  { %v910_v59 = vmul.f32 %v908_v58, %v7165_v45  ;;  %v909_v60 = vmul.f32 %v908_v58, %v7155_v42  ;;  %v912_v61 = vmul.f32 %v908_v58, %v7160_v44  ;;  %v911_v62 = vmul.f32 %v908_v58, %v7150_v41  ;;  %s5434_s19 = sld [smem:[#allocation5 + $0x14]]  ;;  %s5435_s20 = sld [smem:[#allocation5 + $0x1d]] }
  0x7b   :  { %v914_v63 = vmul.f32 %v908_v58, %v7176_v50  ;;  %v913_v0 = vmul.f32 %v908_v58, %v7181_v51  ;;  %v916_v1 = vmul.f32 %v908_v58, %v7190_v54  ;;  %v915_v2 = vmul.f32 %v908_v58, %v7195_v55  ;;  %s5436_s21 = sld [smem:[#allocation5 + $0x5]]  ;;  %s5437_s3 = sld [smem:[#allocation5 + $0xe]] }
  0x7c   :  { %v960_v4 = vmul.f32 %v958_v3, %v7165_v45  ;;  %v959_v5 = vmul.f32 %v958_v3, %v7155_v42  ;;  %v962_v6 = vmul.f32 %v958_v3, %v7160_v44  ;;  %v961_v7 = vmul.f32 %v958_v3, %v7150_v41  ;;  %s5438_s2 = sld [smem:[#allocation5 + $0x17]]  ;;  %s8153_s24 = sld [smem:[#allocation5 + $0x18]] }
  0x7d   :  { %885 = vrot.lane.b32.xlu1 %v864_v52, %s6596_s23  ;;  %883 = vrot.lane.b32.xlu0 %v863_v53, %s6596_s23  ;;  %v964_v8 = vmul.f32 %v958_v3, %v7176_v50  ;;  %v963_v9 = vmul.f32 %v958_v3, %v7181_v51  ;;  %v966_v10 = vmul.f32 %v958_v3, %v7190_v54  ;;  %v1008_v12 = vstv %s5423_s7  ;;  %s8017_s22 = sld [smem:[#allocation5 + $0xf]]  ;;  %s8170_s25 = sld [smem:[#allocation5 + $0x12]] }
  0x7e   :  { %v965_v11 = vmul.f32 %v958_v3, %v7195_v55  ;;  %v1010_v13 = vmul.f32 %v1008_v12, %v7165_v45  ;;  %v1009_v14 = vmul.f32 %v1008_v12, %v7155_v42  ;;  %v1012_v15 = vmul.f32 %v1008_v12, %v7160_v44  ;;  %s8266_s26 = sld [smem:[#allocation5 + $0x21]]  ;;  %s8308_s1 = sld [smem:[#allocation5 + $0x1b]] }
  0x7f   :  { %v1011_v16 = vmul.f32 %v1008_v12, %v7150_v41  ;;  %v1058_v17 = vstv %s5424_s8  ;;  %v1014_v18 = vmul.f32 %v1008_v12, %v7176_v50  ;;  %v1013_v19 = vmul.f32 %v1008_v12, %v7181_v51 }
  0x80   :  { %v1060_v20 = vmul.f32 %v1058_v17, %v7165_v45  ;;  %v1061_v21 = vmul.f32 %v1058_v17, %v7150_v41  ;;  %v1059_v22 = vmul.f32 %v1058_v17, %v7155_v42  ;;  %v1016_v23 = vmul.f32 %v1008_v12, %v7190_v54 }
  0x81   :  { %889 = vrot.lane.b32.xlu1 %v866_v56, %s6596_s23  ;;  %887 = vrot.lane.b32.xlu0 %v865_v57, %s6596_s23  ;;  %v1015_v24 = vmul.f32 %v1008_v12, %v7195_v55  ;;  %v1062_v28 = vmul.f32 %v1058_v17, %v7160_v44  ;;  %v1064_v29 = vmul.f32 %v1058_v17, %v7176_v50  ;;  %v1122_v36 = vstv %s5425_s9 }
  0x82   :  { %v1076_v25 = vrot.slane %v1060_v20, 1  ;;  %v1078_v26 = vrot.slane %v1061_v21, 1  ;;  %v1075_v27 = vrot.slane %v1059_v22, 1  ;;  %v1065_v30 = vmul.f32 %v1058_v17, %v7195_v55 }
  0x83   :  { %v1080_v33 = vrot.slane %v1062_v28, 1  ;;  %v1063_v34 = vmul.f32 %v1058_v17, %v7181_v51  ;;  %v1066_v35 = vmul.f32 %v1058_v17, %v7190_v54  ;;  %v1083_v38 = vrot.slane %v1064_v29, 1 }
  0x84   :  { %v1079_v31 = vsel %vm489_vm0, %v1076_v25, %v1078_v26  ;;  %v1077_v32 = vsel %vm489_vm0, %v1075_v27, %v1076_v25  ;;  %v1085_v39 = vrot.slane %v1065_v30, 1  ;;  %v1124_v46 = vmul.f32 %v1122_v36, %v7165_v45 }
  0x85   :  { %927 = vrot.lane.b32.xlu1 %v910_v59, %s6596_s23  ;;  %925 = vrot.lane.b32.xlu0 %v909_v60, %s6596_s23  ;;  %v1081_v37 = vsel %vm489_vm0, %v1078_v26, %v1080_v33  ;;  %v1082_v40 = vrot.slane %v1063_v34, 1  ;;  %v1087_v43 = vrot.slane %v1066_v35, 1  ;;  %v1125_v49 = vmul.f32 %v1122_v36, %v7150_v41 }
  0x86   :  { %v1086_v47 = vsel %vm489_vm0, %v1083_v38, %v1085_v39  ;;  %v1123_v52 = vmul.f32 %v1122_v36, %v7155_v42  ;;  %v1140_v56 = vrot.slane %v1124_v46, 1  ;;  %v1126_v59 = vmul.f32 %v1122_v36, %v7160_v44 }
  0x87   :  { %v1084_v48 = vsel %vm489_vm0, %v1082_v40, %v1083_v38  ;;  %v1088_v53 = vsel %vm489_vm0, %v1085_v39, %v1087_v43  ;;  %v1142_v57 = vrot.slane %v1125_v49, 1  ;;  %v1128_v60 = vmul.f32 %v1122_v36, %v7176_v50 }
  0x88   :  { %v1139_v58 = vrot.slane %v1123_v52, 1  ;;  %v1186_v3 = vstv %s5426_s10  ;;  %v1250_v26 = vstv %s5427_s11 }
  0x89   :  { %931 = vrot.lane.b32.xlu1 %v912_v61, %s6596_s23  ;;  %929 = vrot.lane.b32.xlu0 %v911_v62, %s6596_s23  ;;  %v1129_v61 = vmul.f32 %v1122_v36, %v7195_v55  ;;  %v1143_v62 = vsel %vm489_vm0, %v1140_v56, %v1142_v57  ;;  %v1189_v12 = vmul.f32 %v1186_v3, %v7150_v41 }
  0x8a   :  { %v1193_v20 = vmul.f32 %v1186_v3, %v7195_v55  ;;  %v1194_v25 = vmul.f32 %v1186_v3, %v7190_v54  ;;  %v1253_v35 = vmul.f32 %v1250_v26, %v7150_v41  ;;  %v1256_v46 = vmul.f32 %v1250_v26, %v7176_v50 }
  0x8c   :  { %v1213_v29 = vrot.slane %v1193_v20, 1  ;;  %v1270_v39 = vrot.slane %v1253_v35, 1 }
  0x8d   :  { %935 = vrot.lane.b32.xlu1 %v914_v63, %s6596_s23  ;;  %933 = vrot.lane.b32.xlu0 %v913_v0, %s6596_s23  ;;  %v1141_v63 = vsel %vm489_vm0, %v1139_v58, %v1140_v56  ;;  %v1144_v0 = vrot.slane %v1126_v59, 1  ;;  %v1275_v56 = vrot.slane %v1256_v46, 1  ;;  %v1258_v58 = vmul.f32 %v1250_v26, %v7190_v54 }
  0x91   :  { %939 = vrot.lane.b32.xlu1 %v916_v1, %s6596_s23  ;;  %937 = vrot.lane.b32.xlu0 %v915_v2, %s6596_s23  ;;  %v1127_v1 = vmul.f32 %v1122_v36, %v7181_v51  ;;  %v1130_v2 = vmul.f32 %v1122_v36, %v7190_v54  ;;  %v1251_v36 = vmul.f32 %v1250_v26, %v7155_v42 }
  0x93   :  { %v1267_v40 = vrot.slane %v1251_v36, 1 }
  0x95   :  { %977 = vrot.lane.b32.xlu1 %v960_v4, %s6596_s23  ;;  %975 = vrot.lane.b32.xlu0 %v959_v5, %s6596_s23  ;;  %v1145_v4 = vsel %vm489_vm0, %v1142_v57, %v1144_v0  ;;  %v1147_v5 = vrot.slane %v1128_v60, 1 }
  0x99   :  { %981 = vrot.lane.b32.xlu1 %v962_v6, %s6596_s23  ;;  %979 = vrot.lane.b32.xlu0 %v961_v7, %s6596_s23  ;;  %v1149_v6 = vrot.slane %v1129_v61, 1  ;;  %v1146_v7 = vrot.slane %v1127_v1, 1  ;;  %v1279_v1 = vrot.slane %v1258_v58, 1 }
  0x9d   :  { %985 = vrot.lane.b32.xlu1 %v964_v8, %s6596_s23  ;;  %983 = vrot.lane.b32.xlu0 %v963_v9, %s6596_s23  ;;  %v1151_v8 = vrot.slane %v1130_v2, 1  ;;  %v1188_v9 = vmul.f32 %v1186_v3, %v7165_v45 }
  0xa1   :  { %989 = vrot.lane.b32.xlu1 %v966_v10, %s6596_s23  ;;  %987 = vrot.lane.b32.xlu0 %v965_v11, %s6596_s23  ;;  %v1150_v10 = vsel %vm489_vm0, %v1147_v5, %v1149_v6  ;;  %v1148_v11 = vsel %vm489_vm0, %v1146_v7, %v1147_v5 }
  0xa5   :  { %1027 = vrot.lane.b32.xlu1 %v1010_v13, %s6596_s23  ;;  %1025 = vrot.lane.b32.xlu0 %v1009_v14, %s6596_s23  ;;  %v1187_v13 = vmul.f32 %v1186_v3, %v7155_v42  ;;  %v1204_v14 = vrot.slane %v1188_v9, 1 }
  0xa7   :  { %v1203_v17 = vrot.slane %v1187_v13, 1 }
  0xa9   :  { %1031 = vrot.lane.b32.xlu1 %v1012_v15, %s6596_s23  ;;  %1029 = vrot.lane.b32.xlu0 %v1011_v16, %s6596_s23  ;;  %v1152_v15 = vsel %vm489_vm0, %v1149_v6, %v1151_v8  ;;  %v1206_v16 = vrot.slane %v1189_v12, 1  ;;  %v1205_v22 = vsel %vm489_vm0, %v1203_v17, %v1204_v14 }
  0xab   :  { %v1207_v21 = vsel %vm489_vm0, %v1204_v14, %v1206_v16 }
  0xad   :  { %1035 = vrot.lane.b32.xlu1 %v1014_v18, %s6596_s23  ;;  %1033 = vrot.lane.b32.xlu0 %v1013_v19, %s6596_s23  ;;  %v1190_v18 = vmul.f32 %v1186_v3, %v7160_v44  ;;  %v1192_v19 = vmul.f32 %v1186_v3, %v7176_v50 }
  0xaf   :  { %v1211_v28 = vrot.slane %v1192_v19, 1 }
  0xb1   :  { %1039 = vrot.lane.b32.xlu1 %v1016_v23, %s6596_s23  ;;  %1037 = vrot.lane.b32.xlu0 %v1015_v24, %s6596_s23  ;;  %v1208_v23 = vrot.slane %v1190_v18, 1  ;;  %v1191_v24 = vmul.f32 %v1186_v3, %v7181_v51 }
  0xb3   :  { %v1209_v27 = vsel %vm489_vm0, %v1206_v16, %v1208_v23  ;;  %v1210_v30 = vrot.slane %v1191_v24, 1 }
  0xb5   :  { %1091 = vrot.lane.b32.xlu1 %v1079_v31, %s6596_s23  ;;  %1089 = vrot.lane.b32.xlu0 %v1077_v32, %s6596_s23  ;;  %v1215_v31 = vrot.slane %v1194_v25, 1  ;;  %v1252_v32 = vmul.f32 %v1250_v26, %v7165_v45  ;;  %v1212_v34 = vsel %vm489_vm0, %v1210_v30, %v1211_v28  ;;  %v1378_v30 = vstv %s5429_s13  ;;  %s5441_s13 = sld [smem:[#allocation5 + $0x11]] }
  0xb6   :  { %v1381_v35 = vmul.f32 %v1378_v30, %v7150_v41  ;;  %v1379_v36 = vmul.f32 %v1378_v30, %v7155_v42 }
  0xb7   :  { %v1216_v38 = vsel %vm489_vm0, %v1213_v29, %v1215_v31 }
  0xb8   :  { %v1395_v46 = vrot.slane %v1379_v36, 2 }
  0xb9   :  { %1095 = vrot.lane.b32.xlu1 %v1080_v33, %s6596_s23  ;;  %1093 = vrot.lane.b32.xlu0 %v1081_v37, %s6596_s23  ;;  %v1214_v33 = vsel %vm489_vm0, %v1211_v28, %v1213_v29  ;;  %v1268_v37 = vrot.slane %v1252_v32, 1 }
  0xbb   :  { %v1269_v49 = vsel %vm489_vm0, %v1267_v40, %v1268_v37 }
  0xbd   :  { %1099 = vrot.lane.b32.xlu1 %v1086_v47, %s6596_s23  ;;  %1097 = vrot.lane.b32.xlu0 %v1084_v48, %s6596_s23  ;;  %v1257_v47 = vmul.f32 %v1250_v26, %v7195_v55  ;;  %v1271_v48 = vsel %vm489_vm0, %v1268_v37, %v1270_v39 }
  0xbf   :  { %v1277_v57 = vrot.slane %v1257_v47, 1  ;;  %v1382_v47 = vmul.f32 %v1378_v30, %v7160_v44 }
  0xc1   :  { %1103 = vrot.lane.b32.xlu1 %v1087_v43, %s6596_s23  ;;  %1101 = vrot.lane.b32.xlu0 %v1088_v53, %s6596_s23  ;;  %v1254_v43 = vmul.f32 %v1250_v26, %v7160_v44  ;;  %v1255_v53 = vmul.f32 %v1250_v26, %v7181_v51  ;;  %v1400_v58 = vrot.slane %v1382_v47, 2 }
  0xc3   :  { %v1272_v52 = vrot.slane %v1254_v43, 1  ;;  %v1274_v60 = vrot.slane %v1255_v53, 1  ;;  %v1398_v43 = vrot.slane %v1381_v35, 2  ;;  %v1385_v53 = vmul.f32 %v1378_v30, %v7195_v55 }
  0xc5   :  { %1155 = vrot.lane.b32.xlu1 %v1143_v62, %s6596_s23  ;;  %1153 = vrot.lane.b32.xlu0 %v1141_v63, %s6596_s23  ;;  %v1273_v59 = vsel %vm489_vm0, %v1270_v39, %v1272_v52  ;;  %v1314_v63 = vstv %s5428_s12  ;;  %v1276_v2 = vsel %vm489_vm0, %v1274_v60, %v1275_v56  ;;  %s5439_s12 = sld [smem:[#allocation5 + $0x20]] }
  0xc6   :  { %v1316_v3 = vmul.f32 %v1314_v63, %v7165_v45  ;;  %v1315_v5 = vmul.f32 %v1314_v63, %v7155_v42  ;;  %v1318_v12 = vmul.f32 %v1314_v63, %v7160_v44  ;;  %v1321_v16 = vmul.f32 %v1314_v63, %v7195_v55 }
  0xc7   :  { %v1319_v20 = vmul.f32 %v1314_v63, %v7181_v51  ;;  %v1322_v25 = vmul.f32 %v1314_v63, %v7190_v54 }
  0xc8   :  { %v1332_v9 = vrot.slane %v1316_v3, 2  ;;  %v1336_v19 = vrot.slane %v1318_v12, 2  ;;  %v1341_v24 = vrot.slane %v1321_v16, 2  ;;  %v1401_v3 = vsel %vm682_vm1, %v1398_v43, %v1400_v58 }
  0xc9   :  { %1159 = vrot.lane.b32.xlu1 %v1144_v0, %s6596_s23  ;;  %1157 = vrot.lane.b32.xlu0 %v1145_v4, %s6596_s23  ;;  %v1278_v0 = vsel %vm489_vm0, %v1275_v56, %v1277_v57  ;;  %v1317_v4 = vmul.f32 %v1314_v63, %v7150_v41  ;;  %v1343_v32 = vrot.slane %v1322_v25, 2 }
  0xcb   :  { %v1344_v39 = vsel %vm682_vm1, %v1341_v24, %v1343_v32 }
  0xcd   :  { %1163 = vrot.lane.b32.xlu1 %v1150_v10, %s6596_s23  ;;  %1161 = vrot.lane.b32.xlu0 %v1148_v11, %s6596_s23  ;;  %v1334_v10 = vrot.slane %v1317_v4, 2  ;;  %v1331_v11 = vrot.slane %v1315_v5, 2 }
  0xcf   :  { %v1335_v17 = vsel %vm682_vm1, %v1332_v9, %v1334_v10  ;;  %v1333_v18 = vsel %vm682_vm1, %v1331_v11, %v1332_v9  ;;  %v1337_v26 = vsel %vm682_vm1, %v1334_v10, %v1336_v19  ;;  %v1442_v9 = vstv %s5430_s14  ;;  %s5442_s14 = sld [smem:[#allocation5 + $0x1a]] }
  0xd0   :  { %v1445_v16 = vmul.f32 %v1442_v9, %v7150_v41  ;;  %v1447_v36 = vmul.f32 %v1442_v9, %v7181_v51  ;;  %v1450_v47 = vmul.f32 %v1442_v9, %v7190_v54 }
  0xd1   :  { %1167 = vrot.lane.b32.xlu1 %v1151_v8, %s6596_s23  ;;  %1165 = vrot.lane.b32.xlu0 %v1152_v15, %s6596_s23  ;;  %v1280_v8 = vsel %vm489_vm0, %v1277_v57, %v1279_v1  ;;  %v1320_v15 = vmul.f32 %v1314_v63, %v7176_v50 }
  0xd5   :  { %1219 = vrot.lane.b32.xlu1 %v1207_v21, %s6596_s23  ;;  %1217 = vrot.lane.b32.xlu0 %v1205_v22, %s6596_s23 }
  0xd9   :  { %1223 = vrot.lane.b32.xlu1 %v1208_v23, %s6596_s23  ;;  %1221 = vrot.lane.b32.xlu0 %v1209_v27, %s6596_s23  ;;  %v1339_v23 = vrot.slane %v1320_v15, 2  ;;  %v1338_v27 = vrot.slane %v1319_v20, 2  ;;  %v1444_v15 = vmul.f32 %v1442_v9, %v7165_v45 }
  0xdd   :  { %1227 = vrot.lane.b32.xlu1 %v1214_v33, %s6596_s23  ;;  %1225 = vrot.lane.b32.xlu0 %v1212_v34, %s6596_s23  ;;  %v1340_v33 = vsel %vm682_vm1, %v1338_v27, %v1339_v23  ;;  %v1380_v34 = vmul.f32 %v1378_v30, %v7165_v45 }
  0xdf   :  { %v1396_v40 = vrot.slane %v1380_v34, 2 }
  0xe1   :  { %1231 = vrot.lane.b32.xlu1 %v1215_v31, %s6596_s23  ;;  %1229 = vrot.lane.b32.xlu0 %v1216_v38, %s6596_s23  ;;  %v1342_v31 = vsel %vm682_vm1, %v1339_v23, %v1341_v24  ;;  %v1399_v56 = vsel %vm682_vm1, %v1396_v40, %v1398_v43  ;;  %v1397_v57 = vsel %vm682_vm1, %v1395_v46, %v1396_v40  ;;  %v1460_v23 = vrot.slane %v1444_v15, 2 }
  0xe2   :  { %v1462_v24 = vrot.slane %v1445_v16, 2 }
  0xe5   :  { %1283 = vrot.lane.b32.xlu1 %v1271_v48, %s6596_s23  ;;  %1281 = vrot.lane.b32.xlu0 %v1269_v49, %s6596_s23 }
  0xe7   :  { %v7330_v61 = vpop.permute.xlu1 %879  ;;  %v7332_v62 = vpop.permute.xlu0 %875 }
  0xe9   :  { %1287 = vrot.lane.b32.xlu1 %v1272_v52, %s6596_s23  ;;  %1285 = vrot.lane.b32.xlu0 %v1273_v59, %s6596_s23  ;;  %v1384_v52 = vmul.f32 %v1378_v30, %v7176_v50  ;;  %v1383_v59 = vmul.f32 %v1378_v30, %v7181_v51 }
  0xeb   :  { %v7341_v6 = vpop.permute.xlu1 %881  ;;  %v7343_v7 = vpop.permute.xlu0 %877  ;;  %v1402_v4 = vrot.slane %v1383_v59, 2 }
  0xed   :  { %1291 = vrot.lane.b32.xlu1 %v1278_v0, %s6596_s23  ;;  %1289 = vrot.lane.b32.xlu0 %v1276_v2, %s6596_s23  ;;  %v1403_v0 = vrot.slane %v1384_v52, 2  ;;  %v1386_v2 = vmul.f32 %v1378_v30, %v7190_v54 }
  0xef   :  { %v7349_v13 = vpop.permute.xlu1 %885  ;;  %v7351_v14 = vpop.permute.xlu0 %883  ;;  %v1407_v11 = vrot.slane %v1386_v2, 2  ;;  %v1404_v12 = vsel %vm682_vm1, %v1402_v4, %v1403_v0 }
  0xf0   :  { %9149 = vst [vmem:[#allocation16_spill] sm:$0xff] %v7351_v14 }
  0xf1   :  { %1295 = vrot.lane.b32.xlu1 %v1279_v1, %s6596_s23  ;;  %1293 = vrot.lane.b32.xlu0 %v1280_v8, %s6596_s23  ;;  %v1405_v1 = vrot.slane %v1385_v53, 2  ;;  %v1466_v53 = vrot.slane %v1447_v36, 2 }
  0xf3   :  { %v7360_v21 = vpop.permute.xlu1 %889  ;;  %v7362_v22 = vpop.permute.xlu0 %887  ;;  %v1406_v10 = vsel %vm682_vm1, %v1403_v0, %v1405_v1  ;;  %v1408_v20 = vsel %vm682_vm1, %v1405_v1, %v1407_v11  ;;  %v1471_v0 = vrot.slane %v1450_v47, 2 }
  0xf4   :  { %9150 = vst [vmem:[#allocation17_spill] sm:$0xff] %v7360_v21  ;;  %9151 = vst [vmem:[#allocation18_spill] sm:$0xff] %v7362_v22 }
  0xf5   :  { %1347 = vrot.lane.b32.xlu1 %v1335_v17, %s6596_s23  ;;  %1345 = vrot.lane.b32.xlu0 %v1333_v18, %s6596_s23  ;;  %v1443_v17 = vmul.f32 %v1442_v9, %v7155_v42 }
  0xf7   :  { %v7368_v28 = vpop.permute.xlu1 %927  ;;  %v7370_v29 = vpop.permute.xlu0 %925  ;;  %v1459_v25 = vrot.slane %v1443_v17, 2 }
  0xf9   :  { %1351 = vrot.lane.b32.xlu1 %v1336_v19, %s6596_s23  ;;  %1349 = vrot.lane.b32.xlu0 %v1337_v26, %s6596_s23  ;;  %v1446_v26 = vmul.f32 %v1442_v9, %v7160_v44  ;;  %v1461_v34 = vsel %vm682_vm1, %v1459_v25, %v1460_v23 }
  0xfb   :  { %v7379_v37 = vpop.permute.xlu1 %931  ;;  %v7381_v38 = vpop.permute.xlu0 %929  ;;  %v1464_v35 = vrot.slane %v1446_v26, 2 }
  0xfc   :  { %9152 = vst [vmem:[#allocation19_spill] sm:$0xff] %v7379_v37  ;;  %9153 = vst [vmem:[#allocation20_spill] sm:$0xff] %v7381_v38 }
  0xfd   :  { %1355 = vrot.lane.b32.xlu1 %v1342_v31, %s6596_s23  ;;  %1353 = vrot.lane.b32.xlu0 %v1340_v33, %s6596_s23  ;;  %v1448_v31 = vmul.f32 %v1442_v9, %v7176_v50  ;;  %v1463_v33 = vsel %vm682_vm1, %v1460_v23, %v1462_v24  ;;  %v1465_v52 = vsel %vm682_vm1, %v1462_v24, %v1464_v35 }
  0xff   :  { %v7387_v48 = vpop.permute.xlu1 %935  ;;  %v7389_v49 = vpop.permute.xlu0 %933  ;;  %v1467_v43 = vrot.slane %v1448_v31, 2 }
 0x100   :  { %9154 = vst [vmem:[#allocation21_spill] sm:$0xff] %v7387_v48  ;;  %9155 = vst [vmem:[#allocation22_spill] sm:$0xff] %v7389_v49 }
 0x101   :  { %1359 = vrot.lane.b32.xlu1 %v1343_v32, %s6596_s23  ;;  %1357 = vrot.lane.b32.xlu0 %v1344_v39, %s6596_s23  ;;  %v1449_v32 = vmul.f32 %v1442_v9, %v7195_v55  ;;  %v1468_v1 = vsel %vm682_vm1, %v1466_v53, %v1467_v43 }
 0x103   :  { %v7398_v60 = vpop.permute.xlu1 %939  ;;  %v7400_v63 = vpop.permute.xlu0 %937  ;;  %v1469_v46 = vrot.slane %v1449_v32, 2 }
 0x104   :  { %9156 = vst [vmem:[#allocation23_spill] sm:$0xff] %v7398_v60  ;;  %9157 = vst [vmem:[#allocation24_spill] sm:$0xff] %v7400_v63 }
 0x105   :  { %1411 = vrot.lane.b32.xlu1 %v1399_v56, %s6596_s23  ;;  %1409 = vrot.lane.b32.xlu0 %v1397_v57, %s6596_s23  ;;  %v1470_v59 = vsel %vm682_vm1, %v1467_v43, %v1469_v46 }
 0x107   :  { %v7406_v5 = vpop.permute.xlu1 %977  ;;  %v7408_v8 = vpop.permute.xlu0 %975 }
 0x108   :  { %9158 = vst [vmem:[#allocation25_spill] sm:$0xff] %v7406_v5  ;;  %9159 = vst [vmem:[#allocation26_spill] sm:$0xff] %v7408_v8 }
 0x109   :  { %1415 = vrot.lane.b32.xlu1 %v1400_v58, %s6596_s23  ;;  %1413 = vrot.lane.b32.xlu0 %v1401_v3, %s6596_s23  ;;  %v1506_v58 = vstv %s5431_s15  ;;  %s5412_s15 = sld [smem:[#allocation5 + $0x3]] }
 0x10a   :  { %v1508_v2 = vmul.f32 %v1506_v58, %v7165_v45  ;;  %v1509_v3 = vmul.f32 %v1506_v58, %v7150_v41  ;;  %v1507_v4 = vmul.f32 %v1506_v58, %v7155_v42  ;;  %v1510_v17 = vmul.f32 %v1506_v58, %v7160_v44 }
 0x10b   :  { %v7417_v18 = vpop.permute.xlu1 %981  ;;  %v7419_v19 = vpop.permute.xlu0 %979  ;;  %v1512_v24 = vmul.f32 %v1506_v58, %v7176_v50  ;;  %v1513_v25 = vmul.f32 %v1506_v58, %v7195_v55  ;;  %v1514_v36 = vmul.f32 %v1506_v58, %v7190_v54 }
 0x10c   :  { %9160 = vst [vmem:[#allocation27_spill] sm:$0xff] %v7417_v18  ;;  %9161 = vst [vmem:[#allocation28_spill] sm:$0xff] %v7419_v19  ;;  %v1526_v15 = vrot.slane %v1509_v3, 2  ;;  %v1523_v16 = vrot.slane %v1507_v4, 2  ;;  %v1528_v32 = vrot.slane %v1510_v17, 2 }
 0x10d   :  { %1419 = vrot.lane.b32.xlu1 %v1406_v10, %s6596_s23  ;;  %1417 = vrot.lane.b32.xlu0 %v1404_v12, %s6596_s23  ;;  %v1524_v12 = vrot.slane %v1508_v2, 2  ;;  %v1533_v47 = vrot.slane %v1513_v25, 2  ;;  %v1535_v2 = vrot.slane %v1514_v36, 2 }
 0x10e   :  { %v1529_v43 = vsel %vm682_vm1, %v1526_v15, %v1528_v32 }
 0x10f   :  { %v7425_v27 = vpop.permute.xlu1 %985  ;;  %v7427_v30 = vpop.permute.xlu0 %983  ;;  %v1527_v26 = vsel %vm682_vm1, %v1524_v12, %v1526_v15  ;;  %v1525_v31 = vsel %vm682_vm1, %v1523_v16, %v1524_v12  ;;  %v1536_v4 = vsel %vm682_vm1, %v1533_v47, %v1535_v2 }
 0x110   :  { %9162 = vst [vmem:[#allocation29_spill] sm:$0xff] %v7425_v27  ;;  %9163 = vst [vmem:[#allocation30_spill] sm:$0xff] %v7427_v30 }
 0x111   :  { %1423 = vrot.lane.b32.xlu1 %v1407_v11, %s6596_s23  ;;  %1421 = vrot.lane.b32.xlu0 %v1408_v20, %s6596_s23  ;;  %v1472_v11 = vsel %vm682_vm1, %v1469_v46, %v1471_v0  ;;  %v1531_v46 = vrot.slane %v1512_v24, 2 }
 0x113   :  { %v7436_v39 = vpop.permute.xlu1 %989  ;;  %v7438_v40 = vpop.permute.xlu0 %987 }
 0x114   :  { %9164 = vst [vmem:[#allocation31_spill] sm:$0xff] %v7436_v39  ;;  %9165 = vst [vmem:[#allocation32_spill] sm:$0xff] %v7438_v40 }
 0x115   :  { %1475 = vrot.lane.b32.xlu1 %v1463_v33, %s6596_s23  ;;  %1473 = vrot.lane.b32.xlu0 %v1461_v34, %s6596_s23  ;;  %v1511_v33 = vmul.f32 %v1506_v58, %v7181_v51 }
 0x117   :  { %v7444_v56 = vpop.permute.xlu1 %1027  ;;  %v7446_v57 = vpop.permute.xlu0 %1025 }
 0x118   :  { %9166 = vst [vmem:[#allocation33_spill] sm:$0xff] %v7444_v56  ;;  %9167 = vst [vmem:[#allocation34_spill] sm:$0xff] %v7446_v57 }
 0x119   :  { %1479 = vrot.lane.b32.xlu1 %v1464_v35, %s6596_s23  ;;  %1477 = vrot.lane.b32.xlu0 %v1465_v52, %s6596_s23  ;;  %v1530_v52 = vrot.slane %v1511_v33, 2 }
 0x11b   :  { %v7455_v9 = vpop.permute.xlu1 %1031  ;;  %v7457_v10 = vpop.permute.xlu0 %1029 }
 0x11c   :  { %9168 = vst [vmem:[#allocation35_spill] sm:$0xff] %v7455_v9  ;;  %9169 = vst [vmem:[#allocation36_spill] sm:$0xff] %v7457_v10 }
 0x11d   :  { %1483 = vrot.lane.b32.xlu1 %v1470_v59, %s6596_s23  ;;  %1481 = vrot.lane.b32.xlu0 %v1468_v1, %s6596_s23  ;;  %v1532_v1 = vsel %vm682_vm1, %v1530_v52, %v1531_v46 }
 0x11f   :  { %v7463_v20 = vpop.permute.xlu1 %1035  ;;  %v7465_v23 = vpop.permute.xlu0 %1033 }
 0x120   :  { %9170 = vst [vmem:[#allocation37_spill] sm:$0xff] %v7463_v20  ;;  %9171 = vst [vmem:[#allocation38_spill] sm:$0xff] %v7465_v23 }
 0x121   :  { %1487 = vrot.lane.b32.xlu1 %v1471_v0, %s6596_s23  ;;  %1485 = vrot.lane.b32.xlu0 %v1472_v11, %s6596_s23  ;;  %v1534_v0 = vsel %vm682_vm1, %v1531_v46, %v1533_v47  ;;  %v1570_v11 = vstv %s5432_s16  ;;  %s5443_s16 = sld [smem:[#allocation5 + $0x23]] }
 0x122   :  { %v1572_v16 = vmul.f32 %v1570_v11, %v7165_v45  ;;  %v1571_v17 = vmul.f32 %v1570_v11, %v7155_v42  ;;  %v1576_v36 = vmul.f32 %v1570_v11, %v7176_v50  ;;  %v1578_v52 = vmul.f32 %v1570_v11, %v7190_v54 }
 0x123   :  { %v7474_v34 = vpop.permute.xlu1 %1039  ;;  %v7476_v35 = vpop.permute.xlu0 %1037 }
 0x124   :  { %9172 = vst [vmem:[#allocation39_spill] sm:$0xff] %v7474_v34  ;;  %9173 = vst [vmem:[#allocation40_spill] sm:$0xff] %v7476_v35  ;;  %v1720_v34 = vstv %s5435_s20  ;;  %s7925_s20 = sld [smem:[#allocation5 + $0x8]] }
 0x125   :  { %1539 = vrot.lane.b32.xlu1 %v1527_v26, %s6596_s23  ;;  %1537 = vrot.lane.b32.xlu0 %v1525_v31, %s6596_s23  ;;  %v1574_v26 = vmul.f32 %v1570_v11, %v7160_v44  ;;  %v1573_v31 = vmul.f32 %v1570_v11, %v7150_v41 }
 0x127   :  { %v7482_v53 = vpop.permute.xlu1 %1091  ;;  %v7484_v59 = vpop.permute.xlu0 %1089 }
 0x128   :  { %9174 = vst [vmem:[#allocation41_spill] sm:$0xff] %v7482_v53  ;;  %9175 = vst [vmem:[#allocation42_spill] sm:$0xff] %v7484_v59 }
 0x129   :  { %1543 = vrot.lane.b32.xlu1 %v1528_v32, %s6596_s23  ;;  %1541 = vrot.lane.b32.xlu0 %v1529_v43, %s6596_s23  ;;  %v1575_v43 = vmul.f32 %v1570_v11, %v7181_v51 }
 0x12a   :  { %v7966_v19 = vstv %s7925_s20  ;;  %s6600_s20 = smov 78  }
 0x12b   :  { %v7490_v58 = vpop.permute.xlu1 %1095  ;;  %v7492_v3 = vpop.permute.xlu0 %1093 }
 0x12c   :  { %9176 = vst [vmem:[#allocation43_spill] sm:$0xff] %v7490_v58  ;;  %9177 = vst [vmem:[#allocation44_spill] sm:$0xff] %v7492_v3 }
 0x12d   :  { %1547 = vrot.lane.b32.xlu1 %v1534_v0, %s6596_s23  ;;  %1545 = vrot.lane.b32.xlu0 %v1532_v1, %s6596_s23  ;;  %v1577_v0 = vmul.f32 %v1570_v11, %v7195_v55  ;;  %v1620_v1 = vstv %s5433_s18  ;;  %s5416_s18 = sld [smem:[#allocation5 + $0x6]] }
 0x12e   :  { %v1624_v11 = vmul.f32 %v1620_v1, %v7160_v44 }
 0x12f   :  { %v7497_v12 = vpop.permute.xlu1 %1099  ;;  %v7499_v15 = vpop.permute.xlu0 %1097 }
 0x130   :  { %9178 = vst [vmem:[#allocation45_spill] sm:$0xff] %v7497_v12  ;;  %9179 = vst [vmem:[#allocation46_spill] sm:$0xff] %v7499_v15  ;;  %v1627_v15 = vmul.f32 %v1620_v1, %v7195_v55  ;;  %v1670_v12 = vstv %s5434_s19  ;;  %s431_s19 = sld [smem:[#allocation5]] }
 0x131   :  { %1551 = vrot.lane.b32.xlu1 %v1535_v2, %s6596_s23  ;;  %1549 = vrot.lane.b32.xlu0 %v1536_v4, %s6596_s23  ;;  %v1672_v3 = vmul.f32 %v1670_v12, %v7165_v45  ;;  %v1671_v58 = vmul.f32 %v1670_v12, %v7155_v42  ;;  %v1673_v22 = vmul.f32 %v1670_v12, %v7150_v41  ;;  %s8129_s23 = sld [smem:[#allocation5 + $0x15]] }
 0x132   :  { %v1676_v59 = vmul.f32 %v1670_v12, %v7176_v50  ;;  %v1675_v53 = vmul.f32 %v1670_v12, %v7181_v51  ;;  %v1678_v21 = vmul.f32 %v1670_v12, %v7190_v54  ;;  %v1677_v35 = vmul.f32 %v1670_v12, %v7195_v55 }
 0x133   :  { %v7505_v24 = vpop.permute.xlu1 %1103  ;;  %v7507_v25 = vpop.permute.xlu0 %1101 }
 0x134   :  { %9180 = vst [vmem:[#allocation47_spill] sm:$0xff] %v7505_v24  ;;  %9181 = vst [vmem:[#allocation48_spill] sm:$0xff] %v7507_v25  ;;  %v1625_v25 = vmul.f32 %v1620_v1, %v7181_v51  ;;  %v1628_v24 = vmul.f32 %v1620_v1, %v7190_v54 }
 0x135   :  { %1589 = vrot.lane.b32.xlu1 %v1572_v16, %s6597_s17  ;;  %1587 = vrot.lane.b32.xlu0 %v1571_v17, %s6597_s17  ;;  %v1622_v16 = vmul.f32 %v1620_v1, %v7165_v45  ;;  %v1621_v17 = vmul.f32 %v1620_v1, %v7155_v42 }
 0x137   :  { %v7513_v32 = vpop.permute.xlu1 %1155  ;;  %v7515_v33 = vpop.permute.xlu0 %1153 }
 0x139   :  { %1593 = vrot.lane.b32.xlu1 %v1574_v26, %s6597_s17  ;;  %1591 = vrot.lane.b32.xlu0 %v1573_v31, %s6597_s17 }
 0x13b   :  { %v7521_v46 = vpop.permute.xlu1 %1159  ;;  %v7523_v47 = vpop.permute.xlu0 %1157 }
 0x13c   :  { %9182 = vst [vmem:[#allocation49_spill] sm:$0xff] %v7521_v46  ;;  %9183 = vst [vmem:[#allocation50_spill] sm:$0xff] %v7523_v47  ;;  %v8084_v46 = vstv %s8017_s22 }
 0x13d   :  { %1597 = vrot.lane.b32.xlu1 %v1576_v36, %s6597_s17  ;;  %1595 = vrot.lane.b32.xlu0 %v1575_v43, %s6597_s17  ;;  %v1623_v36 = vmul.f32 %v1620_v1, %v7150_v41 }
 0x13f   :  { %v7529_v2 = vpop.permute.xlu1 %1163  ;;  %v7531_v4 = vpop.permute.xlu0 %1161 }
 0x140   :  { %9184 = vst [vmem:[#allocation51_spill] sm:$0xff] %v7529_v2  ;;  %9185 = vst [vmem:[#allocation52_spill] sm:$0xff] %v7531_v4 }
 0x141   :  { %1601 = vrot.lane.b32.xlu1 %v1578_v52, %s6597_s17  ;;  %1599 = vrot.lane.b32.xlu0 %v1577_v0, %s6597_s17  ;;  %v1626_v0 = vmul.f32 %v1620_v1, %v7176_v50  ;;  %v1674_v1 = vmul.f32 %v1670_v12, %v7160_v44  ;;  %v1724_v12 = vmul.f32 %v1720_v34, %v7160_v44 }
 0x143   :  { %v7537_v26 = vpop.permute.xlu1 %1167  ;;  %v7539_v31 = vpop.permute.xlu0 %1165 }
 0x144   :  { %9186 = vst [vmem:[#allocation53_spill] sm:$0xff] %v7537_v26  ;;  %9187 = vst [vmem:[#allocation54_spill] sm:$0xff] %v7539_v31  ;;  %v7874_v26 = vstv %s5412_s15  ;;  %s6598_s15 = smov 26  }
 0x145   :  { %1639 = vrot.lane.b32.xlu1 %v1622_v16, %s6597_s17  ;;  %1637 = vrot.lane.b32.xlu0 %v1621_v17, %s6597_s17 }
 0x147   :  { %v7545_v43 = vpop.permute.xlu1 %1219  ;;  %v7547_v52 = vpop.permute.xlu0 %1217 }
 0x148   :  { %9188 = vst [vmem:[#allocation55_spill] sm:$0xff] %v7545_v43  ;;  %9189 = vst [vmem:[#allocation56_spill] sm:$0xff] %v7547_v52  ;;  %v1898_v43 = vstv %s5438_s2 }
 0x149   :  { %1643 = vrot.lane.b32.xlu1 %v1624_v11, %s6597_s17  ;;  %1641 = vrot.lane.b32.xlu0 %v1623_v36, %s6597_s17 }
 0x14b   :  { %v7553_v16 = vpop.permute.xlu1 %1223  ;;  %v7555_v17 = vpop.permute.xlu0 %1221 }
 0x14c   :  { %9190 = vst [vmem:[#allocation57_spill] sm:$0xff] %v7553_v16  ;;  %9191 = vst [vmem:[#allocation58_spill] sm:$0xff] %v7555_v17 }
 0x14d   :  { %1647 = vrot.lane.b32.xlu1 %v1626_v0, %s6597_s17  ;;  %1645 = vrot.lane.b32.xlu0 %v1625_v25, %s6597_s17 }
 0x14f   :  { %v7561_v11 = vpop.permute.xlu1 %1227  ;;  %v7563_v36 = vpop.permute.xlu0 %1225 }
 0x150   :  { %9192 = vst [vmem:[#allocation59_spill] sm:$0xff] %v7561_v11  ;;  %9193 = vst [vmem:[#allocation60_spill] sm:$0xff] %v7563_v36 }
 0x151   :  { %1651 = vrot.lane.b32.xlu1 %v1628_v24, %s6597_s17  ;;  %1649 = vrot.lane.b32.xlu0 %v1627_v15, %s6597_s17 }
 0x153   :  { %v7569_v0 = vpop.permute.xlu1 %1231  ;;  %v7571_v25 = vpop.permute.xlu0 %1229 }
 0x154   :  { %9194 = vst [vmem:[#allocation61_spill] sm:$0xff] %v7569_v0  ;;  %9195 = vst [vmem:[#allocation62_spill] sm:$0xff] %v7571_v25 }
 0x155   :  { %1689 = vrot.lane.b32.xlu1 %v1672_v3, %s6597_s17  ;;  %1687 = vrot.lane.b32.xlu0 %v1671_v58, %s6597_s17 }
 0x157   :  { %v7577_v24 = vpop.permute.xlu1 %1283  ;;  %v7579_v15 = vpop.permute.xlu0 %1281 }
 0x158   :  { %9196 = vst [vmem:[#allocation63_spill] sm:$0xff] %v7577_v24  ;;  %9197 = vst [vmem:[#allocation64_spill] sm:$0xff] %v7579_v15 }
 0x159   :  { %1693 = vrot.lane.b32.xlu1 %v1674_v1, %s6597_s17  ;;  %1691 = vrot.lane.b32.xlu0 %v1673_v22, %s6597_s17 }
 0x15b   :  { %v7585_v3 = vpop.permute.xlu1 %1287  ;;  %v7587_v58 = vpop.permute.xlu0 %1285 }
 0x15c   :  { %9198 = vst [vmem:[#allocation65_spill] sm:$0xff] %v7585_v3  ;;  %9199 = vst [vmem:[#allocation66_spill] sm:$0xff] %v7587_v58  ;;  %v1722_v58 = vmul.f32 %v1720_v34, %v7165_v45 }
 0x15d   :  { %1697 = vrot.lane.b32.xlu1 %v1676_v59, %s6597_s17  ;;  %1695 = vrot.lane.b32.xlu0 %v1675_v53, %s6597_s17  ;;  %v1721_v59 = vmul.f32 %v1720_v34, %v7155_v42 }
 0x15f   :  { %v7593_v1 = vpop.permute.xlu1 %1291  ;;  %v7595_v22 = vpop.permute.xlu0 %1289 }
 0x160   :  { %9200 = vst [vmem:[#allocation67_spill] sm:$0xff] %v7593_v1  ;;  %9201 = vst [vmem:[#allocation68_spill] sm:$0xff] %v7595_v22  ;;  %v1723_v22 = vmul.f32 %v1720_v34, %v7150_v41 }
 0x161   :  { %1701 = vrot.lane.b32.xlu1 %v1678_v21, %s6597_s17  ;;  %1699 = vrot.lane.b32.xlu0 %v1677_v35, %s6597_s17  ;;  %v1770_v35 = vstv %s5436_s21  ;;  %s7958_s21 = sld [smem:[#allocation5 + $0x9]] }
 0x162   :  { %v1771_v15 = vmul.f32 %v1770_v35, %v7155_v42  ;;  %v1774_v0 = vmul.f32 %v1770_v35, %v7160_v44  ;;  %v1775_v44 = vmul.f32 %v1770_v35, %v7181_v51 }
 0x163   :  { %v7601_v3 = vpop.permute.xlu1 %1295  ;;  %v7603_v53 = vpop.permute.xlu0 %1293 }
 0x164   :  { %9202 = vst [vmem:[#allocation69_spill] sm:$0xff] %v7601_v3  ;;  %9203 = vst [vmem:[#allocation70_spill] sm:$0xff] %v7603_v53  ;;  %v1726_v3 = vmul.f32 %v1720_v34, %v7176_v50  ;;  %v1725_v53 = vmul.f32 %v1720_v34, %v7181_v51  ;;  %v1787_v25 = vrot.slane %v1771_v15, 1  ;;  %v1792_v15 = vrot.slane %v1774_v0, 1 }
 0x165   :  { %1739 = vrot.lane.b32.xlu1 %v1722_v58, %s6597_s17  ;;  %1737 = vrot.lane.b32.xlu0 %v1721_v59, %s6597_s17  ;;  %v1772_v58 = vmul.f32 %v1770_v35, %v7165_v45  ;;  %v1773_v59 = vmul.f32 %v1770_v35, %v7150_v41  ;;  %v1834_v51 = vstv %s5437_s3  ;;  %s7983_s3 = sld [smem:[#allocation5 + $0xc]] }
 0x167   :  { %v7609_v1 = vpop.permute.xlu1 %1347  ;;  %v7611_v21 = vpop.permute.xlu0 %1345  ;;  %v1790_v23 = vrot.slane %v1773_v59, 1 }
 0x168   :  { %9204 = vst [vmem:[#allocation71_spill] sm:$0xff] %v7609_v1  ;;  %9205 = vst [vmem:[#allocation72_spill] sm:$0xff] %v7611_v21  ;;  %v1788_v21 = vrot.slane %v1772_v58, 1 }
 0x169   :  { %1743 = vrot.lane.b32.xlu1 %v1724_v12, %s6597_s17  ;;  %1741 = vrot.lane.b32.xlu0 %v1723_v22, %s6597_s17  ;;  %v1728_v22 = vmul.f32 %v1720_v34, %v7190_v54  ;;  %v1727_v12 = vmul.f32 %v1720_v34, %v7195_v55 }
 0x16a   :  { %v1791_v34 = vsel %vm489_vm0, %v1788_v21, %v1790_v23  ;;  %v1789_v58 = vsel %vm489_vm0, %v1787_v25, %v1788_v21 }
 0x16b   :  { %v7620_v24 = vpop.permute.xlu1 %1351  ;;  %v7622_v1 = vpop.permute.xlu0 %1349 }
 0x16c   :  { %9206 = vst [vmem:[#allocation73_spill] sm:$0xff] %v7620_v24  ;;  %9207 = vst [vmem:[#allocation74_spill] sm:$0xff] %v7622_v1 }
 0x16d   :  { %1747 = vrot.lane.b32.xlu1 %v1726_v3, %s6597_s17  ;;  %1745 = vrot.lane.b32.xlu0 %v1725_v53, %s6597_s17  ;;  %v1776_v3 = vmul.f32 %v1770_v35, %v7176_v50  ;;  %v1777_v53 = vmul.f32 %v1770_v35, %v7195_v55  ;;  %v1778_v50 = vmul.f32 %v1770_v35, %v7190_v54  ;;  %v7660_v54 = vld [vmem:[%s9142_s0 + $0x10] sm:$0xff]  ;;  %v7666_v35 = vld [vmem:[%s9142_s0] sm:$0xff] }
 0x16e   :  { %v1793_v55 = vsel %vm489_vm0, %v1790_v23, %v1792_v15  ;;  %v1837_v23 = vmul.f32 %v7660_v54, %v1834_v51 }
 0x16f   :  { %v7629_v41 = vpop.permute.xlu1 %1355  ;;  %v7631_v42 = vpop.permute.xlu0 %1353  ;;  %v1799_v21 = vrot.slane %v1778_v50, 1  ;;  %v7679_v50 = vld [vmem:[%s9142_s0 + $0x18] sm:$0xf] }
 0x170   :  { %9208 = vst [vmem:[#allocation75_spill] sm:$0xff] %v7629_v41  ;;  %9209 = vst [vmem:[#allocation76_spill] sm:$0xff] %v7631_v42  ;;  %v1794_v42 = vrot.slane %v1775_v44, 1  ;;  %v1854_v44 = vrot.slane %v1837_v23, 1 }
 0x171   :  { %1751 = vrot.lane.b32.xlu1 %v1728_v22, %s6597_s17  ;;  %1749 = vrot.lane.b32.xlu0 %v1727_v12, %s6597_s17  ;;  %v1795_v22 = vrot.slane %v1776_v3, 1  ;;  %v1797_v12 = vrot.slane %v1777_v53, 1  ;;  %v1836_v53 = vmul.f32 %v1834_v51, %v7165_v45 }
 0x173   :  { %v7640_v59 = vpop.permute.xlu1 %1359  ;;  %v7642_v41 = vpop.permute.xlu0 %1357  ;;  %v1798_v25 = vsel %vm489_vm0, %v1795_v22, %v1797_v12  ;;  %v1796_v3 = vsel %vm489_vm0, %v1794_v42, %v1795_v22  ;;  %v1800_v45 = vsel %vm489_vm0, %v1797_v12, %v1799_v21  ;;  %v1852_v42 = vrot.slane %v1836_v53, 1  ;;  %v7691_v12 = vld [vmem:[%s9142_s0 + $0x28] sm:$0xff] }
 0x174   :  { %9210 = vst [vmem:[#allocation77_spill] sm:$0xff] %v7640_v59  ;;  %9211 = vst [vmem:[#allocation78_spill] sm:$0xff] %v7642_v41 }
 0x175   :  { %1803 = vrot.lane.b32.xlu1 %v1791_v34, %s6597_s17  ;;  %1801 = vrot.lane.b32.xlu0 %v1789_v58, %s6597_s17  ;;  %v1835_v34 = vmul.f32 %v7666_v35, %v1834_v51  ;;  %v1855_v23 = vsel %vm489_vm0, %v1852_v42, %v1854_v44 }
 0x177   :  { %v7648_v1 = vpop.permute.xlu1 %1411  ;;  %v7650_v0 = vpop.permute.xlu0 %1409  ;;  %v1851_v22 = vrot.slane %v1835_v34, 1 }
 0x178   :  { %9212 = vst [vmem:[#allocation79_spill] sm:$0xff] %v7648_v1  ;;  %9213 = vst [vmem:[#allocation80_spill] sm:$0xff] %v7650_v0 }
 0x179   :  { %1807 = vrot.lane.b32.xlu1 %v1792_v15, %s6597_s17  ;;  %1805 = vrot.lane.b32.xlu0 %v1793_v55, %s6597_s17  ;;  %v1838_v55 = vmul.f32 %v7679_v50, %v1834_v51 }
 0x17b   :  { %v7669_v58 = vpop.permute.xlu1 %1415  ;;  %v7671_v15 = vpop.permute.xlu0 %1413  ;;  %v1856_v34 = vrot.slane %v1838_v55, 1 }
 0x17c   :  { %9214 = vst [vmem:[#allocation81_spill] sm:$0xff] %v7669_v58  ;;  %9215 = vst [vmem:[#allocation82_spill] sm:$0xff] %v7671_v15 }
 0x17d   :  { %1811 = vrot.lane.b32.xlu1 %v1798_v25, %s6597_s17  ;;  %1809 = vrot.lane.b32.xlu0 %v1796_v3, %s6597_s17  ;;  %v1840_v25 = vmul.f32 %v7691_v12, %v1834_v51  ;;  %v7697_v3 = vld [vmem:[%s9142_s0 + $0x30] sm:$0xff]  ;;  %v1857_v55 = vsel %vm489_vm0, %v1854_v44, %v1856_v34  ;;  %v1901_v44 = vmul.f32 %v7660_v54, %v1898_v43 }
 0x17e   :  { %v1841_v53 = vmul.f32 %v7697_v3, %v1834_v51 }
 0x17f   :  { %v7682_v41 = vpop.permute.xlu1 %1419  ;;  %v7684_v59 = vpop.permute.xlu0 %1417  ;;  %v1859_v11 = vrot.slane %v1840_v25, 1 }
 0x180   :  { %9216 = vst [vmem:[#allocation83_spill] sm:$0xff] %v7682_v41  ;;  %9217 = vst [vmem:[#allocation84_spill] sm:$0xff] %v7684_v59  ;;  %v1861_v17 = vrot.slane %v1841_v53, 1 }
 0x181   :  { %1815 = vrot.lane.b32.xlu1 %v1799_v21, %s6597_s17  ;;  %1813 = vrot.lane.b32.xlu0 %v1800_v45, %s6597_s17  ;;  %v1853_v21 = vsel %vm489_vm0, %v1851_v22, %v1852_v42  ;;  %v7705_v45 = vld [vmem:[%s9142_s0 + $0x20] sm:$0xff]  ;;  %v7717_v42 = vld [vmem:[%s9142_s0 + $0x38] sm:$0xf] }
 0x182   :  { %v1839_v24 = vmul.f32 %v7705_v45, %v1834_v51  ;;  %v1842_v22 = vmul.f32 %v7717_v42, %v1834_v51  ;;  %v1862_v25 = vsel %vm489_vm0, %v1859_v11, %v1861_v17  ;;  %v7732_v51 = vld [vmem:[%s9142_s0 + $0x8] sm:$0xff] }
 0x183   :  { %v7708_v20 = vpop.permute.xlu1 %1423  ;;  %v7710_v36 = vpop.permute.xlu0 %1421 }
 0x184   :  { %9218 = vst [vmem:[#allocation85_spill] sm:$0xff] %v7708_v20  ;;  %9219 = vst [vmem:[#allocation86_spill] sm:$0xff] %v7710_v36  ;;  %v1858_v16 = vrot.slane %v1839_v24, 1  ;;  %v1863_v53 = vrot.slane %v1842_v22, 1  ;;  %v1900_v24 = vmul.f32 %v7732_v51, %v1898_v43  ;;  %v1918_v22 = vrot.slane %v1901_v44, 1 }
 0x185   :  { %1867 = vrot.lane.b32.xlu1 %v1855_v23, %s6597_s17  ;;  %1865 = vrot.lane.b32.xlu0 %v1853_v21, %s6597_s17  ;;  %v1899_v21 = vmul.f32 %v7666_v35, %v1898_v43 }
 0x186   :  { %v1860_v23 = vsel %vm489_vm0, %v1858_v16, %v1859_v11  ;;  %v1864_v16 = vsel %vm489_vm0, %v1861_v17, %v1863_v53  ;;  %v1916_v11 = vrot.slane %v1900_v24, 1 }
 0x187   :  { %v7721_v10 = vpop.permute.xlu1 %1475  ;;  %v7723_v52 = vpop.permute.xlu0 %1473 }
 0x188   :  { %9220 = vst [vmem:[#allocation87_spill] sm:$0xff] %v7721_v10  ;;  %9221 = vst [vmem:[#allocation88_spill] sm:$0xff] %v7723_v52  ;;  %v1902_v10 = vmul.f32 %v7679_v50, %v1898_v43  ;;  %v1919_v17 = vsel %vm489_vm0, %v1916_v11, %v1918_v22 }
 0x189   :  { %1871 = vrot.lane.b32.xlu1 %v1856_v34, %s6597_s17  ;;  %1869 = vrot.lane.b32.xlu0 %v1857_v55, %s6597_s17  ;;  %v1915_v55 = vrot.slane %v1899_v21, 1  ;;  %v1903_v21 = vmul.f32 %v7705_v45, %v1898_v43 }
 0x18a   :  { %v1920_v44 = vrot.slane %v1902_v10, 1 }
 0x18b   :  { %v7737_v52 = vpop.permute.xlu1 %1479  ;;  %v7739_v34 = vpop.permute.xlu0 %1477  ;;  %v1917_v24 = vsel %vm489_vm0, %v1915_v55, %v1916_v11  ;;  %v1922_v9 = vrot.slane %v1903_v21, 1  ;;  %v1962_v11 = vstv %s5439_s12 }
 0x18c   :  { %9222 = vst [vmem:[#allocation89_spill] sm:$0xff] %v7737_v52  ;;  %9223 = vst [vmem:[#allocation90_spill] sm:$0xff] %v7739_v34  ;;  %v1921_v52 = vsel %vm489_vm0, %v1918_v22, %v1920_v44  ;;  %v1963_v22 = vmul.f32 %v7666_v35, %v1962_v11 }
 0x18d   :  { %1875 = vrot.lane.b32.xlu1 %v1862_v25, %s6597_s17  ;;  %1873 = vrot.lane.b32.xlu0 %v1860_v23, %s6597_s17  ;;  %v1904_v25 = vmul.f32 %v7691_v12, %v1898_v43  ;;  %v1905_v23 = vmul.f32 %v7697_v3, %v1898_v43 }
 0x18f   :  { %v7745_v36 = vpop.permute.xlu1 %1483  ;;  %v7747_v20 = vpop.permute.xlu0 %1481 }
 0x190   :  { %9224 = vst [vmem:[#allocation91_spill] sm:$0xff] %v7745_v36  ;;  %9225 = vst [vmem:[#allocation92_spill] sm:$0xff] %v7747_v20  ;;  %v1906_v20 = vmul.f32 %v7717_v42, %v1898_v43  ;;  %v1965_v43 = vmul.f32 %v7660_v54, %v1962_v11 }
 0x191   :  { %1879 = vrot.lane.b32.xlu1 %v1863_v53, %s6597_s17  ;;  %1877 = vrot.lane.b32.xlu0 %v1864_v16, %s6597_s17  ;;  %v1923_v53 = vrot.slane %v1904_v25, 1  ;;  %v1925_v16 = vrot.slane %v1905_v23, 1  ;;  %v1964_v23 = vmul.f32 %v7732_v51, %v1962_v11 }
 0x193   :  { %v7756_v34 = vpop.permute.xlu1 %1487  ;;  %v7758_v36 = vpop.permute.xlu0 %1485  ;;  %v1926_v55 = vsel %vm489_vm0, %v1923_v53, %v1925_v16  ;;  %v1924_v25 = vsel %vm489_vm0, %v1922_v9, %v1923_v53  ;;  %v1966_v9 = vmul.f32 %v7679_v50, %v1962_v11 }
 0x194   :  { %9226 = vst [vmem:[#allocation93_spill] sm:$0xff] %v7756_v34  ;;  %9227 = vst [vmem:[#allocation94_spill] sm:$0xff] %v7758_v36 }
 0x195   :  { %1931 = vrot.lane.b32.xlu1 %v1919_v17, %s6597_s17  ;;  %1929 = vrot.lane.b32.xlu0 %v1917_v24, %s6597_s17  ;;  %v1927_v17 = vrot.slane %v1906_v20, 1  ;;  %v1982_v20 = vrot.slane %v1965_v43, 1  ;;  %v1984_v43 = vrot.slane %v1966_v9, 1 }
 0x197   :  { %v7764_v31 = vpop.permute.xlu1 %1539  ;;  %v7766_v10 = vpop.permute.xlu0 %1537 }
 0x198   :  { %9228 = vst [vmem:[#allocation95_spill] sm:$0xff] %v7764_v31  ;;  %9229 = vst [vmem:[#allocation96_spill] sm:$0xff] %v7766_v10  ;;  %v1979_v10 = vrot.slane %v1963_v22, 1  ;;  %v1967_v22 = vmul.f32 %v7705_v45, %v1962_v11 }
 0x199   :  { %1935 = vrot.lane.b32.xlu1 %v1920_v44, %s6597_s17  ;;  %1933 = vrot.lane.b32.xlu0 %v1921_v52, %s6597_s17  ;;  %v1928_v52 = vsel %vm489_vm0, %v1925_v16, %v1927_v17  ;;  %v1980_v44 = vrot.slane %v1964_v23, 1 }
 0x19a   :  { %v1986_v36 = vrot.slane %v1967_v22, 1 }
 0x19b   :  { %v7775_v24 = vpop.permute.xlu1 %1543  ;;  %v7777_v21 = vpop.permute.xlu0 %1541  ;;  %v1983_v16 = vsel %vm489_vm0, %v1980_v44, %v1982_v20  ;;  %v1981_v23 = vsel %vm489_vm0, %v1979_v10, %v1980_v44  ;;  %v2090_v44 = vstv %s5441_s13 }
 0x19c   :  { %9230 = vst [vmem:[#allocation97_spill] sm:$0xff] %v7775_v24  ;;  %9231 = vst [vmem:[#allocation98_spill] sm:$0xff] %v7777_v21  ;;  %v1985_v24 = vsel %vm489_vm0, %v1982_v20, %v1984_v43  ;;  %v2091_v20 = vmul.f32 %v7666_v35, %v2090_v44 }
 0x19d   :  { %1939 = vrot.lane.b32.xlu1 %v1926_v55, %s6597_s17  ;;  %1937 = vrot.lane.b32.xlu0 %v1924_v25, %s6597_s17  ;;  %v1968_v55 = vmul.f32 %v7691_v12, %v1962_v11  ;;  %v1969_v25 = vmul.f32 %v7697_v3, %v1962_v11 }
 0x19f   :  { %v7783_v53 = vpop.permute.xlu1 %1547  ;;  %v7785_v31 = vpop.permute.xlu0 %1545 }
 0x1a0   :  { %9232 = vst [vmem:[#allocation99_spill] sm:$0xff] %v7783_v53  ;;  %9233 = vst [vmem:[#allocation100_spill] sm:$0xff] %v7785_v31  ;;  %v1970_v31 = vmul.f32 %v7717_v42, %v1962_v11  ;;  %v2093_v11 = vmul.f32 %v7660_v54, %v2090_v44 }
 0x1a1   :  { %1943 = vrot.lane.b32.xlu1 %v1927_v17, %s6597_s17  ;;  %1941 = vrot.lane.b32.xlu0 %v1928_v52, %s6597_s17  ;;  %v1987_v17 = vrot.slane %v1968_v55, 1  ;;  %v1989_v52 = vrot.slane %v1969_v25, 1  ;;  %v2092_v25 = vmul.f32 %v7732_v51, %v2090_v44 }
 0x1a3   :  { %v7794_v21 = vpop.permute.xlu1 %1551  ;;  %v7796_v53 = vpop.permute.xlu0 %1549  ;;  %v1990_v9 = vsel %vm489_vm0, %v1987_v17, %v1989_v52  ;;  %v1988_v55 = vsel %vm489_vm0, %v1986_v36, %v1987_v17  ;;  %v2094_v36 = vmul.f32 %v7679_v50, %v2090_v44 }
 0x1a4   :  { %9234 = vst [vmem:[#allocation101_spill] sm:$0xff] %v7794_v21  ;;  %9235 = vst [vmem:[#allocation102_spill] sm:$0xff] %v7796_v53 }
 0x1a5   :  { %1995 = vrot.lane.b32.xlu1 %v1983_v16, %s6597_s17  ;;  %1993 = vrot.lane.b32.xlu0 %v1981_v23, %s6597_s17  ;;  %v1991_v16 = vrot.slane %v1970_v31, 1  ;;  %v2110_v31 = vrot.slane %v2093_v11, 2  ;;  %v2112_v11 = vrot.slane %v2094_v36, 2 }
 0x1a7   :  { %v7802_v34 = vpop.permute.xlu1 %1589  ;;  %v7804_v10 = vpop.permute.xlu0 %1587 }
 0x1a8   :  { %9236 = vst [vmem:[#allocation103_spill] sm:$0xff] %v7802_v34  ;;  %9237 = vst [vmem:[#allocation104_spill] sm:$0xff] %v7804_v10  ;;  %v2107_v10 = vrot.slane %v2091_v20, 2  ;;  %v2095_v20 = vmul.f32 %v7705_v45, %v2090_v44 }
 0x1a9   :  { %1999 = vrot.lane.b32.xlu1 %v1984_v43, %s6597_s17  ;;  %1997 = vrot.lane.b32.xlu0 %v1985_v24, %s6597_s17  ;;  %v1992_v24 = vsel %vm489_vm0, %v1989_v52, %v1991_v16  ;;  %v2108_v43 = vrot.slane %v2092_v25, 2 }
 0x1aa   :  { %v2114_v53 = vrot.slane %v2095_v20, 2 }
 0x1ab   :  { %v7813_v23 = vpop.permute.xlu1 %1593  ;;  %v7815_v22 = vpop.permute.xlu0 %1591  ;;  %v2111_v52 = vsel %vm682_vm1, %v2108_v43, %v2110_v31  ;;  %v2109_v25 = vsel %vm682_vm1, %v2107_v10, %v2108_v43  ;;  %v2154_v43 = vstv %s5442_s14 }
 0x1ac   :  { %9238 = vst [vmem:[#allocation105_spill] sm:$0xff] %v7813_v23  ;;  %9239 = vst [vmem:[#allocation106_spill] sm:$0xff] %v7815_v22  ;;  %v2113_v23 = vsel %vm682_vm1, %v2110_v31, %v2112_v11  ;;  %v2155_v31 = vmul.f32 %v7666_v35, %v2154_v43  ;;  %v2162_v57 = vmul.f32 %v7717_v42, %v2154_v43 }
 0x1ad   :  { %2003 = vrot.lane.b32.xlu1 %v1990_v9, %s6597_s17  ;;  %2001 = vrot.lane.b32.xlu0 %v1988_v55, %s6597_s17  ;;  %v2096_v9 = vmul.f32 %v7691_v12, %v2090_v44  ;;  %v2097_v55 = vmul.f32 %v7697_v3, %v2090_v44 }
 0x1af   :  { %v7821_v17 = vpop.permute.xlu1 %1597  ;;  %v7823_v34 = vpop.permute.xlu0 %1595 }
 0x1b0   :  { %9240 = vst [vmem:[#allocation107_spill] sm:$0xff] %v7821_v17  ;;  %9241 = vst [vmem:[#allocation108_spill] sm:$0xff] %v7823_v34  ;;  %v2098_v34 = vmul.f32 %v7717_v42, %v2090_v44  ;;  %v2157_v44 = vmul.f32 %v7660_v54, %v2154_v43 }
 0x1b1   :  { %2007 = vrot.lane.b32.xlu1 %v1991_v16, %s6597_s17  ;;  %2005 = vrot.lane.b32.xlu0 %v1992_v24, %s6597_s17  ;;  %v2115_v16 = vrot.slane %v2096_v9, 2  ;;  %v2117_v24 = vrot.slane %v2097_v55, 2  ;;  %v2156_v55 = vmul.f32 %v7732_v51, %v2154_v43 }
 0x1b3   :  { %v7832_v22 = vpop.permute.xlu1 %1601  ;;  %v7834_v17 = vpop.permute.xlu0 %1599  ;;  %v2118_v36 = vsel %vm682_vm1, %v2115_v16, %v2117_v24  ;;  %v2116_v9 = vsel %vm682_vm1, %v2114_v53, %v2115_v16  ;;  %v2171_v53 = vrot.slane %v2155_v31, 2  ;;  %v2158_v16 = vmul.f32 %v7679_v50, %v2154_v43 }
 0x1b4   :  { %9242 = vst [vmem:[#allocation109_spill] sm:$0xff] %v7832_v22  ;;  %9243 = vst [vmem:[#allocation110_spill] sm:$0xff] %v7834_v17 }
 0x1b5   :  { %2123 = vrot.lane.b32.xlu1 %v2111_v52, %s6597_s17  ;;  %2121 = vrot.lane.b32.xlu0 %v2109_v25, %s6597_s17  ;;  %v2119_v52 = vrot.slane %v2098_v34, 2  ;;  %v2172_v34 = vrot.slane %v2156_v55, 2  ;;  %v2176_v31 = vrot.slane %v2158_v16, 2  ;;  %v2218_v16 = vstv %s5443_s16  ;;  %s8567_s16 = sld [smem:[#allocation8 + $0x2]] }
 0x1b6   :  { %v2225_v58 = vmul.f32 %v7697_v3, %v2218_v16  ;;  %v2226_v27 = vmul.f32 %v7717_v42, %v2218_v16 }
 0x1b7   :  { %v7840_v21 = vpop.permute.xlu1 %1639  ;;  %v7842_v10 = vpop.permute.xlu0 %1637 }
 0x1b8   :  { %9244 = vst [vmem:[#allocation111_spill] sm:$0xff] %v7840_v21  ;;  %9245 = vst [vmem:[#allocation112_spill] sm:$0xff] %v7842_v10  ;;  %v2245_v30 = vrot.slane %v2225_v58, 2  ;;  %v478_v58 = vmul.f32 %v7691_v12, %v7874_v26 }
 0x1b9   :  { %2127 = vrot.lane.b32.xlu1 %v2112_v11, %s6597_s17  ;;  %2125 = vrot.lane.b32.xlu0 %v2113_v23, %s6597_s17  ;;  %v2120_v23 = vsel %vm682_vm1, %v2117_v24, %v2119_v52  ;;  %v2174_v11 = vrot.slane %v2157_v44, 2  ;;  %v2159_v24 = vmul.f32 %v7705_v45, %v2154_v43  ;;  %v2173_v44 = vsel %vm682_vm1, %v2171_v53, %v2172_v34 }
 0x1bb   :  { %v7851_v25 = vpop.permute.xlu1 %1643  ;;  %v7853_v20 = vpop.permute.xlu0 %1641  ;;  %v2175_v55 = vsel %vm682_vm1, %v2172_v34, %v2174_v11  ;;  %v2178_v59 = vrot.slane %v2159_v24, 2  ;;  %v2177_v41 = vsel %vm682_vm1, %v2174_v11, %v2176_v31  ;;  %v2220_v24 = vmul.f32 %v7732_v51, %v2218_v16 }
 0x1bc   :  { %9246 = vst [vmem:[#allocation113_spill] sm:$0xff] %v7851_v25  ;;  %9247 = vst [vmem:[#allocation114_spill] sm:$0xff] %v7853_v20 }
 0x1bd   :  { %2131 = vrot.lane.b32.xlu1 %v2118_v36, %s6597_s17  ;;  %2129 = vrot.lane.b32.xlu0 %v2116_v9, %s6597_s17  ;;  %v2160_v36 = vmul.f32 %v7691_v12, %v2154_v43  ;;  %v2161_v9 = vmul.f32 %v7697_v3, %v2154_v43  ;;  %v2236_v20 = vrot.slane %v2220_v24, 2 }
 0x1bf   :  { %v7859_v17 = vpop.permute.xlu1 %1647  ;;  %v7861_v22 = vpop.permute.xlu0 %1645 }
 0x1c0   :  { %9248 = vst [vmem:[#allocation115_spill] sm:$0xff] %v7859_v17  ;;  %9249 = vst [vmem:[#allocation116_spill] sm:$0xff] %v7861_v22 }
 0x1c1   :  { %2135 = vrot.lane.b32.xlu1 %v2119_v52, %s6597_s17  ;;  %2133 = vrot.lane.b32.xlu0 %v2120_v23, %s6597_s17  ;;  %v2179_v52 = vrot.slane %v2160_v36, 2  ;;  %v2181_v23 = vrot.slane %v2161_v9, 2  ;;  %v7892_v36 = vstv %s5416_s18  ;;  %v2183_v9 = vrot.slane %v2162_v57, 2  ;;  %s6599_s18 = smov 52  }
 0x1c2   :  { %v673_v47 = vmul.f32 %v7717_v42, %v7892_v36 }
 0x1c3   :  { %v7870_v17 = vpop.permute.xlu1 %1651  ;;  %v7872_v22 = vpop.permute.xlu0 %1649  ;;  %v2182_v43 = vsel %vm682_vm1, %v2179_v52, %v2181_v23  ;;  %v2180_v11 = vsel %vm682_vm1, %v2178_v59, %v2179_v52  ;;  %v7915_v59 = vmul.f32 %v7660_v54, %v7892_v36  ;;  %v474_v52 = vmul.f32 %v7732_v51, %v7874_v26 }
 0x1c4   :  { %9250 = vst [vmem:[#allocation117_spill] sm:$0xff] %v7870_v17  ;;  %9251 = vst [vmem:[#allocation118_spill] sm:$0xff] %v7872_v22  ;;  %v7886_v22 = vmul.f32 %v7679_v50, %v7874_v26 }
 0x1c5   :  { %2187 = vrot.lane.b32.xlu1 %v2175_v55, %s6597_s17  ;;  %2185 = vrot.lane.b32.xlu0 %v2173_v44, %s6597_s17  ;;  %v7890_v55 = vmul.f32 %v7660_v54, %v7874_v26  ;;  %v2221_v44 = vmul.f32 %v7660_v54, %v2218_v16  ;;  %v686_v15 = vrot.slane %v7915_v59, 2  ;;  %v491_v24 = vrot.slane %v474_v52, 1 }
 0x1c6   :  { %v2223_v59 = vmul.f32 %v7705_v45, %v2218_v16  ;;  %v666_v52 = vmul.f32 %v7666_v35, %v7892_v36 }
 0x1c7   :  { %v7880_v34 = vpop.permute.xlu1 %1689  ;;  %v7882_v53 = vpop.permute.xlu0 %1687  ;;  %v493_v57 = vrot.slane %v7890_v55, 1  ;;  %v2238_v55 = vrot.slane %v2221_v44, 2 }
 0x1c8   :  { %9252 = vst [vmem:[#allocation119_spill] sm:$0xff] %v7880_v34  ;;  %9253 = vst [vmem:[#allocation120_spill] sm:$0xff] %v7882_v53  ;;  %v2219_v53 = vmul.f32 %v7666_v35, %v2218_v16  ;;  %v7901_v34 = vstv %s431_s19  ;;  %v683_v21 = vrot.slane %v666_v52, 2  ;;  %v2247_v52 = vrot.slane %v2226_v27, 2  ;;  %s8636_s19 = sld [smem:[#allocation8 + $0x3]] }
 0x1c9   :  { %2191 = vrot.lane.b32.xlu1 %v2176_v31, %s6597_s17  ;;  %2189 = vrot.lane.b32.xlu0 %v2177_v41, %s6597_s17  ;;  %v495_v31 = vrot.slane %v7886_v22, 1  ;;  %v7910_v41 = vmul.f32 %v7679_v50, %v7892_v36  ;;  %v2222_v22 = vmul.f32 %v7679_v50, %v2218_v16  ;;  %v435_v4 = vmul.f32 %v7660_v54, %v7901_v34 }
 0x1ca   :  { %v2235_v25 = vrot.slane %v2219_v53, 2 }
 0x1cb   :  { %v7903_v17 = vpop.permute.xlu1 %1693  ;;  %v7905_v56 = vpop.permute.xlu0 %1691  ;;  %v2240_v44 = vrot.slane %v2222_v22, 2 }
 0x1cc   :  { %9254 = vst [vmem:[#allocation121_spill] sm:$0xff] %v7903_v17  ;;  %9255 = vst [vmem:[#allocation122_spill] sm:$0xff] %v7905_v56  ;;  %v473_v17 = vmul.f32 %v7666_v35, %v7874_v26  ;;  %v2184_v56 = vsel %vm682_vm1, %v2181_v23, %v2183_v9  ;;  %v667_v23 = vmul.f32 %v7732_v51, %v7892_v36 }
 0x1cd   :  { %2195 = vrot.lane.b32.xlu1 %v2182_v43, %s6597_s17  ;;  %2193 = vrot.lane.b32.xlu0 %v2180_v11, %s6597_s17  ;;  %v496_v11 = vsel %vm489_vm0, %v493_v57, %v495_v31  ;;  %v2237_v43 = vsel %vm682_vm1, %v2235_v25, %v2236_v20  ;;  %v433_v25 = vmul.f32 %v7666_v35, %v7901_v34 }
 0x1ce   :  { %v490_v53 = vrot.slane %v473_v17, 1  ;;  %v514_v39 = vadd.f32 %v496_v11, %v435_v4  ;;  %v684_v4 = vrot.slane %v667_v23, 2  ;;  %v434_v23 = vmul.f32 %v7732_v51, %v7901_v34 }
 0x1cf   :  { %v7929_v2 = vpop.permute.xlu1 %1697  ;;  %v7931_v40 = vpop.permute.xlu0 %1695 }
 0x1d0   :  { %9256 = vst [vmem:[#allocation123_spill] sm:$0xff] %v7929_v2  ;;  %9257 = vst [vmem:[#allocation124_spill] sm:$0xff] %v7931_v40  ;;  %v2224_v2 = vmul.f32 %v7691_v12, %v2218_v16  ;;  %v2239_v40 = vsel %vm682_vm1, %v2236_v20, %v2238_v55  ;;  %v436_v20 = vmul.f32 %v7679_v50, %v7901_v34 }
 0x1d1   :  { %2199 = vrot.lane.b32.xlu1 %v2183_v9, %s6597_s17  ;;  %2197 = vrot.lane.b32.xlu0 %v2184_v56, %s6597_s17  ;;  %v9260_v56 = vrot.slane %v7910_v41, 2  ;;  %v492_v11 = vsel %vm489_vm0, %v490_v53, %v491_v24  ;;  %v494_v53 = vsel %vm489_vm0, %v491_v24, %v493_v57  ;;  %v7981_v16 = vmul.f32 %v7697_v3, %v7874_v26 }
 0x1d2   :  { %v7993_v57 = vmul.f32 %v7660_v54, %v7966_v19  ;;  %v687_v27 = vsel %vm682_vm1, %v684_v4, %v686_v15 }
 0x1d3   :  { %v7947_v17 = vpop.permute.xlu1 %1701  ;;  %v7949_v9 = vpop.permute.xlu0 %1699  ;;  %v689_v22 = vsel %vm682_vm1, %v686_v15, %v9260_v56  ;;  %v2242_v56 = vrot.slane %v2223_v59, 2 }
 0x1d4   :  { %9258 = vst [vmem:[#allocation125_spill] sm:$0xff] %v7947_v17  ;;  %9259 = vst [vmem:[#allocation126_spill] sm:$0xff] %v7949_v9  ;;  %v2241_v9 = vsel %vm682_vm1, %v2238_v55, %v2240_v44  ;;  %v2243_v17 = vrot.slane %v2224_v2, 2  ;;  %v7968_v10 = vadd.f32 %v689_v22, %v514_v39  ;;  %v512_v55 = vadd.f32 %v492_v11, %v433_v25 }
 0x1d5   :  { %2251 = vrot.lane.b32.xlu1 %v2239_v40, %s6597_s17  ;;  %2249 = vrot.lane.b32.xlu0 %v2237_v43, %s6597_s17  ;;  %v515_v2 = vadd.f32 %v495_v31, %v436_v20  ;;  %v477_v39 = vmul.f32 %v7705_v45, %v7874_v26  ;;  %v2028_v31 = vmul.f32 %v7732_v51, %v7966_v19 }
 0x1d6   :  { %v2246_v24 = vsel %vm682_vm1, %v2243_v17, %v2245_v30  ;;  %v2244_v59 = vsel %vm682_vm1, %v2242_v56, %v2243_v17  ;;  %v2027_v22 = vmul.f32 %v7666_v35, %v7966_v19  ;;  %v513_v25 = vadd.f32 %v494_v53, %v434_v23 }
 0x1d7   :  { %v7973_v40 = vpop.permute.xlu1 %1739  ;;  %v7975_v43 = vpop.permute.xlu0 %1737  ;;  %v8006_v20 = vmul.f32 %v7697_v3, %v7892_v36  ;;  %v498_v17 = vrot.slane %v478_v58, 1  ;;  %v2044_v23 = vrot.slane %v2028_v31, 2  ;;  %v2046_v53 = vrot.slane %v7993_v57, 2 }
 0x1d8   :  { %9261 = vst [vmem:[#allocation127_spill] sm:$0xff] %v7973_v40  ;;  %9262 = vst [vmem:[#allocation128_spill] sm:$0xff] %v7975_v43  ;;  %v8015_v40 = vstv %s7958_s21  ;;  %v2248_v56 = vsel %vm682_vm1, %v2245_v30, %v2247_v52  ;;  %v438_v31 = vmul.f32 %v7691_v12, %v7901_v34  ;;  %v437_v30 = vmul.f32 %v7705_v45, %v7901_v34  ;;  %s8699_s21 = sld [smem:[#allocation8]] }
 0x1d9   :  { %2255 = vrot.lane.b32.xlu1 %v2240_v44, %s6597_s17  ;;  %2253 = vrot.lane.b32.xlu0 %v2241_v9, %s6597_s17  ;;  %v685_v44 = vsel %vm682_vm1, %v683_v21, %v684_v4  ;;  %v8002_v9 = vmul.f32 %v7691_v12, %v7892_v36  ;;  %v497_v21 = vrot.slane %v477_v39, 1  ;;  %v9265_v4 = vrot.slane %v7910_v41, 2 }
 0x1da   :  { %v8024_v15 = vadd.f32 %v685_v44, %v512_v55  ;;  %v2043_v39 = vrot.slane %v2027_v22, 2  ;;  %v9268_v41 = vrot.slane %v7981_v16, 1  ;;  %v670_v22 = vmul.f32 %v7705_v45, %v7892_v36 }
 0x1db   :  { %v8008_v11 = vpop.permute.xlu1 %1743  ;;  %v8010_v43 = vpop.permute.xlu0 %1741  ;;  %v8028_v58 = vadd.f32 %v9265_v4, %v515_v2  ;;  %v8049_v44 = vstv %s7983_s3  ;;  %v2032_v57 = vmul.f32 %v7691_v12, %v7966_v19  ;;  %v2034_v36 = vmul.f32 %v7717_v42, %v7966_v19 }
 0x1dc   :  { %9263 = vst [vmem:[#allocation129_spill] sm:$0xff] %v8008_v11  ;;  %9264 = vst [vmem:[#allocation130_spill] sm:$0xff] %v8010_v43  ;;  %v2030_v43 = vmul.f32 %v7679_v50, %v7966_v19  ;;  %v8031_v11 = vadd.f32 %v687_v27, %v513_v25  ;;  %v501_v2 = vsel %vm489_vm0, %v498_v17, %v9268_v41  ;;  %v690_v8 = vrot.slane %v670_v22, 2 }
 0x1dd   :  { %2259 = vrot.lane.b32.xlu1 %v2246_v24, %s6597_s17  ;;  %2257 = vrot.lane.b32.xlu0 %v2244_v59, %s6597_s17  ;;  %v691_v24 = vrot.slane %v8002_v9, 2  ;;  %v499_v25 = vsel %vm489_vm0, %v497_v21, %v498_v17  ;;  %v480_v9 = vmul.f32 %v7717_v42, %v7874_v26  ;;  %v2047_v27 = vsel %vm682_vm1, %v2044_v23, %v2046_v53 }
 0x1de   :  { %v2048_v4 = vrot.slane %v2030_v43, 2  ;;  %v2045_v41 = vsel %vm682_vm1, %v2043_v39, %v2044_v23  ;;  %v2031_v26 = vmul.f32 %v7705_v45, %v7966_v19  ;;  %v8073_v43 = vmul.f32 %v7660_v54, %v8049_v44 }
 0x1df   :  { %v8037_v59 = vpop.permute.xlu1 %1747  ;;  %v8039_v55 = vpop.permute.xlu0 %1745  ;;  %v523_v21 = vmul.f32 %v7732_v51, %v8049_v44  ;;  %v516_v18 = vadd.f32 %v499_v25, %v437_v30  ;;  %v502_v5 = vrot.slane %v480_v9, 1  ;;  %v2051_v63 = vrot.slane %v2032_v57, 2 }
 0x1e0   :  { %9266 = vst [vmem:[#allocation131_spill] sm:$0xff] %v8037_v59  ;;  %9267 = vst [vmem:[#allocation132_spill] sm:$0xff] %v8039_v55  ;;  %v8062_v55 = vmul.f32 %v7697_v3, %v7966_v19  ;;  %v517_v59 = vadd.f32 %v501_v2, %v438_v31  ;;  %v2050_v2 = vrot.slane %v2031_v26, 2  ;;  %v8097_v30 = vmul.f32 %v7660_v54, %v8084_v46 }
 0x1e1   :  { %2263 = vrot.lane.b32.xlu1 %v2247_v52, %s6597_s17  ;;  %2261 = vrot.lane.b32.xlu0 %v2248_v56, %s6597_s17  ;;  %v9269_v52 = vrot.slane %v8006_v20, 2  ;;  %v440_v56 = vmul.f32 %v7717_v42, %v7901_v34  ;;  %v539_v22 = vrot.slane %v523_v21, 1  ;;  %v716_v25 = vmul.f32 %v7732_v51, %v8084_v46 }
 0x1e2   :  { %v2053_v31 = vrot.slane %v8062_v55, 2  ;;  %v439_v55 = vmul.f32 %v7697_v3, %v7901_v34  ;;  %v695_v26 = vrot.slane %v673_v47, 2  ;;  %v9274_v21 = vrot.slane %v7981_v16, 1 }
 0x1e3   :  { %v694_v17 = vsel %vm682_vm1, %v691_v24, %v9269_v52  ;;  %v8077_v23 = vpop.permute.xlu1 %1751  ;;  %v8079_v39 = vpop.permute.xlu0 %1749  ;;  %v522_v52 = vmul.f32 %v7666_v35, %v8049_v44  ;;  %v443_v34 = vmul.f32 %v7666_v35, %v8015_v40  ;;  %v734_v47 = vrot.slane %v8097_v30, 2 }
 0x1e4   :  { %9270 = vst [vmem:[#allocation133_spill] sm:$0xff] %v8077_v23  ;;  %9271 = vst [vmem:[#allocation134_spill] sm:$0xff] %v8079_v39  ;;  %v2049_v23 = vsel %vm682_vm1, %v2046_v53, %v2048_v4  ;;  %v8105_v57 = vadd.f32 %v694_v17, %v517_v59  ;;  %v503_v39 = vsel %vm489_vm0, %v9274_v21, %v502_v5  ;;  %v9275_v16 = vrot.slane %v8073_v43, 1 }
 0x1e5   :  { %2059 = vrot.lane.b32.xlu1 %v2047_v27, %s6597_s17  ;;  %2057 = vrot.lane.b32.xlu0 %v2045_v41, %s6597_s17  ;;  %v538_v19 = vrot.slane %v522_v52, 1  ;;  %v715_v27 = vmul.f32 %v7666_v35, %v8084_v46  ;;  %v692_v41 = vsel %vm682_vm1, %v690_v8, %v691_v24  ;;  %v2054_v59 = vsel %vm682_vm1, %v2051_v63, %v2053_v31 }
 0x1e6   :  { %v2052_v17 = vsel %vm682_vm1, %v2050_v2, %v2051_v63  ;;  %v2055_v8 = vrot.slane %v2034_v36, 2  ;;  %v542_v24 = vsel %vm489_vm0, %v539_v22, %v9275_v16  ;;  %v732_v52 = vrot.slane %v716_v25, 2 }
 0x1e7   :  { %v8101_v9 = vpop.permute.xlu1 %1803  ;;  %v8103_v53 = vpop.permute.xlu0 %1801  ;;  %v519_v63 = vadd.f32 %v502_v5, %v440_v56  ;;  %v540_v2 = vsel %vm489_vm0, %v538_v19, %v539_v22  ;;  %v731_v36 = vrot.slane %v715_v27, 2  ;;  %v9278_v30 = vrot.slane %v8006_v20, 2 }
 0x1e8   :  { %9272 = vst [vmem:[#allocation135_spill] sm:$0xff] %v8101_v9  ;;  %9273 = vst [vmem:[#allocation136_spill] sm:$0xff] %v8103_v53  ;;  %v444_v9 = vmul.f32 %v7732_v51, %v8015_v40  ;;  %v8135_v53 = vadd.f32 %v692_v41, %v516_v18  ;;  %v527_v25 = vmul.f32 %v7691_v12, %v8049_v44 }
 0x1e9   :  { %2063 = vrot.lane.b32.xlu1 %v2048_v4, %s6597_s17  ;;  %2061 = vrot.lane.b32.xlu0 %v2049_v23, %s6597_s17  ;;  %v525_v4 = vmul.f32 %v7679_v50, %v8049_v44  ;;  %v696_v16 = vsel %vm682_vm1, %v9278_v30, %v695_v26  ;;  %v528_v0 = vmul.f32 %v7697_v3, %v8049_v44 }
 0x1ea   :  { %v518_v18 = vadd.f32 %v503_v39, %v439_v55  ;;  %v561_v41 = vadd.f32 %v542_v24, %v444_v9  ;;  %v718_v5 = vmul.f32 %v7679_v50, %v8084_v46  ;;  %v2056_v56 = vsel %vm682_vm1, %v2053_v31, %v2055_v8 }
 0x1eb   :  { %v8131_v23 = vpop.permute.xlu1 %1807  ;;  %v8133_v21 = vpop.permute.xlu0 %1805  ;;  %v735_v20 = vsel %vm682_vm1, %v732_v52, %v734_v47  ;;  %v560_v22 = vadd.f32 %v540_v2, %v443_v34  ;;  %v446_v19 = vmul.f32 %v7679_v50, %v8015_v40  ;;  %v543_v27 = vrot.slane %v525_v4, 1 }
 0x1ec   :  { %9276 = vst [vmem:[#allocation137_spill] sm:$0xff] %v8131_v23  ;;  %9277 = vst [vmem:[#allocation138_spill] sm:$0xff] %v8133_v21  ;;  %v8159_v39 = vadd.f32 %v695_v26, %v519_v63  ;;  %v733_v9 = vsel %vm682_vm1, %v731_v36, %v732_v52  ;;  %v720_v31 = vmul.f32 %v7691_v12, %v8084_v46  ;;  %v546_v34 = vrot.slane %v527_v25, 1 }
 0x1ed   :  { %2067 = vrot.lane.b32.xlu1 %v2054_v59, %s6597_s17  ;;  %2065 = vrot.lane.b32.xlu0 %v2052_v17, %s6597_s17  ;;  %v526_v55 = vmul.f32 %v7705_v45, %v8049_v44  ;;  %v548_v17 = vrot.slane %v528_v0, 1  ;;  %v721_v24 = vmul.f32 %v7697_v3, %v8084_v46  ;;  %v529_v4 = vmul.f32 %v7717_v42, %v8049_v44 }
 0x1ee   :  { %9281 = vst [vmem:[#allocation141_spill] sm:$0xff] %v8159_v39  ;;  %v8174_v26 = vadd.f32 %v696_v16, %v518_v18  ;;  %v8176_v52 = vadd.f32 %v735_v20, %v561_v41  ;;  %v736_v63 = vrot.slane %v718_v5, 2  ;;  %v445_v0 = vmul.f32 %v7660_v54, %v8015_v40 }
 0x1ef   :  { %v8155_v30 = vpop.permute.xlu1 %1811  ;;  %v8157_v59 = vpop.permute.xlu0 %1809  ;;  %v8180_v2 = vadd.f32 %v733_v9, %v560_v22  ;;  %v563_v36 = vadd.f32 %v543_v27, %v446_v19  ;;  %v9283_v25 = vrot.slane %v8073_v43, 1  ;;  %v448_v16 = vmul.f32 %v7691_v12, %v8015_v40 }
 0x1f0   :  { %9279 = vst [vmem:[#allocation139_spill] sm:$0xff] %v8155_v30  ;;  %9280 = vst [vmem:[#allocation140_spill] sm:$0xff] %v8157_v59  ;;  %v8186_v59 = vstv %s8129_s23  ;;  %v739_v18 = vrot.slane %v720_v31, 2  ;;  %v545_v41 = vrot.slane %v526_v55, 1  ;;  %v719_v5 = vmul.f32 %v7705_v45, %v8084_v46 }
 0x1f1   :  { %2071 = vrot.lane.b32.xlu1 %v2055_v8, %s6597_s17  ;;  %2069 = vrot.lane.b32.xlu0 %v2056_v56, %s6597_s17  ;;  %9282 = vst [vmem:[#allocation142_spill] sm:$0xff] %v8174_v26  ;;  %v544_v44 = vsel %vm489_vm0, %v9283_v25, %v543_v27  ;;  %v549_v20 = vsel %vm489_vm0, %v546_v34, %v548_v17  ;;  %v741_v43 = vrot.slane %v721_v24, 2  ;;  %v550_v22 = vrot.slane %v529_v4, 1  ;;  %s8260_s17 = sld [smem:[#allocation5 + $0x1e]] }
 0x1f2   :  { %v722_v19 = vmul.f32 %v7717_v42, %v8084_v46  ;;  %v562_v27 = vadd.f32 %v544_v44, %v445_v0  ;;  %v737_v9 = vsel %vm682_vm1, %v734_v47, %v736_v63  ;;  %v8202_v25 = vmul.f32 %v7660_v54, %v8186_v59 }
 0x1f3   :  { %v8188_v8 = vpop.permute.xlu1 %1815  ;;  %v8190_v56 = vpop.permute.xlu0 %1813  ;;  %v571_v31 = vmul.f32 %v7732_v51, %v8186_v59  ;;  %v8206_v55 = vadd.f32 %v736_v63, %v563_v36  ;;  %v447_v24 = vmul.f32 %v7705_v45, %v8015_v40  ;;  %v450_v4 = vmul.f32 %v7717_v42, %v8015_v40 }
 0x1f4   :  { %9284 = vst [vmem:[#allocation143_spill] sm:$0xff] %v8188_v8  ;;  %9285 = vst [vmem:[#allocation144_spill] sm:$0xff] %v8190_v56  ;;  %v8213_v46 = vstv %s8153_s24  ;;  %v565_v44 = vadd.f32 %v549_v20, %v448_v16  ;;  %v547_v56 = vsel %vm489_vm0, %v545_v41, %v546_v34  ;;  %v738_v8 = vrot.slane %v719_v5, 2 }
 0x1f5   :  { %9286 = vst [vmem:[#allocation145_spill] sm:$0xff] %v8206_v55  ;;  %v449_v63 = vmul.f32 %v7697_v3, %v8015_v40  ;;  %v742_v36 = vsel %vm682_vm1, %v739_v18, %v741_v43  ;;  %v743_v30 = vrot.slane %v722_v19, 2  ;;  %v551_v21 = vsel %vm489_vm0, %v548_v17, %v550_v22 }
 0x1f6   :  { %v8225_v23 = vstv %s8170_s25  ;;  %v589_v26 = vrot.slane %v8202_v25, 1  ;;  %v8230_v39 = vmul.f32 %v7660_v54, %v8213_v46  ;;  %v587_v16 = vrot.slane %v571_v31, 1 }
 0x1f7   :  { %v8215_v0 = vpop.permute.xlu1 %1867  ;;  %v8217_v47 = vpop.permute.xlu0 %1865  ;;  %v764_v34 = vmul.f32 %v7732_v51, %v8213_v46  ;;  %v8234_v41 = vadd.f32 %v737_v9, %v562_v27  ;;  %v564_v40 = vadd.f32 %v547_v56, %v447_v24  ;;  %v570_v5 = vmul.f32 %v7666_v35, %v8186_v59 }
 0x1f8   :  { %9287 = vst [vmem:[#allocation146_spill] sm:$0xff] %v8215_v0  ;;  %9288 = vst [vmem:[#allocation147_spill] sm:$0xff] %v8217_v47  ;;  %v573_v17 = vmul.f32 %v7679_v50, %v8186_v59  ;;  %v8244_v25 = vadd.f32 %v742_v36, %v565_v44  ;;  %v740_v31 = vsel %vm682_vm1, %v738_v8, %v739_v18 }
 0x1f9   :  { %9289 = vst [vmem:[#allocation148_spill] sm:$0xff] %v8234_v41  ;;  %v567_v47 = vadd.f32 %v550_v22, %v450_v4  ;;  %v566_v0 = vadd.f32 %v551_v21, %v449_v63  ;;  %v744_v27 = vsel %vm682_vm1, %v741_v43, %v743_v30  ;;  %v454_v56 = vmul.f32 %v7732_v51, %v8225_v23 }
 0x1fa   :  { %9292 = vst [vmem:[#allocation151_spill] sm:$0xff] %v8244_v25  ;;  %v575_v9 = vmul.f32 %v7691_v12, %v8186_v59  ;;  %v8254_v24 = vmul.f32 %v7697_v3, %v8186_v59  ;;  %v590_v44 = vsel %vm489_vm0, %v587_v16, %v589_v26  ;;  %v780_v36 = vrot.slane %v764_v34, 2 }
 0x1fb   :  { %v8240_v20 = vpop.permute.xlu1 %1871  ;;  %v8242_v19 = vpop.permute.xlu0 %1869  ;;  %v763_v21 = vmul.f32 %v7666_v35, %v8213_v46  ;;  %v8262_v8 = vadd.f32 %v740_v31, %v564_v40  ;;  %v586_v18 = vrot.slane %v570_v5, 1  ;;  %v591_v43 = vrot.slane %v573_v17, 1 }
 0x1fc   :  { %9290 = vst [vmem:[#allocation149_spill] sm:$0xff] %v8240_v20  ;;  %9291 = vst [vmem:[#allocation150_spill] sm:$0xff] %v8242_v19  ;;  %v782_v19 = vrot.slane %v8230_v39, 2  ;;  %v766_v22 = vmul.f32 %v7679_v50, %v8213_v46  ;;  %v8272_v63 = vadd.f32 %v743_v30, %v567_v47  ;;  %v8274_v34 = vadd.f32 %v744_v27, %v566_v0 }
 0x1fd   :  { %9293 = vst [vmem:[#allocation152_spill] sm:$0xff] %v8262_v8  ;;  %v768_v20 = vmul.f32 %v7691_v12, %v8213_v46  ;;  %v8280_v40 = vmul.f32 %v7697_v3, %v8213_v46  ;;  %v609_v5 = vadd.f32 %v590_v44, %v454_v56  ;;  %v594_v17 = vrot.slane %v575_v9, 1 }
 0x1fe   :  { %9296 = vst [vmem:[#allocation155_spill] sm:$0xff] %v8272_v63  ;;  %9297 = vst [vmem:[#allocation156_spill] sm:$0xff] %v8274_v34  ;;  %v596_v31 = vrot.slane %v8254_v24, 1  ;;  %v453_v30 = vmul.f32 %v7666_v35, %v8225_v23  ;;  %v779_v0 = vrot.slane %v763_v21, 2  ;;  %v456_v47 = vmul.f32 %v7679_v50, %v8225_v23 }
 0x1ff   :  { %v8268_v4 = vpop.permute.xlu1 %1875  ;;  %v8270_v39 = vpop.permute.xlu0 %1873  ;;  %v588_v27 = vsel %vm489_vm0, %v586_v18, %v587_v16  ;;  %v784_v34 = vrot.slane %v766_v22, 2  ;;  %v455_v56 = vmul.f32 %v7660_v54, %v8225_v23  ;;  %v592_v9 = vsel %vm489_vm0, %v589_v26, %v591_v43 }
 0x200   :  { %9294 = vst [vmem:[#allocation153_spill] sm:$0xff] %v8268_v4  ;;  %9295 = vst [vmem:[#allocation154_spill] sm:$0xff] %v8270_v39  ;;  %v574_v4 = vmul.f32 %v7705_v45, %v8186_v59  ;;  %v783_v39 = vsel %vm682_vm1, %v780_v36, %v782_v19  ;;  %v458_v35 = vmul.f32 %v7691_v12, %v8225_v23  ;;  %v787_v21 = vrot.slane %v768_v20, 2 }
 0x201   :  { %v789_v50 = vrot.slane %v8280_v40, 2  ;;  %v577_v16 = vmul.f32 %v7717_v42, %v8186_v59  ;;  %v8303_v18 = vadd.f32 %v783_v39, %v609_v5  ;;  %v597_v22 = vsel %vm489_vm0, %v594_v17, %v596_v31 }
 0x202   :  { %v593_v1 = vrot.slane %v574_v4, 1  ;;  %v767_v26 = vmul.f32 %v7705_v45, %v8213_v46  ;;  %v781_v12 = vsel %vm682_vm1, %v779_v0, %v780_v36  ;;  %v617_v20 = vstv %s8260_s17 }
 0x203   :  { %v8294_v24 = vpop.permute.xlu1 %1879  ;;  %v8296_v44 = vpop.permute.xlu0 %1877  ;;  %9300 = vst [vmem:[#allocation159_spill] sm:$0xff] %v8303_v18  ;;  %v610_v60 = vadd.f32 %v592_v9, %v455_v56  ;;  %v785_v40 = vsel %vm682_vm1, %v782_v19, %v784_v34  ;;  %v457_v59 = vmul.f32 %v7705_v45, %v8225_v23  ;;  %v8316_v39 = vstv %s8266_s26 }
 0x204   :  { %9298 = vst [vmem:[#allocation157_spill] sm:$0xff] %v8294_v24  ;;  %9299 = vst [vmem:[#allocation158_spill] sm:$0xff] %v8296_v44  ;;  %v608_v44 = vadd.f32 %v588_v27, %v453_v30  ;;  %v611_v24 = vadd.f32 %v591_v43, %v456_v47  ;;  %v613_v18 = vadd.f32 %v597_v22, %v458_v35  ;;  %v598_v30 = vrot.slane %v577_v16, 1  ;;  %v6351_v27 = vld [vmem:[%s9142_s0 + $0x10] sm:$0xff] }
 0x205   :  { %v790_v63 = vsel %vm682_vm1, %v787_v21, %v789_v50  ;;  %v8325_v36 = vmul.f32 %v7717_v42, %v8213_v46  ;;  %v595_v43 = vsel %vm489_vm0, %v593_v1, %v594_v17  ;;  %v786_v19 = vrot.slane %v767_v26, 2  ;;  %v6352_v1 = vld [vmem:[%s9142_s0] sm:$0xff] }
 0x206   :  { %v8329_v0 = vmul.f32 %v7660_v54, %v617_v20  ;;  %v619_v45 = vmul.f32 %v7732_v51, %v617_v20  ;;  %v8332_v47 = vadd.f32 %v781_v12, %v608_v44  ;;  %v8338_v56 = vmul.f32 %v6351_v27, %v8316_v39 }
 0x207   :  { %v8318_v5 = vpop.permute.xlu1 %1931  ;;  %v8320_v4 = vpop.permute.xlu0 %1929  ;;  %v8342_v46 = vmul.f32 %v7732_v51, %v8316_v39  ;;  %v618_v54 = vmul.f32 %v6352_v1, %v617_v20  ;;  %v8347_v17 = vadd.f32 %v784_v34, %v611_v24  ;;  %v8349_v9 = vadd.f32 %v785_v40, %v610_v60 }
 0x208   :  { %9301 = vst [vmem:[#allocation160_spill] sm:$0xff] %v8318_v5  ;;  %9302 = vst [vmem:[#allocation161_spill] sm:$0xff] %v8320_v4  ;;  %v460_v44 = vmul.f32 %v7717_v42, %v8225_v23  ;;  %v459_v35 = vmul.f32 %v7697_v3, %v8225_v23  ;;  %v8359_v26 = vadd.f32 %v790_v63, %v613_v18  ;;  %v9148_v4 = vrot.slane %v8325_v36, 2  ;;  %v6353_v63 = vld [vmem:[%s9142_s0 + $0x18] sm:$0xf] }
 0x209   :  { %9303 = vst [vmem:[#allocation162_spill] sm:$0xff] %v8332_v47  ;;  %9304 = vst [vmem:[#allocation163_spill] sm:$0xff] %v8347_v17  ;;  %v8361_v12 = vadd.f32 %v595_v43, %v457_v59  ;;  %v599_v34 = vsel %vm489_vm0, %v596_v31, %v598_v30  ;;  %v8366_v60 = vsel %vm682_vm1, %v786_v19, %v787_v21  ;;  %v462_v24 = vstv %s8308_s1  ;;  %v6354_v31 = vld [vmem:[%s9142_s0 + $0x28] sm:$0xff]  ;;  %v6355_v19 = vld [vmem:[%s9142_s0 + $0x30] sm:$0xff] }
 0x20a   :  { %9305 = vst [vmem:[#allocation164_spill] sm:$0xff] %v8349_v9  ;;  %9308 = vst [vmem:[#allocation167_spill] sm:$0xff] %v8359_v26  ;;  %v637_v42 = vrot.slane %v8329_v0, 1  ;;  %v635_v40 = vrot.slane %v619_v45, 1  ;;  %v830_v3 = vrot.slane %v8338_v56, 2  ;;  %v828_v23 = vrot.slane %v8342_v46, 2 }
 0x20b   :  { %v8355_v16 = vpop.permute.xlu1 %1935  ;;  %v8357_v22 = vpop.permute.xlu0 %1933  ;;  %v621_v18 = vmul.f32 %v6353_v63, %v617_v20  ;;  %v615_v59 = vadd.f32 %v598_v30, %v460_v44  ;;  %v614_v43 = vadd.f32 %v599_v34, %v459_v35  ;;  %v623_v21 = vmul.f32 %v6354_v31, %v617_v20  ;;  %v6356_v44 = vld [vmem:[%s9142_s0 + $0x20] sm:$0xff] }
 0x20c   :  { %9306 = vst [vmem:[#allocation165_spill] sm:$0xff] %v8355_v16  ;;  %9307 = vst [vmem:[#allocation166_spill] sm:$0xff] %v8357_v22  ;;  %v634_v22 = vrot.slane %v618_v54, 1  ;;  %v624_v0 = vmul.f32 %v6355_v19, %v617_v20  ;;  %v792_v46 = vsel %vm682_vm1, %v789_v50, %v9148_v4  ;;  %v464_v30 = vmul.f32 %v7732_v51, %v462_v24 }
 0x20d   :  { %v811_v54 = vmul.f32 %v6352_v1, %v8316_v39  ;;  %v622_v35 = vmul.f32 %v6356_v44, %v617_v20  ;;  %v638_v34 = vsel %vm489_vm0, %v635_v40, %v637_v42  ;;  %v463_v16 = vmul.f32 %v6352_v1, %v462_v24 }
 0x20e   :  { %v466_v5 = vmul.f32 %v6353_v63, %v462_v24  ;;  %v831_v50 = vsel %vm682_vm1, %v828_v23, %v830_v3  ;;  %v636_v51 = vsel %vm489_vm0, %v634_v22, %v635_v40  ;;  %v639_v4 = vrot.slane %v621_v18, 1 }
 0x20f   :  { %v8381_v45 = vpop.permute.xlu1 %1939  ;;  %v8383_v56 = vpop.permute.xlu0 %1937  ;;  %v814_v26 = vmul.f32 %v6353_v63, %v8316_v39  ;;  %v642_v9 = vrot.slane %v623_v21, 1  ;;  %v644_v17 = vrot.slane %v624_v0, 1  ;;  %v816_v47 = vmul.f32 %v6354_v31, %v8316_v39 }
 0x210   :  { %9309 = vst [vmem:[#allocation168_spill] sm:$0xff] %v8381_v45  ;;  %9310 = vst [vmem:[#allocation169_spill] sm:$0xff] %v8383_v56  ;;  %v6357_v56 = vld [vmem:[%s9142_s0 + $0x38] sm:$0xf]  ;;  %v817_v49 = vmul.f32 %v6355_v19, %v8316_v39  ;;  %v657_v48 = vadd.f32 %v638_v34, %v464_v30  ;;  %v827_v25 = vrot.slane %v811_v54, 2  ;;  %v815_v38 = vmul.f32 %v6356_v44, %v8316_v39  ;;  %s8463_s0 = sld [smem:[#allocation8 + $0x1]] }
 0x211   :  { %v625_v45 = vmul.f32 %v6357_v56, %v617_v20  ;;  %v641_v20 = vrot.slane %v622_v35, 1  ;;  %v656_v41 = vadd.f32 %v636_v51, %v463_v16  ;;  %v465_v22 = vmul.f32 %v6351_v27, %v462_v24 }
 0x212   :  { %v818_v63 = vmul.f32 %v6357_v56, %v8316_v39  ;;  %v832_v18 = vrot.slane %v814_v26, 2  ;;  %v640_v21 = vsel %vm489_vm0, %v637_v42, %v639_v4  ;;  %v468_v0 = vmul.f32 %v6354_v31, %v462_v24 }
 0x213   :  { %v8402_v1 = vpop.permute.xlu1 %1943  ;;  %v8404_v8 = vpop.permute.xlu0 %1941  ;;  %v646_v40 = vrot.slane %v625_v45, 1  ;;  %v467_v37 = vmul.f32 %v6356_v44, %v462_v24  ;;  %v645_v55 = vsel %vm489_vm0, %v642_v9, %v644_v17  ;;  %v837_v14 = vrot.slane %v817_v49, 2 }
 0x214   :  { %9311 = vst [vmem:[#allocation170_spill] sm:$0xff] %v8402_v1  ;;  %9312 = vst [vmem:[#allocation171_spill] sm:$0xff] %v8404_v8  ;;  %v835_v1 = vrot.slane %v816_v47, 2  ;;  %v470_v8 = vmul.f32 %v6357_v56, %v462_v24  ;;  %v829_v16 = vsel %vm682_vm1, %v827_v25, %v828_v23  ;;  %v643_v27 = vsel %vm489_vm0, %v641_v20, %v642_v9  ;;  %v9320_v20 = vld [vmem:[#allocation21_spill] sm:$0xff] }
 0x215   :  { %v834_v45 = vrot.slane %v815_v38, 2  ;;  %v469_v39 = vmul.f32 %v6355_v19, %v462_v24  ;;  %v659_v26 = vadd.f32 %v639_v4, %v466_v5  ;;  %v658_v35 = vadd.f32 %v640_v21, %v465_v22  ;;  %v9317_v19 = vld [vmem:[#allocation148_spill] sm:$0xff]  ;;  %v9322_v22 = vld [vmem:[#allocation22_spill] sm:$0xff] }
 0x216   :  { %v839_v42 = vrot.slane %v818_v63, 2  ;;  %v647_v31 = vsel %vm489_vm0, %v644_v17, %v646_v40  ;;  %v805_v47 = vadd.f32 %v8366_v60, %v8361_v12  ;;  %v9313_v49 = vrot.slane %v8325_v36, 2  ;;  %v9323_v63 = vld [vmem:[#allocation155_spill] sm:$0xff] }
 0x217   :  { %v8410_v30 = vpop.permute.xlu1 %1995  ;;  %v8412_v54 = vpop.permute.xlu0 %1993  ;;  %v833_v44 = vsel %vm682_vm1, %v830_v3, %v832_v18  ;;  %v661_v34 = vadd.f32 %v645_v55, %v468_v0  ;;  %v807_v51 = vadd.f32 %v792_v46, %v614_v43  ;;  %v838_v25 = vsel %vm682_vm1, %v835_v1, %v837_v14  ;;  %v9318_v46 = vld [vmem:[#allocation20_spill] sm:$0xff] }
 0x218   :  { %v808_v56 = vadd.f32 %v9313_v49, %v615_v59  ;;  %v660_v9 = vadd.f32 %v643_v27, %v467_v37  ;;  %v663_v38 = vadd.f32 %v646_v40, %v470_v8  ;;  %v850_v4 = vadd.f32 %v831_v50, %v657_v48  ;;  %v9316_v59 = vld [vmem:[#allocation19_spill] sm:$0xff]  ;;  %v9326_v0 = vld [vmem:[#allocation80_spill] sm:$0xff] }
 0x219   :  { %v849_v17 = vadd.f32 %v829_v16, %v656_v41  ;;  %v836_v23 = vsel %vm682_vm1, %v834_v45, %v835_v1  ;;  %v662_v12 = vadd.f32 %v647_v31, %v469_v39  ;;  %v8430_v36 = vadd.f32 %v7330_v61, %v7968_v10  ;;  %v9319_v1 = vld [vmem:[#allocation151_spill] sm:$0xff]  ;;  %v9327_v16 = vld [vmem:[#allocation156_spill] sm:$0xff]  ;;  %v9332_v31 = vld [vmem:[#allocation26_spill] sm:$0xff] }
 0x21a   :  { %v8432_v60 = vadd.f32 %v832_v18, %v659_v26  ;;  %v8434_v55 = vadd.f32 %v833_v44, %v658_v35  ;;  %v840_v37 = vsel %vm682_vm1, %v837_v14, %v839_v42  ;;  %v8439_v8 = vadd.f32 %v7332_v62, %v8024_v15  ;;  %v9328_v27 = vld [vmem:[#allocation24_spill] sm:$0xff]  ;;  %v9329_v39 = vld [vmem:[#allocation159_spill] sm:$0xff]  ;;  %v9330_v26 = vld [vmem:[#allocation25_spill] sm:$0xff] }
 0x21b   :  { %v8423_v24 = vpop.permute.xlu1 %1999  ;;  %v8425_v5 = vpop.permute.xlu0 %1997  ;;  %v950_v48 = vadd.f32 %v7368_v28, %v8176_v52  ;;  %v949_v41 = vadd.f32 %v7370_v29, %v8180_v2  ;;  %v8445_v3 = vadd.f32 %v838_v25, %v661_v34  ;;  %v8449_v61 = vadd.f32 %v7341_v6, %v8028_v58  ;;  %v9315_v2 = vld [vmem:[#allocation145_spill] sm:$0xff]  ;;  %v9333_v44 = vld [vmem:[#allocation163_spill] sm:$0xff] }
 0x21c   :  { %v8453_v10 = vadd.f32 %v7343_v7, %v8031_v11  ;;  %v8455_v14 = vadd.f32 %v836_v23, %v660_v9  ;;  %v8457_v62 = vadd.f32 %v839_v42, %v663_v38  ;;  %v8467_v29 = vadd.f32 %v7349_v13, %v8105_v57  ;;  %v9314_v11 = vld [vmem:[#allocation16_spill] sm:$0xff]  ;;  %v9331_v42 = vld [vmem:[#allocation162_spill] sm:$0xff]  ;;  %v9334_v34 = vld [vmem:[#allocation27_spill] sm:$0xff] }
 0x21d   :  { %v8469_v6 = vadd.f32 %v840_v37, %v662_v12  ;;  %v1178_v58 = vadd.f32 %v7513_v32, %v950_v48  ;;  %v1177_v7 = vadd.f32 %v7515_v33, %v949_v41  ;;  %v8475_v52 = vadd.f32 %v9314_v11, %v8135_v53  ;;  %v9321_v57 = vld [vmem:[#allocation152_spill] sm:$0xff]  ;;  %v9324_v32 = vld [vmem:[#allocation23_spill] sm:$0xff]  ;;  %v9335_v23 = vld [vmem:[#allocation49_spill] sm:$0xff] }
 0x21e   :  { %v952_v43 = vadd.f32 %v9316_v59, %v9315_v2  ;;  %v951_v50 = vadd.f32 %v9318_v46, %v9317_v19  ;;  %v954_v13 = vadd.f32 %v9320_v20, %v9319_v1  ;;  %v953_v40 = vadd.f32 %v9322_v22, %v9321_v57  ;;  %v9325_v33 = vld [vmem:[#allocation79_spill] sm:$0xff]  ;;  %v9336_v37 = vld [vmem:[#allocation50_spill] sm:$0xff]  ;;  %v9339_v2 = vld [vmem:[#allocation164_spill] sm:$0xff] }
 0x21f   :  { %v8459_v15 = vpop.permute.xlu1 %2003  ;;  %v8461_v28 = vpop.permute.xlu0 %2001  ;;  %v956_v18 = vadd.f32 %v9324_v32, %v9323_v63  ;;  %v1434_v21 = vadd.f32 %v9325_v33, %v1178_v58  ;;  %v1433_v53 = vadd.f32 %v9326_v0, %v1177_v7  ;;  %v955_v45 = vadd.f32 %v9328_v27, %v9327_v16  ;;  %v9337_v41 = vld [vmem:[#allocation111_spill] sm:$0xff]  ;;  %v9338_v7 = vld [vmem:[#allocation112_spill] sm:$0xff]  ;;  %v9342_v1 = vld [vmem:[#allocation29_spill] sm:$0xff] }
 0x220   :  { %v1000_v35 = vadd.f32 %v9330_v26, %v9329_v39  ;;  %v999_v49 = vadd.f32 %v9332_v31, %v9331_v42  ;;  %v8497_v25 = vadd.f32 %v9334_v34, %v9333_v44  ;;  %v1180_v12 = vadd.f32 %v9335_v23, %v952_v43  ;;  %v9340_v59 = vld [vmem:[#allocation28_spill] sm:$0xff]  ;;  %v9341_v46 = vld [vmem:[#allocation167_spill] sm:$0xff]  ;;  %v9343_v57 = vld [vmem:[#allocation30_spill] sm:$0xff] }
 0x221   :  { %v1179_v48 = vadd.f32 %v9336_v37, %v951_v50  ;;  %v1662_v58 = vadd.f32 %v9337_v41, %v1434_v21  ;;  %v1661_v11 = vadd.f32 %v9338_v7, %v1433_v53  ;;  %v8509_v19 = vadd.f32 %v9340_v59, %v9339_v2  ;;  %v9344_v63 = vld [vmem:[#allocation31_spill] sm:$0xff]  ;;  %v9345_v43 = vld [vmem:[#allocation81_spill] sm:$0xff]  ;;  %v9346_v33 = vld [vmem:[#allocation82_spill] sm:$0xff] }
 0x222   :  { %v8513_v20 = vadd.f32 %v9342_v1, %v9341_v46  ;;  %v8516_v22 = vadd.f32 %v9343_v57, %v805_v47  ;;  %v8519_v32 = vadd.f32 %v9344_v63, %v808_v56  ;;  %v1436_v50 = vadd.f32 %v9345_v43, %v1180_v12  ;;  %v9347_v0 = vld [vmem:[#allocation146_spill] sm:$0xff]  ;;  %v9348_v16 = vld [vmem:[#allocation147_spill] sm:$0xff]  ;;  %v9349_v39 = vld [vmem:[#allocation32_spill] sm:$0xff] }
 0x223   :  { %v8499_v9 = vpop.permute.xlu1 %2007  ;;  %v8501_v38 = vpop.permute.xlu0 %2005  ;;  %v1435_v21 = vadd.f32 %v9346_v33, %v1179_v48  ;;  %v1890_v53 = vadd.f32 %v9347_v0, %v1662_v58  ;;  %v1889_v27 = vadd.f32 %v9348_v16, %v1661_v11  ;;  %v8526_v26 = vadd.f32 %v9349_v39, %v807_v51  ;;  %v9350_v42 = vld [vmem:[#allocation51_spill] sm:$0xff]  ;;  %v9351_v44 = vld [vmem:[#allocation52_spill] sm:$0xff]  ;;  %v9352_v37 = vld [vmem:[#allocation113_spill] sm:$0xff] }
 0x224   :  { %v1182_v31 = vadd.f32 %v9350_v42, %v954_v13  ;;  %v1181_v34 = vadd.f32 %v9351_v44, %v953_v40  ;;  %v8531_v47 = vstv %s8463_s0  ;;  %v1664_v41 = vadd.f32 %v9352_v37, %v1436_v50  ;;  %v9353_v12 = vld [vmem:[#allocation114_spill] sm:$0xff]  ;;  %v9354_v58 = vld [vmem:[#allocation33_spill] sm:$0xff]  ;;  %v9356_v46 = vld [vmem:[#allocation83_spill] sm:$0xff] }
 0x225   :  { %v1663_v7 = vadd.f32 %v9353_v12, %v1435_v21  ;;  %v8536_v59 = vadd.f32 %v9354_v58, %v850_v4  ;;  %v9355_v11 = vld [vmem:[#allocation34_spill] sm:$0xff]  ;;  %v9357_v1 = vld [vmem:[#allocation84_spill] sm:$0xff]  ;;  %v9358_v57 = vld [vmem:[#allocation149_spill] sm:$0xff] }
 0x226   :  { %v8539_v51 = vadd.f32 %v9355_v11, %v849_v17  ;;  %v1438_v13 = vadd.f32 %v9356_v46, %v1182_v31  ;;  %v1437_v40 = vadd.f32 %v9357_v1, %v1181_v34  ;;  %v1892_v63 = vadd.f32 %v9358_v57, %v1664_v41  ;;  %v9359_v43 = vld [vmem:[#allocation150_spill] sm:$0xff]  ;;  %v9360_v0 = vld [vmem:[#allocation53_spill] sm:$0xff]  ;;  %v9363_v17 = vld [vmem:[#allocation116_spill] sm:$0xff] }
 0x227   :  { %v2124_v23 = vpop.permute.xlu1 %2123  ;;  %v2122_v56 = vpop.permute.xlu0 %2121  ;;  %v1891_v33 = vadd.f32 %v9359_v43, %v1663_v7  ;;  %v9361_v16 = vld [vmem:[#allocation54_spill] sm:$0xff]  ;;  %v9364_v41 = vld [vmem:[#allocation35_spill] sm:$0xff]  ;;  %v9365_v7 = vld [vmem:[#allocation85_spill] sm:$0xff] }
 0x228   :  { %v2146_v48 = vadd.f32 %v2124_v23, %v1890_v53  ;;  %v2145_v2 = vadd.f32 %v2122_v56, %v1889_v27  ;;  %v1184_v53 = vadd.f32 %v9360_v0, %v956_v18  ;;  %v1183_v4 = vadd.f32 %v9361_v16, %v955_v45  ;;  %v9362_v27 = vld [vmem:[#allocation115_spill] sm:$0xff]  ;;  %v9367_v58 = vld [vmem:[#allocation153_spill] sm:$0xff]  ;;  %v9368_v11 = vld [vmem:[#allocation154_spill] sm:$0xff] }
 0x229   :  { %v1666_v39 = vadd.f32 %v9362_v27, %v1438_v13  ;;  %v1665_v42 = vadd.f32 %v9363_v17, %v1437_v40  ;;  %v8553_v12 = vadd.f32 %v9364_v41, %v8432_v60  ;;  %v9369_v40 = vld [vmem:[#allocation55_spill] sm:$0xff]  ;;  %v9370_v57 = vld [vmem:[#allocation56_spill] sm:$0xff]  ;;  %v9371_v43 = vld [vmem:[#allocation117_spill] sm:$0xff] }
 0x22a   :  { %v2312_v50 = vadd.f32 %v8531_v47, %v2146_v48  ;;  %v2311_v21 = vadd.f32 %v8531_v47, %v2145_v2  ;;  %v1440_v48 = vadd.f32 %v9365_v7, %v1184_v53  ;;  %v9366_v2 = vld [vmem:[#allocation86_spill] sm:$0xff]  ;;  %v1242_v60 = vadd.f32 %v9369_v40, %v1000_v35  ;;  %v9373_v17 = vld [vmem:[#allocation36_spill] sm:$0xff] }
 0x22b   :  { %v2128_v44 = vpop.permute.xlu1 %2127  ;;  %v2126_v31 = vpop.permute.xlu0 %2125  ;;  %v1439_v18 = vadd.f32 %v9366_v2, %v1183_v4  ;;  %v1894_v45 = vadd.f32 %v9367_v58, %v1666_v39  ;;  %v1893_v46 = vadd.f32 %v9368_v11, %v1665_v42  ;;  %v8571_v42 = vadd.f32 %v9373_v17, %v8434_v55  ;;  %v9379_v2 = vld [vmem:[#allocation58_spill] sm:$0xff]  ;;  %v9380_v58 = vld [vmem:[#allocation119_spill] sm:$0xff]  ;;  %v9381_v11 = vld [vmem:[#allocation120_spill] sm:$0xff] }
 0x22c   :  { %v2320_v23 = vmax.f32 %v2312_v50, 0.0  ;;  %v2319_v34 = vmax.f32 %v2311_v21, 0.0  ;;  %v2148_v56 = vadd.f32 %v2128_v44, %v1892_v63  ;;  %v2147_v37 = vadd.f32 %v2126_v31, %v1891_v33  ;;  %v9372_v50 = vld [vmem:[#allocation118_spill] sm:$0xff]  ;;  %v9374_v44 = vld [vmem:[#allocation87_spill] sm:$0xff]  ;;  %v9375_v31 = vld [vmem:[#allocation88_spill] sm:$0xff] }
 0x22d   :  { %v1241_v63 = vadd.f32 %v9370_v57, %v999_v49  ;;  %v1668_v33 = vadd.f32 %v9371_v43, %v1440_v48  ;;  %v1667_v21 = vadd.f32 %v9372_v50, %v1439_v18  ;;  %v1498_v35 = vadd.f32 %v9374_v44, %v1242_v60  ;;  %v9378_v48 = vld [vmem:[#allocation57_spill] sm:$0xff]  ;;  %v9382_v43 = vld [vmem:[#allocation59_spill] sm:$0xff]  ;;  %v9387_v17 = vld [vmem:[#allocation60_spill] sm:$0xff] }
 0x22e   :  { %v2314_v13 = vadd.f32 %v8531_v47, %v2148_v56  ;;  %v2313_v1 = vadd.f32 %v8531_v47, %v2147_v37  ;;  %2337 = vrot.lane.b32.xlu1 %v2320_v23, %s6598_s15  ;;  %2335 = vrot.lane.b32.xlu0 %v2319_v34, %s6598_s15  ;;  %v9376_v23 = vld [vmem:[#allocation157_spill] sm:$0xff]  ;;  %v9377_v56 = vld [vmem:[#allocation158_spill] sm:$0xff]  ;;  %v1244_v55 = vadd.f32 %v9378_v48, %v8497_v25 }
 0x22f   :  { %v2132_v0 = vpop.permute.xlu1 %2131  ;;  %v2130_v53 = vpop.permute.xlu0 %2129  ;;  %v1497_v49 = vadd.f32 %v9375_v31, %v1241_v63  ;;  %v1896_v34 = vadd.f32 %v9376_v23, %v1668_v33  ;;  %v1895_v37 = vadd.f32 %v9377_v56, %v1667_v21  ;;  %v1243_v18 = vadd.f32 %v9379_v2, %v8509_v19  ;;  %v9383_v50 = vld [vmem:[#allocation89_spill] sm:$0xff]  ;;  %v9384_v25 = vld [vmem:[#allocation90_spill] sm:$0xff]  ;;  %v9391_v2 = vld [vmem:[#allocation91_spill] sm:$0xff] }
 0x230   :  { %v2322_v16 = vmax.f32 %v2314_v13, 0.0  ;;  %v2321_v4 = vmax.f32 %v2313_v1, 0.0  ;;  %v2150_v27 = vadd.f32 %v2132_v0, %v1894_v45  ;;  %v2149_v39 = vadd.f32 %v2130_v53, %v1893_v46  ;;  %v9385_v53 = vld [vmem:[#allocation160_spill] sm:$0xff]  ;;  %v9389_v31 = vld [vmem:[#allocation122_spill] sm:$0xff] }
 0x231   :  { %v1712_v45 = vadd.f32 %v9380_v58, %v1498_v35  ;;  %v1711_v46 = vadd.f32 %v9381_v11, %v1497_v49  ;;  %v1246_v33 = vadd.f32 %v9382_v43, %v8513_v20  ;;  %v1500_v21 = vadd.f32 %v9383_v50, %v1244_v55  ;;  %v9388_v20 = vld [vmem:[#allocation121_spill] sm:$0xff]  ;;  %v9392_v58 = vld [vmem:[#allocation92_spill] sm:$0xff]  ;;  %v9397_v43 = vld [vmem:[#allocation123_spill] sm:$0xff] }
 0x232   :  { %v2316_v41 = vadd.f32 %v8531_v47, %v2150_v27  ;;  %v2315_v7 = vadd.f32 %v8531_v47, %v2149_v39  ;;  %2341 = vrot.lane.b32.xlu1 %v2322_v16, %s6598_s15  ;;  %2339 = vrot.lane.b32.xlu0 %v2321_v4, %s6598_s15  ;;  %v1499_v0 = vadd.f32 %v9384_v25, %v1243_v18  ;;  %v9386_v16 = vld [vmem:[#allocation161_spill] sm:$0xff]  ;;  %v8602_v23 = vstv %s8567_s16  ;;  %v9398_v50 = vld [vmem:[#allocation124_spill] sm:$0xff] }
 0x233   :  { %v2136_v13 = vpop.permute.xlu1 %2135  ;;  %v2134_v1 = vpop.permute.xlu0 %2133  ;;  %v1954_v19 = vadd.f32 %v9385_v53, %v1712_v45  ;;  %v1953_v4 = vadd.f32 %v9386_v16, %v1711_v46  ;;  %v1245_v44 = vadd.f32 %v9387_v17, %v8516_v22  ;;  %v1714_v35 = vadd.f32 %v9388_v20, %v1500_v21  ;;  %v9393_v22 = vld [vmem:[#allocation165_spill] sm:$0xff]  ;;  %v9394_v46 = vld [vmem:[#allocation166_spill] sm:$0xff] }
 0x234   :  { %v2324_v40 = vmax.f32 %v2316_v41, 0.0  ;;  %v2323_v60 = vmax.f32 %v2315_v7, 0.0  ;;  %v2152_v57 = vadd.f32 %v2136_v13, %v1896_v34  ;;  %v2151_v63 = vadd.f32 %v2134_v1, %v1895_v37  ;;  %v9400_v17 = vld [vmem:[#allocation93_spill] sm:$0xff]  ;;  %v9401_v20 = vld [vmem:[#allocation94_spill] sm:$0xff] }
 0x235   :  { %v1713_v49 = vadd.f32 %v9389_v31, %v1499_v0  ;;  %v1502_v18 = vadd.f32 %v9391_v2, %v1246_v33  ;;  %v1501_v45 = vadd.f32 %v9392_v58, %v1245_v44  ;;  %v1956_v11 = vadd.f32 %v9393_v22, %v1714_v35  ;;  %v9402_v35 = vld [vmem:[#allocation168_spill] sm:$0xff]  ;;  %v9407_v2 = vld [vmem:[#allocation126_spill] sm:$0xff] }
 0x236   :  { %v2318_v27 = vadd.f32 %v8531_v47, %v2152_v57  ;;  %v2317_v39 = vadd.f32 %v8531_v47, %v2151_v63  ;;  %2345 = vrot.lane.b32.xlu1 %v2324_v40, %s6598_s15  ;;  %2343 = vrot.lane.b32.xlu0 %v2323_v60, %s6598_s15  ;;  %v9390_v47 = vld [vmem:[#allocation37_spill] sm:$0xff] }
 0x237   :  { %v2188_v34 = vpop.permute.xlu1 %2187  ;;  %v2186_v56 = vpop.permute.xlu0 %2185  ;;  %v1054_v55 = vadd.f32 %v9390_v47, %v8445_v3  ;;  %v1955_v13 = vadd.f32 %v9394_v46, %v1713_v49  ;;  %v9395_v60 = vld [vmem:[#allocation61_spill] sm:$0xff]  ;;  %v9396_v3 = vld [vmem:[#allocation62_spill] sm:$0xff]  ;;  %v1716_v33 = vadd.f32 %v9397_v43, %v1502_v18  ;;  %v1715_v21 = vadd.f32 %v9398_v50, %v1501_v45  ;;  %v9412_v43 = vld [vmem:[#allocation171_spill] sm:$0xff] }
 0x238   :  { %v2326_v37 = vmax.f32 %v2318_v27, 0.0  ;;  %v2325_v41 = vmax.f32 %v2317_v39, 0.0  ;;  %v2210_v7 = vadd.f32 %v2188_v34, %v1954_v19  ;;  %v2209_v48 = vadd.f32 %v2186_v56, %v1953_v4  ;;  %v9399_v27 = vld [vmem:[#allocation38_spill] sm:$0xff] }
 0x239   :  { %v1248_v57 = vadd.f32 %v9395_v60, %v8519_v32  ;;  %v1247_v63 = vadd.f32 %v9396_v3, %v8526_v26  ;;  %v1053_v39 = vadd.f32 %v9399_v27, %v8455_v14  ;;  %v1958_v31 = vadd.f32 %v9402_v35, %v1716_v33  ;;  %v9403_v26 = vld [vmem:[#allocation169_spill] sm:$0xff]  ;;  %v9409_v60 = vld [vmem:[#allocation95_spill] sm:$0xff] }
 0x23a   :  { %v2372_v1 = vadd.f32 %v8602_v23, %v2210_v7  ;;  %v2371_v40 = vadd.f32 %v8602_v23, %v2209_v48  ;;  %2349 = vrot.lane.b32.xlu1 %v2326_v37, %s6598_s15  ;;  %2347 = vrot.lane.b32.xlu0 %v2325_v41, %s6598_s15  ;;  %v1957_v49 = vadd.f32 %v9403_v26, %v1715_v21  ;;  %v9404_v37 = vld [vmem:[#allocation63_spill] sm:$0xff]  ;;  %v9405_v41 = vld [vmem:[#allocation64_spill] sm:$0xff]  ;;  %v9406_v48 = vld [vmem:[#allocation125_spill] sm:$0xff] }
 0x23b   :  { %v2192_v25 = vpop.permute.xlu1 %2191  ;;  %v2190_v0 = vpop.permute.xlu0 %2189  ;;  %v1504_v44 = vadd.f32 %v9400_v17, %v1248_v57  ;;  %v1503_v32 = vadd.f32 %v9401_v20, %v1247_v63  ;;  %v1306_v14 = vadd.f32 %v9404_v37, %v8536_v59  ;;  %v1305_v7 = vadd.f32 %v9405_v41, %v8539_v51  ;;  %v9410_v57 = vld [vmem:[#allocation96_spill] sm:$0xff]  ;;  %v9411_v51 = vld [vmem:[#allocation170_spill] sm:$0xff]  ;;  %v9417_v26 = vld [vmem:[#allocation67_spill] sm:$0xff] }
 0x23c   :  { %v2380_v53 = vmax.f32 %v2372_v1, 0.0  ;;  %v2379_v19 = vmax.f32 %v2371_v40, 0.0  ;;  %v2212_v16 = vadd.f32 %v2192_v25, %v1956_v11  ;;  %v2211_v4 = vadd.f32 %v2190_v0, %v1955_v13  ;;  %v9408_v1 = vld [vmem:[#allocation39_spill] sm:$0xff]  ;;  %v9413_v25 = vld [vmem:[#allocation65_spill] sm:$0xff]  ;;  %v9419_v37 = vld [vmem:[#allocation98_spill] sm:$0xff] }
 0x23d   :  { %v1718_v47 = vadd.f32 %v9406_v48, %v1504_v44  ;;  %v1717_v18 = vadd.f32 %v9407_v2, %v1503_v32  ;;  %v1056_v40 = vadd.f32 %v9408_v1, %v8457_v62  ;;  %v1562_v59 = vadd.f32 %v9409_v60, %v1306_v14  ;;  %v9414_v62 = vld [vmem:[#allocation66_spill] sm:$0xff]  ;;  %v9420_v48 = vld [vmem:[#allocation68_spill] sm:$0xff]  ;;  %v9421_v2 = vld [vmem:[#allocation129_spill] sm:$0xff] }
 0x23e   :  { %v2374_v34 = vadd.f32 %v8602_v23, %v2212_v16  ;;  %v2373_v56 = vadd.f32 %v8602_v23, %v2211_v4  ;;  %2397 = vrot.lane.b32.xlu1 %v2380_v53, %s6599_s18  ;;  %2395 = vrot.lane.b32.xlu0 %v2379_v19, %s6599_s18  ;;  %v1561_v3 = vadd.f32 %v9410_v57, %v1305_v7  ;;  %v9415_v19 = vld [vmem:[#allocation127_spill] sm:$0xff]  ;;  %v9416_v4 = vld [vmem:[#allocation128_spill] sm:$0xff] }
 0x23f   :  { %v2196_v58 = vpop.permute.xlu1 %2195  ;;  %v2194_v45 = vpop.permute.xlu0 %2193  ;;  %v1960_v63 = vadd.f32 %v9411_v51, %v1718_v47  ;;  %v1959_v33 = vadd.f32 %v9412_v43, %v1717_v18  ;;  %v1308_v0 = vadd.f32 %v9413_v25, %v8553_v12  ;;  %v1307_v53 = vadd.f32 %v9414_v62, %v8571_v42  ;;  %v9422_v18 = vld [vmem:[#allocation130_spill] sm:$0xff]  ;;  %v9424_v60 = vld [vmem:[#allocation99_spill] sm:$0xff]  ;;  %v9425_v57 = vld [vmem:[#allocation100_spill] sm:$0xff] }
 0x240   :  { %v2382_v22 = vmax.f32 %v2374_v34, 0.0  ;;  %v2381_v11 = vmax.f32 %v2373_v56, 0.0  ;;  %v2214_v46 = vadd.f32 %v2196_v58, %v1958_v31  ;;  %v2213_v13 = vadd.f32 %v2194_v45, %v1957_v49  ;;  %v9418_v34 = vld [vmem:[#allocation97_spill] sm:$0xff]  ;;  %v9428_v25 = vld [vmem:[#allocation131_spill] sm:$0xff]  ;;  %v9429_v62 = vld [vmem:[#allocation132_spill] sm:$0xff] }
 0x241   :  { %v1762_v16 = vadd.f32 %v9415_v19, %v1562_v59  ;;  %v1761_v27 = vadd.f32 %v9416_v4, %v1561_v3  ;;  %v1310_v49 = vadd.f32 %v9417_v26, %v1054_v55  ;;  %v1564_v56 = vadd.f32 %v9418_v34, %v1308_v0 }
 0x242   :  { %v2376_v50 = vadd.f32 %v8602_v23, %v2214_v46  ;;  %v2375_v21 = vadd.f32 %v8602_v23, %v2213_v13  ;;  %2401 = vrot.lane.b32.xlu1 %v2382_v22, %s6599_s18  ;;  %2399 = vrot.lane.b32.xlu0 %v2381_v11, %s6599_s18  ;;  %v1563_v12 = vadd.f32 %v9419_v37, %v1307_v53  ;;  %v8667_v45 = vstv %s8636_s19  ;;  %v9434_v37 = vld [vmem:[#allocation41_spill] sm:$0xff] }
 0x243   :  { %v2200_v17 = vpop.permute.xlu1 %2199  ;;  %v2198_v44 = vpop.permute.xlu0 %2197  ;;  %v2018_v14 = vadd.f32 %v8410_v30, %v1762_v16  ;;  %v2017_v42 = vadd.f32 %v8412_v54, %v1761_v27  ;;  %v1309_v47 = vadd.f32 %v9420_v48, %v1053_v39  ;;  %v1764_v55 = vadd.f32 %v9421_v2, %v1564_v56 }
 0x244   :  { %v2384_v20 = vmax.f32 %v2376_v50, 0.0  ;;  %v2383_v32 = vmax.f32 %v2375_v21, 0.0  ;;  %v2216_v35 = vadd.f32 %v2200_v17, %v1960_v63  ;;  %v2215_v31 = vadd.f32 %v2198_v44, %v1959_v33  ;;  %v9426_v33 = vld [vmem:[#allocation69_spill] sm:$0xff]  ;;  %v9427_v21 = vld [vmem:[#allocation70_spill] sm:$0xff] }
 0x245   :  { %v1763_v58 = vadd.f32 %v9422_v18, %v1563_v12  ;;  %v1566_v59 = vadd.f32 %v9424_v60, %v1310_v49  ;;  %v1565_v3 = vadd.f32 %v9425_v57, %v1309_v47  ;;  %v2020_v39 = vadd.f32 %v8423_v24, %v1764_v55  ;;  %v9430_v17 = vld [vmem:[#allocation141_spill] sm:$0xff] }
 0x246   :  { %v2378_v41 = vadd.f32 %v8602_v23, %v2216_v35  ;;  %v2377_v7 = vadd.f32 %v8602_v23, %v2215_v31  ;;  %2405 = vrot.lane.b32.xlu1 %v2384_v20, %s6599_s18  ;;  %2403 = vrot.lane.b32.xlu0 %v2383_v32, %s6599_s18  ;;  %v9423_v23 = vld [vmem:[#allocation40_spill] sm:$0xff]  ;;  %v1312_v50 = vadd.f32 %v9426_v33, %v1056_v40  ;;  %v9431_v44 = vld [vmem:[#allocation17_spill] sm:$0xff]  ;;  %v9433_v31 = vld [vmem:[#allocation102_spill] sm:$0xff] }
 0x247   :  { %v2252_v22 = vpop.permute.xlu1 %2251  ;;  %v2250_v30 = vpop.permute.xlu0 %2249  ;;  %v1055_v1 = vadd.f32 %v9423_v23, %v8469_v6  ;;  %v2019_v51 = vadd.f32 %v8425_v5, %v1763_v58  ;;  %v1766_v0 = vadd.f32 %v9428_v25, %v1566_v59  ;;  %v1765_v53 = vadd.f32 %v9429_v62, %v1565_v3  ;;  %v9432_v32 = vld [vmem:[#allocation101_spill] sm:$0xff]  ;;  %v9442_v59 = vld [vmem:[#allocation43_spill] sm:$0xff]  ;;  %v9443_v3 = vld [vmem:[#allocation44_spill] sm:$0xff] }
 0x248   :  { %v2386_v11 = vmax.f32 %v2378_v41, 0.0  ;;  %v2385_v54 = vmax.f32 %v2377_v7, 0.0  ;;  %v2274_v46 = vadd.f32 %v2252_v22, %v2018_v14  ;;  %v2273_v13 = vadd.f32 %v2250_v30, %v2017_v42  ;;  %v9435_v14 = vld [vmem:[#allocation42_spill] sm:$0xff]  ;;  %v9436_v41 = vld [vmem:[#allocation133_spill] sm:$0xff] }
 0x249   :  { %v1311_v6 = vadd.f32 %v9427_v21, %v1055_v1  ;;  %v906_v20 = vadd.f32 %v9431_v44, %v9430_v17  ;;  %v1568_v35 = vadd.f32 %v9432_v32, %v1312_v50  ;;  %v2022_v40 = vadd.f32 %v8459_v15, %v1766_v0  ;;  %v9437_v15 = vld [vmem:[#allocation134_spill] sm:$0xff]  ;;  %v9446_v0 = vld [vmem:[#allocation45_spill] sm:$0xff] }
 0x24a   :  { %v2432_v63 = vadd.f32 %v8667_v45, %v2274_v46  ;;  %v2431_v43 = vadd.f32 %v8667_v45, %v2273_v13  ;;  %2409 = vrot.lane.b32.xlu1 %v2386_v11, %s6599_s18  ;;  %2407 = vrot.lane.b32.xlu0 %v2385_v54, %s6599_s18  ;;  %v2021_v49 = vadd.f32 %v8461_v28, %v1765_v53  ;;  %v9438_v22 = vld [vmem:[#allocation142_spill] sm:$0xff]  ;;  %v9440_v54 = vld [vmem:[#allocation71_spill] sm:$0xff]  ;;  %v9441_v46 = vld [vmem:[#allocation72_spill] sm:$0xff] }
 0x24b   :  { %v2256_v19 = vpop.permute.xlu1 %2255  ;;  %v2254_v24 = vpop.permute.xlu0 %2253  ;;  %v1567_v26 = vadd.f32 %v9433_v31, %v1311_v6  ;;  %v1114_v12 = vadd.f32 %v9434_v37, %v8453_v10  ;;  %v1113_v42 = vadd.f32 %v9435_v14, %v8439_v8  ;;  %v1768_v7 = vadd.f32 %v9436_v41, %v1568_v35  ;;  %v9439_v30 = vld [vmem:[#allocation18_spill] sm:$0xff]  ;;  %v9447_v53 = vld [vmem:[#allocation73_spill] sm:$0xff]  ;;  %v9455_v41 = vld [vmem:[#allocation75_spill] sm:$0xff] }
 0x24c   :  { %v2440_v16 = vmax.f32 %v2432_v63, 0.0  ;;  %v2439_v5 = vmax.f32 %v2431_v43, 0.0  ;;  %v2276_v4 = vadd.f32 %v2256_v19, %v2020_v39  ;;  %v2275_v27 = vadd.f32 %v2254_v24, %v2019_v51  ;;  %v9444_v51 = vld [vmem:[#allocation103_spill] sm:$0xff]  ;;  %v9445_v43 = vld [vmem:[#allocation104_spill] sm:$0xff]  ;;  %v9451_v44 = vld [vmem:[#allocation46_spill] sm:$0xff] }
 0x24d   :  { %v1767_v48 = vadd.f32 %v9437_v15, %v1567_v26  ;;  %v905_v11 = vadd.f32 %v9439_v30, %v9438_v22  ;;  %v1370_v10 = vadd.f32 %v9440_v54, %v1114_v12  ;;  %v1369_v13 = vadd.f32 %v9441_v46, %v1113_v42  ;;  %v9453_v31 = vld [vmem:[#allocation106_spill] sm:$0xff]  ;;  %v9454_v42 = vld [vmem:[#allocation47_spill] sm:$0xff]  ;;  %v9456_v15 = vld [vmem:[#allocation76_spill] sm:$0xff] }
 0x24e   :  { %v2434_v34 = vadd.f32 %v8667_v45, %v2276_v4  ;;  %v2433_v56 = vadd.f32 %v8667_v45, %v2275_v27  ;;  %2457 = vrot.lane.b32.xlu1 %v2440_v16, %s6600_s20  ;;  %2455 = vrot.lane.b32.xlu0 %v2439_v5, %s6600_s20  ;;  %v2024_v8 = vadd.f32 %v8499_v9, %v1768_v7  ;;  %v9449_v16 = vld [vmem:[#allocation135_spill] sm:$0xff]  ;;  %v9450_v5 = vld [vmem:[#allocation136_spill] sm:$0xff] }
 0x24f   :  { %v2260_v28 = vpop.permute.xlu1 %2259  ;;  %v2258_v47 = vpop.permute.xlu0 %2257  ;;  %v2023_v23 = vadd.f32 %v8501_v38, %v1767_v48  ;;  %v1116_v57 = vadd.f32 %v9442_v59, %v8449_v61  ;;  %v1115_v39 = vadd.f32 %v9443_v3, %v8430_v36  ;;  %v1612_v63 = vadd.f32 %v9444_v51, %v1370_v10  ;;  %v9448_v61 = vld [vmem:[#allocation74_spill] sm:$0xff]  ;;  %v9460_v30 = vld [vmem:[#allocation107_spill] sm:$0xff]  ;;  %v9461_v10 = vld [vmem:[#allocation108_spill] sm:$0xff] }
 0x250   :  { %v2442_v2 = vmax.f32 %v2434_v34, 0.0  ;;  %v2441_v55 = vmax.f32 %v2433_v56, 0.0  ;;  %v2278_v18 = vadd.f32 %v2260_v28, %v2022_v40  ;;  %v2277_v58 = vadd.f32 %v2258_v47, %v2021_v49  ;;  %v9457_v28 = vld [vmem:[#allocation137_spill] sm:$0xff]  ;;  %v9463_v3 = vld [vmem:[#allocation78_spill] sm:$0xff]  ;;  %v9464_v51 = vld [vmem:[#allocation139_spill] sm:$0xff] }
 0x251   :  { %v1611_v9 = vadd.f32 %v9445_v43, %v1369_v13  ;;  %v1118_v62 = vadd.f32 %v9446_v0, %v8467_v29  ;;  %v1372_v19 = vadd.f32 %v9447_v53, %v1116_v57  ;;  %v1371_v24 = vadd.f32 %v9448_v61, %v1115_v39  ;;  %v9452_v29 = vld [vmem:[#allocation105_spill] sm:$0xff]  ;;  %v9465_v43 = vld [vmem:[#allocation140_spill] sm:$0xff] }
 0x252   :  { %v2436_v1 = vadd.f32 %v8667_v45, %v2278_v18  ;;  %v2435_v60 = vadd.f32 %v8667_v45, %v2277_v58  ;;  %2461 = vrot.lane.b32.xlu1 %v2442_v2, %s6600_s20  ;;  %2459 = vrot.lane.b32.xlu0 %v2441_v55, %s6600_s20  ;;  %v1826_v36 = vadd.f32 %v9449_v16, %v1612_v63  ;;  %v2282_v40 = vstv %s8699_s21  ;;  %v9459_v58 = vld [vmem:[#allocation48_spill] sm:$0xff]  ;;  %v9462_v59 = vld [vmem:[#allocation77_spill] sm:$0xff] }
 0x253   :  { %v2264_v33 = vpop.permute.xlu1 %2263  ;;  %v2262_v38 = vpop.permute.xlu0 %2261  ;;  %v1825_v4 = vadd.f32 %v9450_v5, %v1611_v9  ;;  %v1117_v32 = vadd.f32 %v9451_v44, %v8475_v52  ;;  %v1614_v35 = vadd.f32 %v9452_v29, %v1372_v19  ;;  %v1613_v26 = vadd.f32 %v9453_v31, %v1371_v24  ;;  %v9458_v52 = vld [vmem:[#allocation138_spill] sm:$0xff]  ;;  %v9468_v24 = vld [vmem:[#allocation143_spill] sm:$0xff] }
 0x254   :  { %v2444_v50 = vmax.f32 %v2436_v1, 0.0  ;;  %v2443_v21 = vmax.f32 %v2435_v60, 0.0  ;;  %v2280_v6 = vadd.f32 %v2264_v33, %v2024_v8  ;;  %v2279_v25 = vadd.f32 %v2262_v38, %v2023_v23  ;;  %v9466_v38 = vld [vmem:[#allocation109_spill] sm:$0xff] }
 0x255   :  { %v1374_v7 = vadd.f32 %v9455_v41, %v1118_v62  ;;  %v1373_v48 = vadd.f32 %v9456_v15, %v1117_v32  ;;  %v1828_v47 = vadd.f32 %v9457_v28, %v1614_v35  ;;  %v1827_v2 = vadd.f32 %v9458_v52, %v1613_v26 }
 0x256   :  { %v2438_v27 = vadd.f32 %v8667_v45, %v2280_v6  ;;  %v2437_v17 = vadd.f32 %v8667_v45, %v2279_v25  ;;  %2465 = vrot.lane.b32.xlu1 %v2444_v50, %s6600_s20  ;;  %2463 = vrot.lane.b32.xlu0 %v2443_v21, %s6600_s20  ;;  %v1120_v45 = vadd.f32 %v9454_v42, %v906_v20  ;;  %v9467_v21 = vld [vmem:[#allocation110_spill] sm:$0xff] }
 0x257   :  { %v2060_v49 = vpop.permute.xlu1 %2059  ;;  %v2058_v34 = vpop.permute.xlu0 %2057  ;;  %v1119_v22 = vadd.f32 %v9459_v58, %v905_v11  ;;  %v1616_v54 = vadd.f32 %v9460_v30, %v1374_v7  ;;  %v1615_v20 = vadd.f32 %v9461_v10, %v1373_v48 }
 0x258   :  { %v2446_v56 = vmax.f32 %v2438_v27, 0.0  ;;  %v2445_v37 = vmax.f32 %v2437_v17, 0.0  ;;  %v2082_v12 = vadd.f32 %v2060_v49, %v1826_v36  ;;  %v2081_v14 = vadd.f32 %v2058_v34, %v1825_v4  ;;  %v9469_v36 = vld [vmem:[#allocation144_spill] sm:$0xff] }
 0x259   :  { %v1376_v57 = vadd.f32 %v9462_v59, %v1120_v45  ;;  %v1375_v39 = vadd.f32 %v9463_v3, %v1119_v22  ;;  %v1830_v63 = vadd.f32 %v9464_v51, %v1616_v54  ;;  %v1829_v9 = vadd.f32 %v9465_v43, %v1615_v20 }
 0x25a   :  { %v2284_v55 = vadd.f32 %v2282_v40, %v2082_v12  ;;  %v2283_v18 = vadd.f32 %v2282_v40, %v2081_v14  ;;  %2469 = vrot.lane.b32.xlu1 %v2446_v56, %s6600_s20  ;;  %2467 = vrot.lane.b32.xlu0 %v2445_v37, %s6600_s20 }
 0x25b   :  { %v2064_v46 = vpop.permute.xlu1 %2063  ;;  %v2062_v13 = vpop.permute.xlu0 %2061  ;;  %v1618_v50 = vadd.f32 %v9466_v38, %v1376_v57  ;;  %v1617_v6 = vadd.f32 %v9467_v21, %v1375_v39 }
 0x25c   :  { %v2292_v8 = vmax.f32 %v2284_v55, 0.0  ;;  %v2291_v23 = vmax.f32 %v2283_v18, 0.0  ;;  %v2084_v1 = vadd.f32 %v2064_v46, %v1828_v47  ;;  %v2083_v60 = vadd.f32 %v2062_v13, %v1827_v2 }
 0x25d   :  { %v1832_v16 = vadd.f32 %v9468_v24, %v1618_v50  ;;  %v1831_v5 = vadd.f32 %v9469_v36, %v1617_v6 }
 0x25e   :  { %v2286_v11 = vadd.f32 %v2282_v40, %v2084_v1  ;;  %v2285_v33 = vadd.f32 %v2282_v40, %v2083_v60  ;;  %2301 = vst.msk [vmem:[#allocation2 + $0x8] sm:$0xff] %vm2299_vm2, %v2292_v8  ;;  %2300 = vst.msk [vmem:[#allocation2] sm:$0xff] %vm2299_vm2, %v2291_v23 }
 0x25f   :  { %v2068_v25 = vpop.permute.xlu1 %2067  ;;  %v2066_v0 = vpop.permute.xlu0 %2065 }
 0x260   :  { %v2294_v62 = vmax.f32 %v2286_v11, 0.0  ;;  %v2293_v53 = vmax.f32 %v2285_v33, 0.0  ;;  %v2086_v19 = vadd.f32 %v2068_v25, %v1830_v63  ;;  %v2085_v61 = vadd.f32 %v2066_v0, %v1829_v9 }
 0x262   :  { %v2288_v4 = vadd.f32 %v2282_v40, %v2086_v19  ;;  %v2287_v27 = vadd.f32 %v2282_v40, %v2085_v61  ;;  %2302 = vst.msk [vmem:[#allocation2 + $0x10] sm:$0xff] %vm2299_vm2, %v2293_v53 }
 0x263   :  { %2304 = vst.msk [vmem:[#allocation2 + $0x18] sm:$0x3] %vm2303_vm3, %v2294_v62  ;;  %v2072_v17 = vpop.permute.xlu1 %2071  ;;  %v2070_v44 = vpop.permute.xlu0 %2069 }
 0x264   :  { %v2296_v32 = vmax.f32 %v2288_v4, 0.0  ;;  %v2295_v29 = vmax.f32 %v2287_v27, 0.0  ;;  %v2088_v35 = vadd.f32 %v2072_v17, %v1832_v16  ;;  %v2087_v31 = vadd.f32 %v2070_v44, %v1831_v5 }
 0x266   :  { %v2290_v26 = vadd.f32 %v2282_v40, %v2088_v35  ;;  %v2289_v49 = vadd.f32 %v2282_v40, %v2087_v31  ;;  %2305 = vst.msk [vmem:[#allocation2 + $0x20] sm:$0xff] %vm2299_vm2, %v2295_v29  ;;  %2306 = vst.msk [vmem:[#allocation2 + $0x28] sm:$0xff] %vm2299_vm2, %v2296_v32 }
 0x268   :  { %v2298_v34 = vmax.f32 %v2290_v26, 0.0  ;;  %v2297_v56 = vmax.f32 %v2289_v49, 0.0 }
 0x26a   :  { %2307 = vst.msk [vmem:[#allocation2 + $0x30] sm:$0xff] %vm2299_vm2, %v2297_v56 }
 0x26b   :  { %2308 = vst.msk [vmem:[#allocation2 + $0x38] sm:$0x3] %vm2303_vm3, %v2298_v34 }
 0x2a0   :  { %v2338_v37 = vpop.permute.xlu1 %2337  ;;  %v2336_v12 = vpop.permute.xlu0 %2335 }
 0x2a1   :  { %2361 = vst.msk [vmem:[#allocation2 + $0x8] sm:$0xff] %vm2359_vm4, %v2338_v37  ;;  %2360 = vst.msk [vmem:[#allocation2] sm:$0xff] %vm2359_vm4, %v2336_v12 }
 0x2a4   :  { %v2342_v14 = vpop.permute.xlu1 %2341  ;;  %v2340_v40 = vpop.permute.xlu0 %2339 }
 0x2a5   :  { %2364 = vst.msk [vmem:[#allocation2 + $0x18] sm:$0x3] %vm2363_vm5, %v2342_v14 }
 0x2a6   :  { %2362 = vst.msk [vmem:[#allocation2 + $0x10] sm:$0xff] %vm2359_vm4, %v2340_v40 }
 0x2a8   :  { %v2346_v42 = vpop.permute.xlu1 %2345  ;;  %v2344_v45 = vpop.permute.xlu0 %2343 }
 0x2a9   :  { %2366 = vst.msk [vmem:[#allocation2 + $0x28] sm:$0xff] %vm2359_vm4, %v2346_v42  ;;  %2365 = vst.msk [vmem:[#allocation2 + $0x20] sm:$0xff] %vm2359_vm4, %v2344_v45 }
 0x2ac   :  { %v2350_v41 = vpop.permute.xlu1 %2349  ;;  %v2348_v7 = vpop.permute.xlu0 %2347 }
 0x2ad   :  { %2368 = vst.msk [vmem:[#allocation2 + $0x38] sm:$0x3] %vm2363_vm5, %v2350_v41 }
 0x2ae   :  { %2367 = vst.msk [vmem:[#allocation2 + $0x30] sm:$0xff] %vm2359_vm4, %v2348_v7 }
 0x2b0   :  { %v2398_v15 = vpop.permute.xlu1 %2397  ;;  %v2396_v48 = vpop.permute.xlu0 %2395 }
 0x2b1   :  { %2421 = vst.msk [vmem:[#allocation2 + $0x8] sm:$0xff] %vm2419_vm6, %v2398_v15  ;;  %2420 = vst.msk [vmem:[#allocation2] sm:$0xff] %vm2419_vm6, %v2396_v48 }
 0x2b4   :  { %v2402_v28 = vpop.permute.xlu1 %2401  ;;  %v2400_v47 = vpop.permute.xlu0 %2399 }
 0x2b5   :  { %2424 = vst.msk [vmem:[#allocation2 + $0x18] sm:$0x3] %vm2423_vm7, %v2402_v28 }
 0x2b6   :  { %2422 = vst.msk [vmem:[#allocation2 + $0x10] sm:$0xff] %vm2419_vm6, %v2400_v47 }
 0x2b8   :  { %v2406_v52 = vpop.permute.xlu1 %2405  ;;  %v2404_v2 = vpop.permute.xlu0 %2403 }
 0x2b9   :  { %2426 = vst.msk [vmem:[#allocation2 + $0x28] sm:$0xff] %vm2419_vm6, %v2406_v52  ;;  %2425 = vst.msk [vmem:[#allocation2 + $0x20] sm:$0xff] %vm2419_vm6, %v2404_v2 }
 0x2bc   :  { %v2410_v55 = vpop.permute.xlu1 %2409  ;;  %v2408_v18 = vpop.permute.xlu0 %2407 }
 0x2bd   :  { %2428 = vst.msk [vmem:[#allocation2 + $0x38] sm:$0x3] %vm2423_vm7, %v2410_v55 }
 0x2be   :  { %2427 = vst.msk [vmem:[#allocation2 + $0x30] sm:$0xff] %vm2419_vm6, %v2408_v18 }
 0x2c0   :  { %v2458_v58 = vpop.permute.xlu1 %2457  ;;  %v2456_v22 = vpop.permute.xlu0 %2455 }
 0x2c1   :  { %2481 = vst.msk [vmem:[#allocation2 + $0x8] sm:$0xff] %vm2479_vm8, %v2458_v58  ;;  %2480 = vst.msk [vmem:[#allocation2] sm:$0xff] %vm2479_vm8, %v2456_v22 }
 0x2c4   :  { %v2462_v30 = vpop.permute.xlu1 %2461  ;;  %v2460_v54 = vpop.permute.xlu0 %2459 }
 0x2c5   :  { %2484 = vst.msk [vmem:[#allocation2 + $0x18] sm:$0x3] %vm2483_vm9, %v2462_v30 }
 0x2c6   :  { %2482 = vst.msk [vmem:[#allocation2 + $0x10] sm:$0xff] %vm2479_vm8, %v2460_v54 }
 0x2c8   :  { %v2466_v10 = vpop.permute.xlu1 %2465  ;;  %v2464_v20 = vpop.permute.xlu0 %2463 }
 0x2c9   :  { %2486 = vst.msk [vmem:[#allocation2 + $0x28] sm:$0xff] %vm2479_vm8, %v2466_v10  ;;  %2485 = vst.msk [vmem:[#allocation2 + $0x20] sm:$0xff] %vm2479_vm8, %v2464_v20 }
 0x2cc   :  { %v2470_v46 = vpop.permute.xlu1 %2469  ;;  %v2468_v13 = vpop.permute.xlu0 %2467 }
 0x2cd   :  { %2488 = vst.msk [vmem:[#allocation2 + $0x38] sm:$0x3] %vm2483_vm9, %v2470_v46 }
 0x2ce   :  { %2487 = vst.msk [vmem:[#allocation2 + $0x30] sm:$0xff] %vm2479_vm8, %v2468_v13 }
 0x2cf   :  { %6590 = dma.done.wait [#allocation4], 21632 }
 0x2d0   :  { %6591 = vsyncadd [#allocation4], 4294945664  ;;  %v6601_v8 = vmov 0.0   ;;  %vm6602_vm10 = vmmov 0   ;;  %v6358_v23 = vld [vmem:[#allocation3 + $0x34] sm:$0xff]   ;;  %v6359_v1 = vld [vmem:[#allocation3 + $0x9c] sm:$0xff]  }
 0x2d1   :  { %5865 = vmatprep.subr.bf16.mxu0 %v6601_v8  ;;  %5883 = vmatprep.subr.bf16.mxu1 %v6601_v8  ;;  %v6360_v60 = vld [vmem:[#allocation3 + $0x3c] sm:$0xff]   ;;  %v6361_v59 = vld [vmem:[#allocation3 + $0xa4] sm:$0xff]   ;;  %v6363_v3 = vld [vmem:[#allocation3 + $0xac] sm:$0xff]   ;;  %vm2580_vm11 = vcmask 1043456   ;;  %vm2534_vm12 = vcmask 1041409   ;;  %vm2576_vm13 = vcmask 850944  }
 0x2d2   :  { %5879 = vmatprep.mubr.msk.bf16.mxu0 %vm6602_vm10, %v6601_v8  ;;  %5897 = vmatprep.mubr.msk.bf16.mxu1 %vm6602_vm10, %v6601_v8  ;;  %v6362_v57 = vld [vmem:[#allocation3 + $0x44] sm:$0xff]   ;;  %v6364_v39 = vld [vmem:[#allocation3 + $0x4c] sm:$0xff]   ;;  %v6365_v51 = vld [vmem:[#allocation3 + $0xb4] sm:$0xff]   ;;  %s6603_s23 = smov [#allocation10]   ;;  %vm5377_vm14 = vcmask 254976  }
 0x2d3   :  { %5866 = vmatpush3.bf16.msra.mxu0 %v6358_v23  ;;  %5884 = vmatpush3.bf16.msra.mxu1 %v6359_v1  ;;  %v2511_v63 = vld [vmem:[#allocation2 + $0x1] sm:$0x1]  ;;  %v6366_v9 = vld [vmem:[#allocation3 + $0x54] sm:$0xff]   ;;  %v2642_v38 = vld [vmem:[#allocation2 + $0x3] sm:$0x1]  ;;  %s5385_s24 = sshll.u32 %s6603_s23, 4  ;;  %s5386_s24 = int_to_ptr.vmem [resolvable:$true] %s5385_s24 }
 0x2d4   :  { %5867 = vmatprep.subr.bf16.mxu0 %v6601_v8  ;;  %5885 = vmatprep.subr.bf16.mxu1 %v6601_v8  ;;  %v2512_v43 = vld [vmem:[#allocation2 + $0x21] sm:$0x1]  ;;  %v2513_v11 = vpack.c.bf16 %v2511_v63, %v2511_v63  ;;  %v2643_v50 = vld [vmem:[#allocation2 + $0x23] sm:$0x1]  ;;  %v2644_v6 = vpack.c.bf16 %v2642_v38, %v2642_v38  ;;  %v6370_v62 = vld [vmem:[#allocation3 + $0x64] ss:$0 sps:$4 sm:$0xff]   ;;  %p6569_p11 = scmp.lt.s32.totalorder %s5386_s24, %s5386_s24 }
 0x2d5   :  { %v2514_v33 = vpack.c.bf16 %v2512_v43, %v2512_v43  ;;  %v6367_v21 = vld [vmem:[#allocation3 + $0xbc] sm:$0xff]   ;;  %v2645_v25 = vpack.c.bf16 %v2643_v50, %v2643_v50  ;;  %v6369_v16 = vld [vmem:[#allocation3 + $0xc4] sm:$0xff]   ;;  %v6371_v4 = vld [vmem:[#allocation3 + $0xcc] ss:$0 sps:$4 sm:$0xff]   ;;  %v2582_v17 = vsel %vm2580_vm11, %v6370_v62, 0  ;;  %s6564_s25 = scalar_lea.vmem %s5386_s24, 32 }
 0x2d6   :  { %v6368_v19 = vld [vmem:[#allocation3 + $0x5c] sm:$0xff]   ;;  %v2531_v61 = vunpack.c.l.b16 %v2513_v11  ;;  %v2662_v36 = vunpack.c.l.b16 %v2644_v6  ;;  %v2710_v32 = vsel %vm2580_vm11, %v6371_v4, 0  ;;  %v6372_v31 = vld [vmem:[#allocation3 + $0x104] sm:$0xff]   ;;  %v6373_v26 = vld [vmem:[#allocation3 + $0x16c] sm:$0xff]   ;;  %p6565_p10 = scmp.ne.s32.totalorder %s5386_s24, %s6564_s25  ;;  %p6570_p12 = scmp.lt.s32.totalorder %s6564_s25, %s6564_s25 }
 0x2d7   :  { %5868 = vmatpush3.bf16.msra.mxu0 %v6360_v60  ;;  %5886 = vmatpush3.bf16.msra.mxu1 %v6361_v59  ;;  %v2532_v0 = vunpack.c.l.b16 %v2514_v33  ;;  %v2663_v53 = vunpack.c.l.b16 %v2645_v25  ;;  %v6374_v49 = vld [vmem:[#allocation3 + $0x10c] sm:$0xff]   ;;  %v6375_v34 = vld [vmem:[#allocation3 + $0x174] sm:$0xff]   ;;  %v6377_v37 = vld [vmem:[#allocation3 + $0x17c] sm:$0xff]  }
 0x2d8   :  { %5869 = vmatprep.subr.bf16.mxu0 %v6601_v8  ;;  %5887 = vmatprep.subr.bf16.mxu1 %v6601_v8  ;;  %v6376_v56 = vld [vmem:[#allocation3 + $0x114] sm:$0xff]   ;;  %v2771_v12 = vld [vmem:[#allocation2 + $0x25] sm:$0x1]  ;;  %v2899_v14 = vld [vmem:[#allocation2 + $0x27] sm:$0x1]  ;;  %p6571_p13 = por %p6570_p12, %p6569_p11 }
 0x2d9   :  { %v2533_v24 = vrot.slane %v2532_v0, 7  ;;  %v2664_v5 = vrot.slane %v2663_v53, 7  ;;  %v6378_v40 = vld [vmem:[#allocation3 + $0x11c] sm:$0xff]   ;;  %v6379_v42 = vld [vmem:[#allocation3 + $0x184] sm:$0xff]   ;;  %v2773_v45 = vpack.c.bf16 %v2771_v12, %v2771_v12  ;;  %v2901_v7 = vpack.c.bf16 %v2899_v14, %v2899_v14  ;;  %v6381_v52 = vld [vmem:[#allocation3 + $0x18c] sm:$0xff]  }
 0x2da   :  { %v2770_v41 = vld [vmem:[#allocation2 + $0x5] sm:$0x1]  ;;  %v2898_v15 = vld [vmem:[#allocation2 + $0x7] sm:$0x1]  ;;  %v6384_v18 = vld [vmem:[#allocation3 + $0x134] ss:$0 sps:$4 sm:$0xff]   ;;  %p6572_p0 = pnand %p6571_p13, %p6565_p10 }
 0x2db   :  { %5870 = vmatpush3.bf16.msra.mxu0 %v6362_v57  ;;  %5888 = vmatpush3.bf16.msra.mxu1 %v6363_v3  ;;  %v2535_v27 = vsel %vm2534_vm12, %v2533_v24, %v2531_v61  ;;  %v2665_v44 = vsel %vm2534_vm12, %v2664_v5, %v2662_v36  ;;  %v6380_v48 = vld [vmem:[#allocation3 + $0x124] sm:$0xff]   ;;  %v2772_v28 = vpack.c.bf16 %v2770_v41, %v2770_v41  ;;  %v2791_v47 = vunpack.c.l.b16 %v2773_v45  ;;  %v6382_v58 = vld [vmem:[#allocation3 + $0x12c] sm:$0xff]   ;;  %v6383_v54 = vld [vmem:[#allocation3 + $0x194] sm:$0xff]  }
 0x2dc   :  { %5871 = vmatprep.subr.bf16.mxu0 %v6601_v8  ;;  %5889 = vmatprep.subr.bf16.mxu1 %v6601_v8  ;;  %v2536_v29 = vpack.c.b16 %v2535_v27, %v2535_v27  ;;  %v2666_v35 = vpack.c.b16 %v2665_v44, %v2665_v44  ;;  %v2900_v2 = vpack.c.bf16 %v2898_v15, %v2898_v15  ;;  %v2919_v55 = vunpack.c.l.b16 %v2901_v7  ;;  %v6385_v46 = vld [vmem:[#allocation3 + $0x19c] ss:$0 sps:$4 sm:$0xff]   ;;  %v6386_v3 = vld [vmem:[#allocation3 + $0x1d4] sm:$0xff]   ;;  %v6389_v63 = vld [vmem:[#allocation3 + $0x244] sm:$0xff]  }
 0x2dd   :  { %v2790_v22 = vunpack.c.l.b16 %v2772_v28  ;;  %v2792_v30 = vrot.slane %v2791_v47, 7  ;;  %v2838_v23 = vsel %vm2580_vm11, %v6384_v18, 0  ;;  %v2966_v60 = vsel %vm2580_vm11, %v6385_v46, 0  ;;  %v6390_v43 = vld [vmem:[#allocation3 + $0x1e4] sm:$0xff]   ;;  %v6392_v38 = vld [vmem:[#allocation3 + $0x1ec] sm:$0xff]   ;;  %v6393_v50 = vld [vmem:[#allocation3 + $0x254] sm:$0xff]  }
 0x2de   :  { %v2918_v10 = vunpack.c.l.b16 %v2900_v2  ;;  %v2920_v20 = vrot.slane %v2919_v55, 7  ;;  %v3027_v11 = vld [vmem:[#allocation2 + $0x29] sm:$0x1]  ;;  %v3155_v33 = vld [vmem:[#allocation2 + $0x2b] sm:$0x1]  ;;  %v6394_v62 = vld [vmem:[#allocation3 + $0x1f4] sm:$0xff]  }
 0x2df   :  { %5872 = vmatpush3.bf16.msra.mxu0 %v6364_v39  ;;  %5890 = vmatpush3.bf16.msra.mxu1 %v6365_v51  ;;  %v2793_v13 = vsel %vm2534_vm12, %v2792_v30, %v2790_v22  ;;  %v6387_v39 = vld [vmem:[#allocation3 + $0x23c] sm:$0xff]   ;;  %v3026_v6 = vld [vmem:[#allocation2 + $0x9] sm:$0x1]  ;;  %v3157_v25 = vpack.c.bf16 %v3155_v33, %v3155_v33  ;;  %v3154_v0 = vld [vmem:[#allocation2 + $0xb] sm:$0x1] }
 0x2e0   :  { %5873 = vmatprep.subr.bf16.mxu0 %v6601_v8  ;;  %5891 = vmatprep.subr.bf16.mxu1 %v6601_v8  ;;  %v2921_v1 = vsel %vm2534_vm12, %v2920_v20, %v2918_v10  ;;  %v2794_v59 = vpack.c.b16 %v2793_v13, %v2793_v13  ;;  %v6388_v51 = vld [vmem:[#allocation3 + $0x1dc] sm:$0xff]   ;;  %v3028_v53 = vpack.c.bf16 %v3026_v6, %v3026_v6  ;;  %v6398_v5 = vld [vmem:[#allocation3 + $0x204] ss:$0 sps:$4 sm:$0xff]   ;;  %v6401_v12 = vld [vmem:[#allocation3 + $0x30c] sm:$0xff]  }
 0x2e1   :  { %v2922_v57 = vpack.c.b16 %v2921_v1, %v2921_v1  ;;  %v6395_v61 = vld [vmem:[#allocation3 + $0x25c] sm:$0xff]   ;;  %v3156_v24 = vpack.c.bf16 %v3154_v0, %v3154_v0  ;;  %v6402_v14 = vld [vmem:[#allocation3 + $0x2ac] sm:$0xff]   ;;  %v6408_v55 = vld [vmem:[#allocation3 + $0x2c4] sm:$0xff]  }
 0x2e2   :  { %v6396_v36 = vld [vmem:[#allocation3 + $0x1fc] sm:$0xff]   ;;  %v3046_v4 = vunpack.c.l.b16 %v3028_v53  ;;  %v3283_v41 = vld [vmem:[#allocation2 + $0x2d] sm:$0x1]  ;;  %v3411_v7 = vld [vmem:[#allocation2 + $0x2f] sm:$0x1] }
 0x2e3   :  { %5874 = vmatpush3.bf16.msra.mxu0 %v6366_v9  ;;  %5892 = vmatpush3.bf16.msra.mxu1 %v6367_v21  ;;  %v6391_v9 = vld [vmem:[#allocation3 + $0x24c] sm:$0xff]   ;;  %v3029_v21 = vpack.c.bf16 %v3027_v11, %v3027_v11  ;;  %v3174_v44 = vunpack.c.l.b16 %v3156_v24  ;;  %v6405_v45 = vld [vmem:[#allocation3 + $0x31c] sm:$0xff]   ;;  %v3285_v28 = vpack.c.bf16 %v3283_v41, %v3283_v41  ;;  %v6411_v13 = vld [vmem:[#allocation3 + $0x334] sm:$0xff]  }
 0x2e4   :  { %5875 = vmatprep.subr.bf16.mxu0 %v6601_v8  ;;  %5893 = vmatprep.subr.bf16.mxu1 %v6601_v8  ;;  %v6406_v15 = vld [vmem:[#allocation3 + $0x2bc] sm:$0xff]   ;;  %v3282_v47 = vld [vmem:[#allocation2 + $0xd] sm:$0x1]  ;;  %v3410_v2 = vld [vmem:[#allocation2 + $0xf] sm:$0x1] }
 0x2e5   :  { %v3284_v18 = vpack.c.bf16 %v3282_v47, %v3282_v47  ;;  %v6409_v22 = vld [vmem:[#allocation3 + $0x32c] sm:$0xff]   ;;  %v3412_v30 = vpack.c.bf16 %v3410_v2, %v3410_v2  ;;  %v6415_v11 = vld [vmem:[#allocation3 + $0x3dc] sm:$0xff]   ;;  %v3923_v47 = vld [vmem:[#allocation2 + $0x37] sm:$0x1] }
 0x2e6   :  { %v6410_v10 = vld [vmem:[#allocation3 + $0x2cc] sm:$0xff]   ;;  %v6416_v33 = vld [vmem:[#allocation3 + $0x37c] sm:$0xff]  }
 0x2e7   :  { %5876 = vmatpush3.bf16.msra.mxu0 %v6368_v19  ;;  %5894 = vmatpush3.bf16.msra.mxu1 %v6369_v16  ;;  %v3047_v19 = vunpack.c.l.b16 %v3029_v21  ;;  %v3175_v16 = vunpack.c.l.b16 %v3157_v25  ;;  %v3302_v20 = vunpack.c.l.b16 %v3284_v18  ;;  %v3430_v1 = vunpack.c.l.b16 %v3412_v30  ;;  %v6419_v21 = vld [vmem:[#allocation3 + $0x3ec] sm:$0xff]   ;;  %v6434_v2 = vld [vmem:[#allocation3 + $0x45c] sm:$0xff]   ;;  %v3922_v30 = vld [vmem:[#allocation2 + $0x17] sm:$0x1] }
 0x2e8   :  { %5877 = vmatprep.subr.bf16.mxu0 %v6601_v8  ;;  %5895 = vmatprep.subr.bf16.mxu1 %v6601_v8  ;;  %v3539_v6 = vld [vmem:[#allocation2 + $0x31] sm:$0x1]  ;;  %v3667_v25 = vld [vmem:[#allocation2 + $0x33] sm:$0x1] }
 0x2e9   :  { %v3048_v27 = vrot.slane %v3047_v19, 7  ;;  %v6420_v0 = vld [vmem:[#allocation3 + $0x38c] sm:$0xff]   ;;  %v3541_v53 = vpack.c.bf16 %v3539_v6, %v3539_v6 }
 0x2ea   :  { %v3538_v19 = vld [vmem:[#allocation2 + $0x11] sm:$0x1]  ;;  %v3666_v24 = vld [vmem:[#allocation2 + $0x13] sm:$0x1] }
 0x2eb   :  { %5878 = vmatpush3.bf16.msra.mxu0 %v2582_v17  ;;  %5896 = vmatpush3.bf16.msra.mxu1 %v2710_v32  ;;  %v6397_v17 = vld [vmem:[#allocation3 + $0x264] sm:$0xff]   ;;  %v3176_v32 = vrot.slane %v3175_v16, 7  ;;  %v6422_v16 = vld [vmem:[#allocation3 + $0x394] sm:$0xff]   ;;  %v6429_v41 = vld [vmem:[#allocation3 + $0x4ac] sm:$0xff]  }
 0x2ec   :  { %5901 = vmatprep.subr.bf16.mxu0 %v6601_v8  ;;  %5919 = vmatprep.subr.bf16.mxu1 %v6601_v8 }
 0x2ee   :  { %5880 = vmatmul.mubr.msk.bf16.vlgmr.msra.gmra.mrb[0].mxu0 %vm2576_vm13, %v2536_v29  ;;  %5898 = vmatmul.mubr.msk.bf16.vlgmr.msra.gmra.mrb[0].mxu1 %vm2576_vm13, %v2666_v35  ;;  %v6399_v29 = vld [vmem:[#allocation3 + $0x26c] ss:$0 sps:$4 sm:$0xff]   ;;  %v3049_v35 = vsel %vm2534_vm12, %v3048_v27, %v3046_v4  ;;  %v6423_v4 = vld [vmem:[#allocation3 + $0x3fc] sm:$0xff]   ;;  %v3668_v27 = vpack.c.bf16 %v3666_v24, %v3666_v24 }
 0x2ef   :  { %5902 = vmatpush3.bf16.msra.mxu0 %v6372_v31  ;;  %5920 = vmatpush3.bf16.msra.mxu1 %v6373_v26  ;;  %v3094_v31 = vsel %vm2580_vm11, %v6398_v5, 0  ;;  %v3177_v26 = vsel %vm2534_vm12, %v3176_v32, %v3174_v44  ;;  %v3559_v5 = vunpack.c.l.b16 %v3541_v53  ;;  %v6426_v44 = vld [vmem:[#allocation3 + $0x3a4] ss:$0 sps:$4 sm:$0xff]   ;;  %v6424_v32 = vld [vmem:[#allocation3 + $0x39c] sm:$0xff]   ;;  %v6447_v53 = vld [vmem:[#allocation3 + $0x10] sm:$0xff]  }
 0x2f0   :  { %5903 = vmatprep.subr.bf16.mxu0 %v6601_v8  ;;  %5921 = vmatprep.subr.bf16.mxu1 %v6601_v8  ;;  %v2495_v24 = vld [vmem:[#allocation2 + $0x20] sm:$0x1] }
 0x2f1   :  { %5915 = vmatprep.mubr.msk.bf16.mxu0 %vm6602_vm10, %v6601_v8  ;;  %5933 = vmatprep.mubr.msk.bf16.mxu1 %vm6602_vm10, %v6601_v8 }
 0x2f3   :  { %5904 = vmatpush3.bf16.msra.mxu0 %v6374_v49  ;;  %5922 = vmatpush3.bf16.msra.mxu1 %v6375_v34  ;;  %v3222_v49 = vsel %vm2580_vm11, %v6399_v29, 0  ;;  %v3050_v34 = vpack.c.b16 %v3049_v35, %v3049_v35  ;;  %v3560_v35 = vrot.slane %v3559_v5, 7 }
 0x2f4   :  { %5905 = vmatprep.subr.bf16.mxu0 %v6601_v8  ;;  %5923 = vmatprep.subr.bf16.mxu1 %v6601_v8 }
 0x2f7   :  { %5906 = vmatpush3.bf16.msra.mxu0 %v6376_v56  ;;  %5924 = vmatpush3.bf16.msra.mxu1 %v6377_v37  ;;  %v3178_v56 = vpack.c.b16 %v3177_v26, %v3177_v26  ;;  %v6400_v37 = vld [vmem:[#allocation3 + $0x2a4] sm:$0xff]   ;;  %v3686_v26 = vunpack.c.l.b16 %v3668_v27  ;;  %v2497_v27 = vpack.c.bf16 %v2495_v24, %v2495_v24 }
 0x2f8   :  { %5907 = vmatprep.subr.bf16.mxu0 %v6601_v8  ;;  %5925 = vmatprep.subr.bf16.mxu1 %v6601_v8  ;;  %v6473_v24 = vld [vmem:[#allocation3 + $0x1a8] sm:$0xff]  }
 0x2fb   :  { %5908 = vmatpush3.bf16.msra.mxu0 %v6378_v40  ;;  %5926 = vmatpush3.bf16.msra.mxu1 %v6379_v42  ;;  %v6403_v40 = vld [vmem:[#allocation3 + $0x314] sm:$0xff]  }
 0x2fc   :  { %5909 = vmatprep.subr.bf16.mxu0 %v6601_v8  ;;  %5927 = vmatprep.subr.bf16.mxu1 %v6601_v8  ;;  %v6404_v42 = vld [vmem:[#allocation3 + $0x2b4] sm:$0xff]  }
 0x2ff   :  { %5910 = vmatpush3.bf16.msra.mxu0 %v6380_v48  ;;  %5928 = vmatpush3.bf16.msra.mxu1 %v6381_v52  ;;  %v6407_v48 = vld [vmem:[#allocation3 + $0x324] sm:$0xff]   ;;  %v3413_v52 = vpack.c.bf16 %v3411_v7, %v3411_v7  ;;  %v6430_v7 = vld [vmem:[#allocation3 + $0x44c] sm:$0xff]  }
 0x300   :  { %5911 = vmatprep.subr.bf16.mxu0 %v6601_v8  ;;  %5929 = vmatprep.subr.bf16.mxu1 %v6601_v8 }
 0x303   :  { %5912 = vmatpush3.bf16.msra.mxu0 %v6382_v58  ;;  %5930 = vmatpush3.bf16.msra.mxu1 %v6383_v54  ;;  %v3303_v58 = vunpack.c.l.b16 %v3285_v28  ;;  %v3431_v54 = vunpack.c.l.b16 %v3413_v52  ;;  %v3795_v28 = vld [vmem:[#allocation2 + $0x35] sm:$0x1]  ;;  %v6433_v52 = vld [vmem:[#allocation3 + $0x4bc] sm:$0xff]  }
 0x304   :  { %5913 = vmatprep.subr.bf16.mxu0 %v6601_v8  ;;  %5931 = vmatprep.subr.bf16.mxu1 %v6601_v8  ;;  %v3797_v18 = vpack.c.bf16 %v3795_v28, %v3795_v28  ;;  %v6456_v28 = vld [vmem:[#allocation3 + $0x68] sm:$0xff]  }
 0x305   :  { %v3304_v46 = vrot.slane %v3303_v58, 7  ;;  %v3925_v58 = vpack.c.bf16 %v3923_v47, %v3923_v47  ;;  %v6457_v47 = vld [vmem:[#allocation3 + $0xd0] sm:$0xff]  }
 0x307   :  { %5914 = vmatpush3.bf16.msra.mxu0 %v2838_v23  ;;  %5932 = vmatpush3.bf16.msra.mxu1 %v2966_v60  ;;  %v6412_v23 = vld [vmem:[#allocation3 + $0x2d4] ss:$0 sps:$4 sm:$0xff]   ;;  %v3432_v60 = vrot.slane %v3431_v54, 7  ;;  %v6436_v54 = vld [vmem:[#allocation3 + $0x464] sm:$0xff]  }
 0x308   :  { %5937 = vmatprep.subr.bf16.mxu0 %v6601_v8  ;;  %5955 = vmatprep.subr.bf16.mxu1 %v6601_v8 }
 0x30a   :  { %5916 = vmatmul.mubr.msk.bf16.vlgmr.msra.gmra.mrb[4].mxu0 %vm2576_vm13, %v2794_v59  ;;  %5934 = vmatmul.mubr.msk.bf16.vlgmr.msra.gmra.mrb[4].mxu1 %vm2576_vm13, %v2922_v57  ;;  %v6413_v59 = vld [vmem:[#allocation3 + $0x33c] ss:$0 sps:$4 sm:$0xff]   ;;  %v3305_v57 = vsel %vm2534_vm12, %v3304_v46, %v3302_v20  ;;  %v3943_v20 = vunpack.c.l.b16 %v3925_v58  ;;  %v2625_v58 = vld [vmem:[#allocation2 + $0x22] sm:$0x1] }
 0x30b   :  { %5938 = vmatpush3.bf16.msra.mxu0 %v6386_v3  ;;  %5956 = vmatpush3.bf16.msra.mxu1 %v6387_v39  ;;  %v3350_v3 = vsel %vm2580_vm11, %v6412_v23, 0  ;;  %v3433_v39 = vsel %vm2534_vm12, %v3432_v60, %v3430_v1  ;;  %v3924_v23 = vpack.c.bf16 %v3922_v30, %v3922_v30  ;;  %v6438_v1 = vld [vmem:[#allocation3 + $0x46c] sm:$0xff]   ;;  %v6440_v60 = vld [vmem:[#allocation3 + $0x474] ss:$0 sps:$4 sm:$0xff]   ;;  %v6462_v30 = vld [vmem:[#allocation3 + $0x80] sm:$0xff]  }
 0x30c   :  { %5939 = vmatprep.subr.bf16.mxu0 %v6601_v8  ;;  %5957 = vmatprep.subr.bf16.mxu1 %v6601_v8 }
 0x30d   :  { %5951 = vmatprep.mubr.msk.bf16.mxu0 %vm6602_vm10, %v6601_v8  ;;  %5969 = vmatprep.mubr.msk.bf16.mxu1 %vm6602_vm10, %v6601_v8 }
 0x30f   :  { %5940 = vmatpush3.bf16.msra.mxu0 %v6388_v51  ;;  %5958 = vmatpush3.bf16.msra.mxu1 %v6389_v63  ;;  %v3478_v51 = vsel %vm2580_vm11, %v6413_v59, 0  ;;  %v3306_v63 = vpack.c.b16 %v3305_v57, %v3305_v57  ;;  %v6439_v59 = vld [vmem:[#allocation3 + $0x4d4] sm:$0xff]  }
 0x310   :  { %5941 = vmatprep.subr.bf16.mxu0 %v6601_v8  ;;  %5959 = vmatprep.subr.bf16.mxu1 %v6601_v8 }
 0x313   :  { %5942 = vmatpush3.bf16.msra.mxu0 %v6390_v43  ;;  %5960 = vmatpush3.bf16.msra.mxu1 %v6391_v9  ;;  %v3434_v43 = vpack.c.b16 %v3433_v39, %v3433_v39  ;;  %v6414_v9 = vld [vmem:[#allocation3 + $0x374] sm:$0xff]  }
 0x314   :  { %5943 = vmatprep.subr.bf16.mxu0 %v6601_v8  ;;  %5961 = vmatprep.subr.bf16.mxu1 %v6601_v8 }
 0x317   :  { %5944 = vmatpush3.bf16.msra.mxu0 %v6392_v38  ;;  %5962 = vmatpush3.bf16.msra.mxu1 %v6393_v50  ;;  %v6417_v38 = vld [vmem:[#allocation3 + $0x3e4] sm:$0xff]  }
 0x318   :  { %5945 = vmatprep.subr.bf16.mxu0 %v6601_v8  ;;  %5963 = vmatprep.subr.bf16.mxu1 %v6601_v8  ;;  %v6418_v50 = vld [vmem:[#allocation3 + $0x384] sm:$0xff]  }
 0x31b   :  { %5946 = vmatpush3.bf16.msra.mxu0 %v6394_v62  ;;  %5964 = vmatpush3.bf16.msra.mxu1 %v6395_v61  ;;  %v6421_v62 = vld [vmem:[#allocation3 + $0x3f4] sm:$0xff]   ;;  %v3669_v61 = vpack.c.bf16 %v3667_v25, %v3667_v25  ;;  %v6444_v25 = vld [vmem:[#allocation3 + $0x51c] sm:$0xff]  }
 0x31c   :  { %5947 = vmatprep.subr.bf16.mxu0 %v6601_v8  ;;  %5965 = vmatprep.subr.bf16.mxu1 %v6601_v8 }
 0x31f   :  { %5948 = vmatpush3.bf16.msra.mxu0 %v6396_v36  ;;  %5966 = vmatpush3.bf16.msra.mxu1 %v6397_v17  ;;  %v3540_v36 = vpack.c.bf16 %v3538_v19, %v3538_v19  ;;  %v3687_v17 = vunpack.c.l.b16 %v3669_v61  ;;  %v4051_v19 = vld [vmem:[#allocation2 + $0x39] sm:$0x1]  ;;  %v6448_v61 = vld [vmem:[#allocation3 + $0x52c] sm:$0xff]  }
 0x320   :  { %5949 = vmatprep.subr.bf16.mxu0 %v6601_v8  ;;  %5967 = vmatprep.subr.bf16.mxu1 %v6601_v8  ;;  %v4053_v5 = vpack.c.bf16 %v4051_v19, %v4051_v19  ;;  %v6471_v19 = vld [vmem:[#allocation3 + $0x1a0] sm:$0xff]  }
 0x321   :  { %v3558_v29 = vunpack.c.l.b16 %v3540_v36  ;;  %v4050_v36 = vld [vmem:[#allocation2 + $0x19] sm:$0x1] }
 0x323   :  { %5950 = vmatpush3.bf16.msra.mxu0 %v3094_v31  ;;  %5968 = vmatpush3.bf16.msra.mxu1 %v3222_v49  ;;  %v6425_v31 = vld [vmem:[#allocation3 + $0x404] sm:$0xff]   ;;  %v3688_v49 = vrot.slane %v3687_v17, 7  ;;  %v6450_v17 = vld [vmem:[#allocation3 + $0x534] sm:$0xff]  }
 0x324   :  { %5973 = vmatprep.subr.bf16.mxu0 %v6601_v8  ;;  %5991 = vmatprep.subr.bf16.mxu1 %v6601_v8 }
 0x326   :  { %5952 = vmatmul.mubr.msk.bf16.vlgmr.msra.gmra.mrb[8].mxu0 %vm2576_vm13, %v3050_v34  ;;  %5970 = vmatmul.mubr.msk.bf16.vlgmr.msra.gmra.mrb[8].mxu1 %vm2576_vm13, %v3178_v56  ;;  %v6427_v34 = vld [vmem:[#allocation3 + $0x40c] ss:$0 sps:$4 sm:$0xff]   ;;  %v3561_v56 = vsel %vm2534_vm12, %v3560_v35, %v3558_v29  ;;  %v6451_v29 = vld [vmem:[#allocation3 + $0x20] sm:$0xff]  }
 0x327   :  { %5974 = vmatpush3.bf16.msra.mxu0 %v6400_v37  ;;  %5992 = vmatpush3.bf16.msra.mxu1 %v6401_v12  ;;  %v3606_v37 = vsel %vm2580_vm11, %v6426_v44, 0  ;;  %v3689_v12 = vsel %vm2534_vm12, %v3688_v49, %v3686_v26  ;;  %v4052_v44 = vpack.c.bf16 %v4050_v36, %v4050_v36  ;;  %v6452_v26 = vld [vmem:[#allocation3 + $0x53c] sm:$0xff]   ;;  %v6475_v36 = vld [vmem:[#allocation3 + $0x1b0] sm:$0xff]  }
 0x328   :  { %5975 = vmatprep.subr.bf16.mxu0 %v6601_v8  ;;  %5993 = vmatprep.subr.bf16.mxu1 %v6601_v8 }
 0x329   :  { %5987 = vmatprep.mubr.msk.bf16.mxu0 %vm6602_vm10, %v6601_v8  ;;  %6005 = vmatprep.mubr.msk.bf16.mxu1 %vm6602_vm10, %v6601_v8  ;;  %v4070_v49 = vunpack.c.l.b16 %v4052_v44  ;;  %v6477_v44 = vld [vmem:[#allocation3 + $0x1b8] sm:$0xff]  }
 0x32b   :  { %5976 = vmatpush3.bf16.msra.mxu0 %v6402_v14  ;;  %5994 = vmatpush3.bf16.msra.mxu1 %v6403_v40  ;;  %v3734_v14 = vsel %vm2580_vm11, %v6427_v34, 0  ;;  %v3562_v40 = vpack.c.b16 %v3561_v56, %v3561_v56  ;;  %v6453_v56 = vld [vmem:[#allocation3 + $0x28] sm:$0xff]  }
 0x32c   :  { %5977 = vmatprep.subr.bf16.mxu0 %v6601_v8  ;;  %5995 = vmatprep.subr.bf16.mxu1 %v6601_v8 }
 0x32f   :  { %5978 = vmatpush3.bf16.msra.mxu0 %v6404_v42  ;;  %5996 = vmatpush3.bf16.msra.mxu1 %v6405_v45  ;;  %v3690_v42 = vpack.c.b16 %v3689_v12, %v3689_v12  ;;  %v6428_v45 = vld [vmem:[#allocation3 + $0x444] sm:$0xff]  }
 0x330   :  { %5979 = vmatprep.subr.bf16.mxu0 %v6601_v8  ;;  %5997 = vmatprep.subr.bf16.mxu1 %v6601_v8 }
 0x333   :  { %5980 = vmatpush3.bf16.msra.mxu0 %v6406_v15  ;;  %5998 = vmatpush3.bf16.msra.mxu1 %v6407_v48  ;;  %v6431_v15 = vld [vmem:[#allocation3 + $0x4b4] sm:$0xff]  }
 0x334   :  { %5981 = vmatprep.subr.bf16.mxu0 %v6601_v8  ;;  %5999 = vmatprep.subr.bf16.mxu1 %v6601_v8  ;;  %v6432_v48 = vld [vmem:[#allocation3 + $0x454] sm:$0xff]  }
 0x337   :  { %5982 = vmatpush3.bf16.msra.mxu0 %v6408_v55  ;;  %6000 = vmatpush3.bf16.msra.mxu1 %v6409_v22  ;;  %v6435_v55 = vld [vmem:[#allocation3 + $0x4c4] sm:$0xff]   ;;  %v3794_v22 = vld [vmem:[#allocation2 + $0x15] sm:$0x1] }
 0x338   :  { %5983 = vmatprep.subr.bf16.mxu0 %v6601_v8  ;;  %6001 = vmatprep.subr.bf16.mxu1 %v6601_v8  ;;  %v3796_v46 = vpack.c.bf16 %v3794_v22, %v3794_v22  ;;  %v2753_v22 = vld [vmem:[#allocation2 + $0x24] sm:$0x1] }
 0x33a   :  { %v3814_v39 = vunpack.c.l.b16 %v3796_v46  ;;  %v2755_v46 = vpack.c.bf16 %v2753_v22, %v2753_v22 }
 0x33b   :  { %5984 = vmatpush3.bf16.msra.mxu0 %v6410_v10  ;;  %6002 = vmatpush3.bf16.msra.mxu1 %v6411_v13  ;;  %v3815_v10 = vunpack.c.l.b16 %v3797_v18  ;;  %v6437_v13 = vld [vmem:[#allocation3 + $0x4cc] sm:$0xff]   ;;  %v6461_v18 = vld [vmem:[#allocation3 + $0xe0] sm:$0xff]  }
 0x33c   :  { %5985 = vmatprep.subr.bf16.mxu0 %v6601_v8  ;;  %6003 = vmatprep.subr.bf16.mxu1 %v6601_v8 }
 0x33d   :  { %v3816_v57 = vrot.slane %v3815_v10, 7  ;;  %v6463_v10 = vld [vmem:[#allocation3 + $0xe8] sm:$0xff]  }
 0x33f   :  { %5986 = vmatpush3.bf16.msra.mxu0 %v3350_v3  ;;  %6004 = vmatpush3.bf16.msra.mxu1 %v3478_v51  ;;  %v3944_v3 = vrot.slane %v3943_v20, 7  ;;  %v3942_v51 = vunpack.c.l.b16 %v3924_v23  ;;  %v2624_v20 = vld [vmem:[#allocation2 + $0x2] sm:$0x1]  ;;  %v6464_v23 = vld [vmem:[#allocation3 + $0x88] sm:$0xff]  }
 0x340   :  { %6009 = vmatprep.subr.bf16.mxu0 %v6601_v8  ;;  %6027 = vmatprep.subr.bf16.mxu1 %v6601_v8 }
 0x342   :  { %5988 = vmatmul.mubr.msk.bf16.vlgmr.msra.gmra.mrb[12].mxu0 %vm2576_vm13, %v3306_v63  ;;  %6006 = vmatmul.mubr.msk.bf16.vlgmr.msra.gmra.mrb[12].mxu1 %vm2576_vm13, %v3434_v43  ;;  %v6441_v63 = vld [vmem:[#allocation3 + $0x4dc] ss:$0 sps:$4 sm:$0xff]   ;;  %v3862_v43 = vsel %vm2580_vm11, %v6440_v60, 0 }
 0x343   :  { %6010 = vmatpush3.bf16.msra.mxu0 %v6414_v9  ;;  %6028 = vmatpush3.bf16.msra.mxu1 %v6415_v11  ;;  %v3817_v9 = vsel %vm2534_vm12, %v3816_v57, %v3814_v39  ;;  %v3945_v11 = vsel %vm2534_vm12, %v3944_v3, %v3942_v51  ;;  %v4347_v3 = vunpack.c.l.b16 %v2755_v46  ;;  %v6466_v39 = vld [vmem:[#allocation3 + $0x90] sm:$0xff]  }
 0x344   :  { %6011 = vmatprep.subr.bf16.mxu0 %v6601_v8  ;;  %6029 = vmatprep.subr.bf16.mxu1 %v6601_v8  ;;  %v3946_v6 = vpack.c.b16 %v3945_v11, %v3945_v11 }
 0x345   :  { %6023 = vmatprep.mubr.msk.bf16.mxu0 %vm6602_vm10, %v6601_v8  ;;  %6041 = vmatprep.mubr.msk.bf16.mxu1 %vm6602_vm10, %v6601_v8 }
 0x347   :  { %6012 = vmatpush3.bf16.msra.mxu0 %v6416_v33  ;;  %6030 = vmatpush3.bf16.msra.mxu1 %v6417_v38  ;;  %v3990_v33 = vsel %vm2580_vm11, %v6441_v63, 0  ;;  %v6442_v38 = vld [vmem:[#allocation3 + $0x514] sm:$0xff]  }
 0x348   :  { %6013 = vmatprep.subr.bf16.mxu0 %v6601_v8  ;;  %6031 = vmatprep.subr.bf16.mxu1 %v6601_v8 }
 0x34b   :  { %6014 = vmatpush3.bf16.msra.mxu0 %v6418_v50  ;;  %6032 = vmatpush3.bf16.msra.mxu1 %v6419_v21  ;;  %v3818_v50 = vpack.c.b16 %v3817_v9, %v3817_v9  ;;  %v6443_v21 = vld [vmem:[#allocation3] sm:$0xff]   ;;  %v6468_v9 = vld [vmem:[#allocation3 + $0x98] ss:$0 sps:$4 sm:$0xff]  }
 0x34c   :  { %6015 = vmatprep.subr.bf16.mxu0 %v6601_v8  ;;  %6033 = vmatprep.subr.bf16.mxu1 %v6601_v8 }
 0x34f   :  { %6016 = vmatpush3.bf16.msra.mxu0 %v6420_v0  ;;  %6034 = vmatpush3.bf16.msra.mxu1 %v6421_v62  ;;  %v6445_v0 = vld [vmem:[#allocation3 + $0x8] sm:$0xff]  }
 0x350   :  { %6017 = vmatprep.subr.bf16.mxu0 %v6601_v8  ;;  %6035 = vmatprep.subr.bf16.mxu1 %v6601_v8  ;;  %v6446_v62 = vld [vmem:[#allocation3 + $0x524] sm:$0xff]  }
 0x353   :  { %6018 = vmatpush3.bf16.msra.mxu0 %v6422_v16  ;;  %6036 = vmatpush3.bf16.msra.mxu1 %v6423_v4  ;;  %v6449_v16 = vld [vmem:[#allocation3 + $0x18] sm:$0xff]   ;;  %v2494_v4 = vld [vmem:[#allocation2] sm:$0x1] }
 0x354   :  { %6019 = vmatprep.subr.bf16.mxu0 %v6601_v8  ;;  %6037 = vmatprep.subr.bf16.mxu1 %v6601_v8  ;;  %v2496_v35 = vpack.c.bf16 %v2494_v4, %v2494_v4  ;;  %v3009_v4 = vld [vmem:[#allocation2 + $0x28] sm:$0x1] }
 0x356   :  { %v4162_v12 = vunpack.c.l.b16 %v2496_v35  ;;  %v3008_v35 = vld [vmem:[#allocation2 + $0x8] sm:$0x1] }
 0x357   :  { %6020 = vmatpush3.bf16.msra.mxu0 %v6424_v32  ;;  %6038 = vmatpush3.bf16.msra.mxu1 %v6425_v31  ;;  %v4071_v32 = vunpack.c.l.b16 %v4053_v5  ;;  %v4163_v31 = vunpack.c.l.b16 %v2497_v27  ;;  %v2881_v5 = vld [vmem:[#allocation2 + $0x26] sm:$0x1]  ;;  %v6476_v27 = vld [vmem:[#allocation3 + $0x150] sm:$0xff]  }
 0x358   :  { %6021 = vmatprep.subr.bf16.mxu0 %v6601_v8  ;;  %6039 = vmatprep.subr.bf16.mxu1 %v6601_v8 }
 0x359   :  { %v4072_v34 = vrot.slane %v4071_v32, 7  ;;  %v2880_v32 = vld [vmem:[#allocation2 + $0x6] sm:$0x1] }
 0x35b   :  { %6022 = vmatpush3.bf16.msra.mxu0 %v3606_v37  ;;  %6040 = vmatpush3.bf16.msra.mxu1 %v3734_v14  ;;  %v6454_v37 = vld [vmem:[#allocation3 + $0x544] ss:$0 sps:$4 sm:$0xff]   ;;  %v4164_v14 = vrot.slane %v4163_v31, 7  ;;  %v6478_v31 = vld [vmem:[#allocation3 + $0x158] sm:$0xff]  }
 0x35c   :  { %6045 = vmatprep.subr.bf16.mxu0 %v6601_v8  ;;  %6063 = vmatprep.subr.bf16.mxu1 %v6601_v8 }
 0x35e   :  { %6024 = vmatmul.mubr.msk.bf16.vlgmr.msra.gmra.mrb[16].mxu0 %vm2576_vm13, %v3562_v40  ;;  %6042 = vmatmul.mubr.msk.bf16.vlgmr.msra.gmra.mrb[16].mxu1 %vm2576_vm13, %v3690_v42  ;;  %v6455_v40 = vld [vmem:[#allocation3 + $0x30] ss:$0 sps:$4 sm:$0xff]   ;;  %v4073_v42 = vsel %vm2534_vm12, %v4072_v34, %v4070_v49  ;;  %v6479_v34 = vld [vmem:[#allocation3 + $0x1c0] sm:$0xff]  }
 0x35f   :  { %6046 = vmatpush3.bf16.msra.mxu0 %v6428_v45  ;;  %6064 = vmatpush3.bf16.msra.mxu1 %v6429_v41  ;;  %v4118_v45 = vsel %vm2580_vm11, %v6454_v37, 0  ;;  %v4165_v41 = vsel %vm2534_vm12, %v4164_v14, %v4162_v12 }
 0x360   :  { %6047 = vmatprep.subr.bf16.mxu0 %v6601_v8  ;;  %6065 = vmatprep.subr.bf16.mxu1 %v6601_v8 }
 0x361   :  { %6059 = vmatprep.mubr.msk.bf16.mxu0 %vm6602_vm10, %v6601_v8  ;;  %6077 = vmatprep.mubr.msk.bf16.mxu1 %vm6602_vm10, %v6601_v8 }
 0x363   :  { %6048 = vmatpush3.bf16.msra.mxu0 %v6430_v7  ;;  %6066 = vmatpush3.bf16.msra.mxu1 %v6431_v15  ;;  %v4210_v7 = vsel %vm2580_vm11, %v6455_v40, 0  ;;  %v4074_v15 = vpack.c.b16 %v4073_v42, %v4073_v42 }
 0x364   :  { %6049 = vmatprep.subr.bf16.mxu0 %v6601_v8  ;;  %6067 = vmatprep.subr.bf16.mxu1 %v6601_v8 }
 0x367   :  { %6050 = vmatpush3.bf16.msra.mxu0 %v6432_v48  ;;  %6068 = vmatpush3.bf16.msra.mxu1 %v6433_v52  ;;  %v4166_v48 = vpack.c.b16 %v4165_v41, %v4165_v41  ;;  %v6458_v52 = vld [vmem:[#allocation3 + $0x70] sm:$0xff]   ;;  %v6480_v41 = vld [vmem:[#allocation3 + $0x160] sm:$0xff]  }
 0x368   :  { %6051 = vmatprep.subr.bf16.mxu0 %v6601_v8  ;;  %6069 = vmatprep.subr.bf16.mxu1 %v6601_v8 }
 0x36b   :  { %6052 = vmatpush3.bf16.msra.mxu0 %v6434_v2  ;;  %6070 = vmatpush3.bf16.msra.mxu1 %v6435_v55  ;;  %v6459_v2 = vld [vmem:[#allocation3 + $0xd8] sm:$0xff]  }
 0x36c   :  { %6053 = vmatprep.subr.bf16.mxu0 %v6601_v8  ;;  %6071 = vmatprep.subr.bf16.mxu1 %v6601_v8  ;;  %v6460_v55 = vld [vmem:[#allocation3 + $0x78] sm:$0xff]  }
 0x36f   :  { %6054 = vmatpush3.bf16.msra.mxu0 %v6436_v54  ;;  %6072 = vmatpush3.bf16.msra.mxu1 %v6437_v13  ;;  %v2627_v54 = vpack.c.bf16 %v2625_v58, %v2625_v58  ;;  %v2752_v13 = vld [vmem:[#allocation2 + $0x4] sm:$0x1]  ;;  %v6483_v58 = vld [vmem:[#allocation3 + $0x1d0] ss:$0 sps:$4 sm:$0xff]  }
 0x370   :  { %6055 = vmatprep.subr.bf16.mxu0 %v6601_v8  ;;  %6073 = vmatprep.subr.bf16.mxu1 %v6601_v8  ;;  %v2754_v57 = vpack.c.bf16 %v2752_v13, %v2752_v13  ;;  %v6484_v13 = vld [vmem:[#allocation3 + $0x208] sm:$0xff]  }
 0x371   :  { %v4255_v60 = vunpack.c.l.b16 %v2627_v54 }
 0x372   :  { %v4346_v11 = vunpack.c.l.b16 %v2754_v57  ;;  %v6489_v57 = vld [vmem:[#allocation3 + $0x280] sm:$0xff]  }
 0x373   :  { %6056 = vmatpush3.bf16.msra.mxu0 %v6438_v1  ;;  %6074 = vmatpush3.bf16.msra.mxu1 %v6439_v59  ;;  %v2626_v1 = vpack.c.bf16 %v2624_v20, %v2624_v20  ;;  %v6465_v59 = vld [vmem:[#allocation3 + $0xf0] sm:$0xff]   ;;  %v4256_v63 = vrot.slane %v4255_v60, 7  ;;  %v6487_v60 = vld [vmem:[#allocation3 + $0x278] sm:$0xff]  }
 0x374   :  { %6057 = vmatprep.subr.bf16.mxu0 %v6601_v8  ;;  %6075 = vmatprep.subr.bf16.mxu1 %v6601_v8 }
 0x375   :  { %v4254_v51 = vunpack.c.l.b16 %v2626_v1  ;;  %v6486_v1 = vld [vmem:[#allocation3 + $0x210] sm:$0xff]  }
 0x377   :  { %6058 = vmatpush3.bf16.msra.mxu0 %v3862_v43  ;;  %6076 = vmatpush3.bf16.msra.mxu1 %v3990_v33  ;;  %v6467_v43 = vld [vmem:[#allocation3 + $0xf8] sm:$0xff]   ;;  %v4348_v33 = vrot.slane %v4347_v3, 7  ;;  %v3137_v3 = vld [vmem:[#allocation2 + $0x2a] sm:$0x1] }
 0x378   :  { %6081 = vmatprep.subr.bf16.mxu0 %v6601_v8  ;;  %6099 = vmatprep.subr.bf16.mxu1 %v6601_v8 }
 0x37a   :  { %6060 = vmatmul.mubr.msk.bf16.vlgmr.msra.gmra.mrb[20].mxu0 %vm2576_vm13, %v3818_v50  ;;  %6078 = vmatmul.mubr.msk.bf16.vlgmr.msra.gmra.mrb[20].mxu1 %vm2576_vm13, %v3946_v6  ;;  %v4257_v50 = vsel %vm2534_vm12, %v4256_v63, %v4254_v51  ;;  %v4349_v6 = vsel %vm2534_vm12, %v4348_v33, %v4346_v11  ;;  %v6490_v51 = vld [vmem:[#allocation3 + $0x220] sm:$0xff]   ;;  %v3139_v63 = vpack.c.bf16 %v3137_v3, %v3137_v3  ;;  %v3264_v33 = vld [vmem:[#allocation2 + $0xc] sm:$0x1] }
 0x37b   :  { %6082 = vmatpush3.bf16.msra.mxu0 %v6442_v38  ;;  %6100 = vmatpush3.bf16.msra.mxu1 %v6443_v21  ;;  %v6469_v38 = vld [vmem:[#allocation3 + $0x100] ss:$0 sps:$4 sm:$0xff]   ;;  %v4302_v21 = vsel %vm2580_vm11, %v6468_v9, 0  ;;  %v3136_v9 = vld [vmem:[#allocation2 + $0xa] sm:$0x1] }
 0x37c   :  { %6083 = vmatprep.subr.bf16.mxu0 %v6601_v8  ;;  %6101 = vmatprep.subr.bf16.mxu1 %v6601_v8  ;;  %v6508_v3 = vld [vmem:[#allocation3 + $0x300] sm:$0xff]  }
 0x37d   :  { %6095 = vmatprep.mubr.msk.bf16.mxu0 %vm6602_vm10, %v6601_v8  ;;  %6113 = vmatprep.mubr.msk.bf16.mxu1 %vm6602_vm10, %v6601_v8 }
 0x37f   :  { %6084 = vmatpush3.bf16.msra.mxu0 %v6444_v25  ;;  %6102 = vmatpush3.bf16.msra.mxu1 %v6445_v0  ;;  %v4394_v25 = vsel %vm2580_vm11, %v6469_v38, 0  ;;  %v4258_v0 = vpack.c.b16 %v4257_v50, %v4257_v50  ;;  %v6492_v38 = vld [vmem:[#allocation3 + $0x228] sm:$0xff]   ;;  %v3138_v50 = vpack.c.bf16 %v3136_v9, %v3136_v9 }
 0x380   :  { %6085 = vmatprep.subr.bf16.mxu0 %v6601_v8  ;;  %6103 = vmatprep.subr.bf16.mxu1 %v6601_v8  ;;  %v6509_v9 = vld [vmem:[#allocation3 + $0x368] sm:$0xff]  }
 0x383   :  { %6086 = vmatpush3.bf16.msra.mxu0 %v6446_v62  ;;  %6104 = vmatpush3.bf16.msra.mxu1 %v6447_v53  ;;  %v4350_v62 = vpack.c.b16 %v4349_v6, %v4349_v6  ;;  %v6470_v53 = vld [vmem:[#allocation3 + $0x138] sm:$0xff]   ;;  %v6493_v6 = vld [vmem:[#allocation3 + $0x290] sm:$0xff]  }
 0x384   :  { %6087 = vmatprep.subr.bf16.mxu0 %v6601_v8  ;;  %6105 = vmatprep.subr.bf16.mxu1 %v6601_v8 }
 0x387   :  { %6088 = vmatpush3.bf16.msra.mxu0 %v6448_v61  ;;  %6106 = vmatpush3.bf16.msra.mxu1 %v6449_v16  ;;  %v6472_v61 = vld [vmem:[#allocation3 + $0x140] sm:$0xff]   ;;  %v6474_v16 = vld [vmem:[#allocation3 + $0x148] sm:$0xff]  }
 0x388   :  { %6089 = vmatprep.subr.bf16.mxu0 %v6601_v8  ;;  %6107 = vmatprep.subr.bf16.mxu1 %v6601_v8 }
 0x38b   :  { %6090 = vmatpush3.bf16.msra.mxu0 %v6450_v17  ;;  %6108 = vmatpush3.bf16.msra.mxu1 %v6451_v29  ;;  %v2883_v17 = vpack.c.bf16 %v2881_v5, %v2881_v5  ;;  %v3011_v29 = vpack.c.bf16 %v3009_v4, %v3009_v4 }
 0x38c   :  { %6091 = vmatprep.subr.bf16.mxu0 %v6601_v8  ;;  %6109 = vmatprep.subr.bf16.mxu1 %v6601_v8 }
 0x38d   :  { %v4439_v49 = vunpack.c.l.b16 %v2883_v17  ;;  %v4531_v37 = vunpack.c.l.b16 %v3011_v29  ;;  %v6495_v17 = vld [vmem:[#allocation3 + $0x298] sm:$0xff]  }
 0x38f   :  { %6092 = vmatpush3.bf16.msra.mxu0 %v6452_v26  ;;  %6110 = vmatpush3.bf16.msra.mxu1 %v6453_v56  ;;  %v2882_v26 = vpack.c.bf16 %v2880_v32, %v2880_v32  ;;  %v3010_v56 = vpack.c.bf16 %v3008_v35, %v3008_v35 }
 0x390   :  { %6093 = vmatprep.subr.bf16.mxu0 %v6601_v8  ;;  %6111 = vmatprep.subr.bf16.mxu1 %v6601_v8 }
 0x393   :  { %6094 = vmatpush3.bf16.msra.mxu0 %v4118_v45  ;;  %6112 = vmatpush3.bf16.msra.mxu1 %v4210_v7  ;;  %v4438_v7 = vunpack.c.l.b16 %v2882_v26 }
 0x394   :  { %6117 = vmatprep.subr.bf16.mxu0 %v6601_v8  ;;  %6135 = vmatprep.subr.bf16.mxu1 %v6601_v8 }
 0x396   :  { %6096 = vmatmul.mubr.msk.bf16.vlgmr.msra.gmra.mrb[24].mxu0 %vm2576_vm13, %v4074_v15  ;;  %6114 = vmatmul.mubr.msk.bf16.vlgmr.msra.gmra.mrb[24].mxu1 %vm2576_vm13, %v4166_v48  ;;  %v4440_v15 = vrot.slane %v4439_v49, 7 }
 0x397   :  { %6118 = vmatpush3.bf16.msra.mxu0 %v6456_v28  ;;  %6136 = vmatpush3.bf16.msra.mxu1 %v6457_v47  ;;  %v6481_v47 = vld [vmem:[#allocation3 + $0x1c8] sm:$0xff]  }
 0x398   :  { %6119 = vmatprep.subr.bf16.mxu0 %v6601_v8  ;;  %6137 = vmatprep.subr.bf16.mxu1 %v6601_v8  ;;  %v4441_v22 = vsel %vm2534_vm12, %v4440_v15, %v4438_v7  ;;  %v6501_v7 = vld [vmem:[#allocation3 + $0x348] sm:$0xff]  }
 0x399   :  { %6131 = vmatprep.mubr.msk.bf16.mxu0 %vm6602_vm10, %v6601_v8  ;;  %6149 = vmatprep.mubr.msk.bf16.mxu1 %vm6602_vm10, %v6601_v8  ;;  %v4442_v20 = vpack.c.b16 %v4441_v22, %v4441_v22  ;;  %v6502_v15 = vld [vmem:[#allocation3 + $0x2e8] sm:$0xff]   ;;  %v3520_v22 = vld [vmem:[#allocation2 + $0x10] sm:$0x1] }
 0x39b   :  { %6120 = vmatpush3.bf16.msra.mxu0 %v6458_v52  ;;  %6138 = vmatpush3.bf16.msra.mxu1 %v6459_v2  ;;  %v6482_v52 = vld [vmem:[#allocation3 + $0x168] ss:$0 sps:$4 sm:$0xff]   ;;  %v4530_v2 = vunpack.c.l.b16 %v3010_v56 }
 0x39c   :  { %6121 = vmatprep.subr.bf16.mxu0 %v6601_v8  ;;  %6139 = vmatprep.subr.bf16.mxu1 %v6601_v8 }
 0x39f   :  { %6122 = vmatpush3.bf16.msra.mxu0 %v6460_v55  ;;  %6140 = vmatpush3.bf16.msra.mxu1 %v6461_v18  ;;  %v4532_v55 = vrot.slane %v4531_v37, 7 }
 0x3a0   :  { %6123 = vmatprep.subr.bf16.mxu0 %v6601_v8  ;;  %6141 = vmatprep.subr.bf16.mxu1 %v6601_v8 }
 0x3a1   :  { %v4533_v54 = vsel %vm2534_vm12, %v4532_v55, %v4530_v2  ;;  %v6505_v55 = vld [vmem:[#allocation3 + $0x358] sm:$0xff]  }
 0x3a2   :  { %v4534_v46 = vpack.c.b16 %v4533_v54, %v4533_v54 }
 0x3a3   :  { %6124 = vmatpush3.bf16.msra.mxu0 %v6462_v30  ;;  %6142 = vmatpush3.bf16.msra.mxu1 %v6463_v10  ;;  %v4486_v30 = vsel %vm2580_vm11, %v6482_v52, 0  ;;  %v4578_v10 = vsel %vm2580_vm11, %v6483_v58, 0  ;;  %v6504_v52 = vld [vmem:[#allocation3 + $0x2f0] sm:$0xff]  }
 0x3a4   :  { %6125 = vmatprep.subr.bf16.mxu0 %v6601_v8  ;;  %6143 = vmatprep.subr.bf16.mxu1 %v6601_v8 }
 0x3a7   :  { %6126 = vmatpush3.bf16.msra.mxu0 %v6464_v23  ;;  %6144 = vmatpush3.bf16.msra.mxu1 %v6465_v59  ;;  %v6485_v23 = vld [vmem:[#allocation3 + $0x270] sm:$0xff]   ;;  %v6488_v59 = vld [vmem:[#allocation3 + $0x218] sm:$0xff]  }
 0x3a8   :  { %6127 = vmatprep.subr.bf16.mxu0 %v6601_v8  ;;  %6145 = vmatprep.subr.bf16.mxu1 %v6601_v8 }
 0x3ab   :  { %6128 = vmatpush3.bf16.msra.mxu0 %v6466_v39  ;;  %6146 = vmatpush3.bf16.msra.mxu1 %v6467_v43  ;;  %v3265_v39 = vld [vmem:[#allocation2 + $0x2c] sm:$0x1] }
 0x3ac   :  { %6129 = vmatprep.subr.bf16.mxu0 %v6601_v8  ;;  %6147 = vmatprep.subr.bf16.mxu1 %v6601_v8  ;;  %v6491_v43 = vld [vmem:[#allocation3 + $0x288] sm:$0xff]   ;;  %v3267_v11 = vpack.c.bf16 %v3265_v39, %v3265_v39 }
 0x3af   :  { %6130 = vmatpush3.bf16.msra.mxu0 %v4302_v21  ;;  %6148 = vmatpush3.bf16.msra.mxu1 %v4394_v25  ;;  %v4623_v21 = vunpack.c.l.b16 %v3139_v63  ;;  %v3266_v25 = vpack.c.bf16 %v3264_v33, %v3264_v33 }
 0x3b0   :  { %6153 = vmatprep.subr.bf16.mxu0 %v6601_v8  ;;  %6171 = vmatprep.subr.bf16.mxu1 %v6601_v8 }
 0x3b1   :  { %v4624_v5 = vrot.slane %v4623_v21, 7  ;;  %v4714_v32 = vunpack.c.l.b16 %v3266_v25  ;;  %v6511_v21 = vld [vmem:[#allocation3 + $0x370] ss:$0 sps:$4 sm:$0xff]  }
 0x3b2   :  { %6132 = vmatmul.mubr.msk.bf16.vlgmr.msra.gmra.mrb[28].mxu0 %vm2576_vm13, %v4258_v0  ;;  %6150 = vmatmul.mubr.msk.bf16.vlgmr.msra.gmra.mrb[28].mxu1 %vm2576_vm13, %v4350_v62  ;;  %v4715_v0 = vunpack.c.l.b16 %v3267_v11  ;;  %v6510_v11 = vld [vmem:[#allocation3 + $0x308] ss:$0 sps:$4 sm:$0xff]  }
 0x3b3   :  { %6154 = vmatpush3.bf16.msra.mxu0 %v6470_v53  ;;  %6172 = vmatpush3.bf16.msra.mxu1 %v6471_v19  ;;  %v4854_v25 = vsel %vm2580_vm11, %v6510_v11, 0  ;;  %v6530_v11 = vld [vmem:[#allocation3 + $0x488] sm:$0xff]  }
 0x3b4   :  { %6155 = vmatprep.subr.bf16.mxu0 %v6601_v8  ;;  %6173 = vmatprep.subr.bf16.mxu1 %v6601_v8  ;;  %v4716_v29 = vrot.slane %v4715_v0, 7 }
 0x3b5   :  { %6167 = vmatprep.mubr.msk.bf16.mxu0 %vm6602_vm10, %v6601_v8  ;;  %6185 = vmatprep.mubr.msk.bf16.mxu1 %vm6602_vm10, %v6601_v8 }
 0x3b7   :  { %6156 = vmatpush3.bf16.msra.mxu0 %v6472_v61  ;;  %6174 = vmatpush3.bf16.msra.mxu1 %v6473_v24 }
 0x3b8   :  { %6157 = vmatprep.subr.bf16.mxu0 %v6601_v8  ;;  %6175 = vmatprep.subr.bf16.mxu1 %v6601_v8 }
 0x3bb   :  { %6158 = vmatpush3.bf16.msra.mxu0 %v6474_v16  ;;  %6176 = vmatpush3.bf16.msra.mxu1 %v6475_v36  ;;  %v6494_v16 = vld [vmem:[#allocation3 + $0x230] sm:$0xff]   ;;  %v4622_v36 = vunpack.c.l.b16 %v3138_v50 }
 0x3bc   :  { %6159 = vmatprep.subr.bf16.mxu0 %v6601_v8  ;;  %6177 = vmatprep.subr.bf16.mxu1 %v6601_v8 }
 0x3bd   :  { %v4625_v26 = vsel %vm2534_vm12, %v4624_v5, %v4622_v36  ;;  %v6513_v36 = vld [vmem:[#allocation3 + $0x410] sm:$0xff]  }
 0x3be   :  { %v4626_v37 = vpack.c.b16 %v4625_v26, %v4625_v26  ;;  %v6514_v5 = vld [vmem:[#allocation3 + $0x3b0] sm:$0xff]  }
 0x3bf   :  { %6160 = vmatpush3.bf16.msra.mxu0 %v6476_v27  ;;  %6178 = vmatpush3.bf16.msra.mxu1 %v6477_v44  ;;  %v6496_v44 = vld [vmem:[#allocation3 + $0x238] ss:$0 sps:$4 sm:$0xff]   ;;  %v3648_v26 = vld [vmem:[#allocation2 + $0x12] sm:$0x1] }
 0x3c0   :  { %6161 = vmatprep.subr.bf16.mxu0 %v6601_v8  ;;  %6179 = vmatprep.subr.bf16.mxu1 %v6601_v8  ;;  %v4670_v49 = vsel %vm2580_vm11, %v6496_v44, 0  ;;  %v3649_v44 = vld [vmem:[#allocation2 + $0x32] sm:$0x1] }
 0x3c1   :  { %v8981_v12 = vpop.f32.mrb[0].mxu0  ;;  %v8984_v40 = vpop.f32.mrb[0].mxu1 }
 0x3c2   :  { %v5881_v14 = vpop.f32.mrb[1].mxu0  ;;  %v5899_v45 = vpop.f32.mrb[1].mxu1 }
 0x3c3   :  { %v2621_v42 = vpop.f32.mrb[2].mxu0  ;;  %6162 = vmatpush3.bf16.msra.mxu0 %v6478_v31  ;;  %6180 = vmatpush3.bf16.msra.mxu1 %v6479_v34  ;;  %v2749_v28 = vpop.f32.mrb[2].mxu1  ;;  %v6497_v31 = vld [vmem:[#allocation3 + $0x2a0] ss:$0 sps:$4 sm:$0xff]   ;;  %v4717_v34 = vsel %vm2534_vm12, %v4716_v29, %v4714_v32  ;;  %v3777_v32 = vld [vmem:[#allocation2 + $0x34] sm:$0x1] }
 0x3c4   :  { %v5882_v48 = vpop.f32.mrb[3].mxu0  ;;  %6163 = vmatprep.subr.bf16.mxu0 %v6601_v8  ;;  %v5900_v18 = vpop.f32.mrb[3].mxu1  ;;  %6181 = vmatprep.subr.bf16.mxu1 %v6601_v8  ;;  %v4762_v56 = vsel %vm2580_vm11, %v6497_v31, 0  ;;  %v4718_v14 = vpack.c.b16 %v4717_v34, %v4717_v34  ;;  %v6498_v42 = vld [vmem:[#allocation3 + $0x2d8] sm:$0xff]   ;;  %v6499_v45 = vld [vmem:[#allocation3 + $0x340] sm:$0xff]   ;;  %v6519_v31 = vld [vmem:[#allocation3 + $0x428] sm:$0xff]  }
 0x3c5   :  { %v6503_v48 = vld [vmem:[#allocation3 + $0x350] sm:$0xff]   ;;  %v3393_v28 = vld [vmem:[#allocation2 + $0x2e] sm:$0x1]  ;;  %v6518_v29 = vld [vmem:[#allocation3 + $0x3c0] sm:$0xff]  }
 0x3c6   :  { %v3395_v2 = vpack.c.bf16 %v3393_v28, %v3393_v28  ;;  %v3392_v18 = vld [vmem:[#allocation2 + $0xe] sm:$0x1]  ;;  %v3776_v34 = vld [vmem:[#allocation2 + $0x14] sm:$0x1] }
 0x3c7   :  { %6164 = vmatpush3.bf16.msra.mxu0 %v6480_v41  ;;  %6182 = vmatpush3.bf16.msra.mxu1 %v6481_v47  ;;  %v6500_v41 = vld [vmem:[#allocation3 + $0x2e0] sm:$0xff]   ;;  %v3521_v47 = vld [vmem:[#allocation2 + $0x30] sm:$0x1]  ;;  %v3394_v54 = vpack.c.bf16 %v3392_v18, %v3392_v18 }
 0x3c8   :  { %6165 = vmatprep.subr.bf16.mxu0 %v6601_v8  ;;  %6183 = vmatprep.subr.bf16.mxu1 %v6601_v8  ;;  %v3523_v58 = vpack.c.bf16 %v3521_v47, %v3521_v47 }
 0x3c9   :  { %v4806_v39 = vunpack.c.l.b16 %v3394_v54 }
 0x3cb   :  { %6166 = vmatpush3.bf16.msra.mxu0 %v4486_v30  ;;  %6184 = vmatpush3.bf16.msra.mxu1 %v4578_v10  ;;  %v6506_v30 = vld [vmem:[#allocation3 + $0x2f8] sm:$0xff]   ;;  %v4807_v10 = vunpack.c.l.b16 %v3395_v2 }
 0x3cc   :  { %6189 = vmatprep.subr.bf16.mxu0 %v6601_v8  ;;  %6207 = vmatprep.subr.bf16.mxu1 %v6601_v8 }
 0x3ce   :  { %6168 = vmatmul.mubr.msk.bf16.vlgmr.msra.gmra.mrb[32].mxu0 %vm2576_vm13, %v4442_v20  ;;  %6186 = vmatmul.mubr.msk.bf16.vlgmr.msra.gmra.mrb[32].mxu1 %vm2576_vm13, %v4534_v46  ;;  %v6507_v20 = vld [vmem:[#allocation3 + $0x360] sm:$0xff]   ;;  %v3522_v46 = vpack.c.bf16 %v3520_v22, %v3520_v22  ;;  %v6523_v22 = vld [vmem:[#allocation3 + $0x438] sm:$0xff]  }
 0x3cf   :  { %6190 = vmatpush3.bf16.msra.mxu0 %v6484_v13  ;;  %6208 = vmatpush3.bf16.msra.mxu1 %v6485_v23  ;;  %v4899_v13 = vunpack.c.l.b16 %v3523_v58 }
 0x3d0   :  { %6191 = vmatprep.subr.bf16.mxu0 %v6601_v8  ;;  %6209 = vmatprep.subr.bf16.mxu1 %v6601_v8  ;;  %v4898_v33 = vunpack.c.l.b16 %v3522_v46  ;;  %v6525_v46 = vld [vmem:[#allocation3 + $0x440] ss:$0 sps:$4 sm:$0xff]  }
 0x3d1   :  { %6203 = vmatprep.mubr.msk.bf16.mxu0 %vm6602_vm10, %v6601_v8  ;;  %6221 = vmatprep.mubr.msk.bf16.mxu1 %vm6602_vm10, %v6601_v8 }
 0x3d3   :  { %6192 = vmatpush3.bf16.msra.mxu0 %v6486_v1  ;;  %6210 = vmatpush3.bf16.msra.mxu1 %v6487_v60 }
 0x3d4   :  { %6193 = vmatprep.subr.bf16.mxu0 %v6601_v8  ;;  %6211 = vmatprep.subr.bf16.mxu1 %v6601_v8 }
 0x3d7   :  { %6194 = vmatpush3.bf16.msra.mxu0 %v6488_v59  ;;  %6212 = vmatpush3.bf16.msra.mxu1 %v6489_v57 }
 0x3d8   :  { %6195 = vmatprep.subr.bf16.mxu0 %v6601_v8  ;;  %6213 = vmatprep.subr.bf16.mxu1 %v6601_v8 }
 0x3db   :  { %6196 = vmatpush3.bf16.msra.mxu0 %v6490_v51  ;;  %6214 = vmatpush3.bf16.msra.mxu1 %v6491_v43  ;;  %v4808_v51 = vrot.slane %v4807_v10, 7 }
 0x3dc   :  { %6197 = vmatprep.subr.bf16.mxu0 %v6601_v8  ;;  %6215 = vmatprep.subr.bf16.mxu1 %v6601_v8 }
 0x3dd   :  { %v9009_v62 = vpop.f32.mrb[4].mxu0  ;;  %v9012_v19 = vpop.f32.mrb[4].mxu1 }
 0x3de   :  { %v5917_v53 = vpop.f32.mrb[5].mxu0  ;;  %v5935_v24 = vpop.f32.mrb[5].mxu1 }
 0x3df   :  { %v2877_v61 = vpop.f32.mrb[6].mxu0  ;;  %6198 = vmatpush3.bf16.msra.mxu0 %v6492_v38  ;;  %6216 = vmatpush3.bf16.msra.mxu1 %v6493_v6  ;;  %v3005_v27 = vpop.f32.mrb[6].mxu1  ;;  %v4900_v38 = vrot.slane %v4899_v13, 7  ;;  %v4809_v6 = vsel %vm2534_vm12, %v4808_v51, %v4806_v39  ;;  %v4946_v53 = vsel %vm2580_vm11, %v6511_v21, 0  ;;  %v6526_v51 = vld [vmem:[#allocation3 + $0x478] sm:$0xff]   ;;  %v6532_v21 = vld [vmem:[#allocation3 + $0x490] sm:$0xff]  }
 0x3e0   :  { %v5918_v4 = vpop.f32.mrb[7].mxu0  ;;  %6199 = vmatprep.subr.bf16.mxu0 %v6601_v8  ;;  %v5936_v35 = vpop.f32.mrb[7].mxu1  ;;  %6217 = vmatprep.subr.bf16.mxu1 %v6601_v8  ;;  %v4810_v61 = vpack.c.b16 %v4809_v6, %v4809_v6  ;;  %v6516_v27 = vld [vmem:[#allocation3 + $0x3b8] sm:$0xff]  }
 0x3e1   :  { %v4901_v0 = vsel %vm2534_vm12, %v4900_v38, %v4898_v33  ;;  %v6515_v4 = vld [vmem:[#allocation3 + $0x418] sm:$0xff]   ;;  %v3651_v35 = vpack.c.bf16 %v3649_v44, %v3649_v44  ;;  %v6531_v33 = vld [vmem:[#allocation3 + $0x4f0] sm:$0xff]  }
 0x3e2   :  { %v4902_v24 = vpack.c.b16 %v4901_v0, %v4901_v0  ;;  %v3905_v38 = vld [vmem:[#allocation2 + $0x36] sm:$0x1] }
 0x3e3   :  { %6200 = vmatpush3.bf16.msra.mxu0 %v6494_v16  ;;  %6218 = vmatpush3.bf16.msra.mxu1 %v6495_v17  ;;  %v6512_v16 = vld [vmem:[#allocation3 + $0x3a8] sm:$0xff]   ;;  %v6517_v17 = vld [vmem:[#allocation3 + $0x420] sm:$0xff]   ;;  %v3907_v6 = vpack.c.bf16 %v3905_v38, %v3905_v38  ;;  %v3904_v0 = vld [vmem:[#allocation2 + $0x16] sm:$0x1] }
 0x3e4   :  { %6201 = vmatprep.subr.bf16.mxu0 %v6601_v8  ;;  %6219 = vmatprep.subr.bf16.mxu1 %v6601_v8 }
 0x3e7   :  { %6202 = vmatpush3.bf16.msra.mxu0 %v4670_v49  ;;  %6220 = vmatpush3.bf16.msra.mxu1 %v4762_v56  ;;  %v3779_v49 = vpack.c.bf16 %v3777_v32, %v3777_v32  ;;  %v6520_v56 = vld [vmem:[#allocation3 + $0x3c8] sm:$0xff]  }
 0x3e8   :  { %6225 = vmatprep.subr.bf16.mxu0 %v6601_v8  ;;  %6243 = vmatprep.subr.bf16.mxu1 %v6601_v8 }
 0x3ea   :  { %6204 = vmatmul.mubr.msk.bf16.vlgmr.msra.gmra.mrb[36].mxu0 %vm2576_vm13, %v4626_v37  ;;  %6222 = vmatmul.mubr.msk.bf16.vlgmr.msra.gmra.mrb[36].mxu1 %vm2576_vm13, %v4718_v14  ;;  %v3650_v37 = vpack.c.bf16 %v3648_v26, %v3648_v26  ;;  %v4991_v14 = vunpack.c.l.b16 %v3651_v35 }
 0x3eb   :  { %6226 = vmatpush3.bf16.msra.mxu0 %v6498_v42  ;;  %6244 = vmatpush3.bf16.msra.mxu1 %v6499_v45  ;;  %v6521_v42 = vld [vmem:[#allocation3 + $0x430] sm:$0xff]   ;;  %v3778_v45 = vpack.c.bf16 %v3776_v34, %v3776_v34 }
 0x3ec   :  { %6227 = vmatprep.subr.bf16.mxu0 %v6601_v8  ;;  %6245 = vmatprep.subr.bf16.mxu1 %v6601_v8  ;;  %v4990_v2 = vunpack.c.l.b16 %v3650_v37  ;;  %v6537_v37 = vld [vmem:[#allocation3 + $0x508] sm:$0xff]  }
 0x3ed   :  { %6239 = vmatprep.mubr.msk.bf16.mxu0 %vm6602_vm10, %v6601_v8  ;;  %6257 = vmatprep.mubr.msk.bf16.mxu1 %vm6602_vm10, %v6601_v8  ;;  %v5082_v54 = vunpack.c.l.b16 %v3778_v45 }
 0x3ef   :  { %6228 = vmatpush3.bf16.msra.mxu0 %v6500_v41  ;;  %6246 = vmatpush3.bf16.msra.mxu1 %v6501_v7  ;;  %v5083_v41 = vunpack.c.l.b16 %v3779_v49 }
 0x3f0   :  { %6229 = vmatprep.subr.bf16.mxu0 %v6601_v8  ;;  %6247 = vmatprep.subr.bf16.mxu1 %v6601_v8 }
 0x3f1   :  { %v5084_v10 = vrot.slane %v5083_v41, 7 }
 0x3f3   :  { %6230 = vmatpush3.bf16.msra.mxu0 %v6502_v15  ;;  %6248 = vmatpush3.bf16.msra.mxu1 %v6503_v48 }
 0x3f4   :  { %6231 = vmatprep.subr.bf16.mxu0 %v6601_v8  ;;  %6249 = vmatprep.subr.bf16.mxu1 %v6601_v8 }
 0x3f7   :  { %6232 = vmatpush3.bf16.msra.mxu0 %v6504_v52  ;;  %6250 = vmatpush3.bf16.msra.mxu1 %v6505_v55  ;;  %v6522_v52 = vld [vmem:[#allocation3 + $0x3d0] sm:$0xff]   ;;  %v4992_v55 = vrot.slane %v4991_v14, 7  ;;  %v6538_v14 = vld [vmem:[#allocation3 + $0x4a8] ss:$0 sps:$4 sm:$0xff]  }
 0x3f8   :  { %6233 = vmatprep.subr.bf16.mxu0 %v6601_v8  ;;  %6251 = vmatprep.subr.bf16.mxu1 %v6601_v8 }
 0x3f9   :  { %v9037_v23 = vpop.f32.mrb[8].mxu0  ;;  %v9040_v60 = vpop.f32.mrb[8].mxu1  ;;  %v4993_v13 = vsel %vm2534_vm12, %v4992_v55, %v4990_v2 }
 0x3fa   :  { %v5953_v1 = vpop.f32.mrb[9].mxu0  ;;  %v5971_v57 = vpop.f32.mrb[9].mxu1 }
 0x3fb   :  { %v3133_v59 = vpop.f32.mrb[10].mxu0  ;;  %6234 = vmatpush3.bf16.msra.mxu0 %v6506_v30  ;;  %6252 = vmatpush3.bf16.msra.mxu1 %v6507_v20  ;;  %v3261_v43 = vpop.f32.mrb[10].mxu1  ;;  %v6524_v30 = vld [vmem:[#allocation3 + $0x3d8] ss:$0 sps:$4 sm:$0xff]   ;;  %v5130_v57 = vsel %vm2580_vm11, %v6525_v46, 0 }
 0x3fc   :  { %v5954_v63 = vpop.f32.mrb[11].mxu0  ;;  %6235 = vmatprep.subr.bf16.mxu0 %v6601_v8  ;;  %v5972_v50 = vpop.f32.mrb[11].mxu1  ;;  %6253 = vmatprep.subr.bf16.mxu1 %v6601_v8  ;;  %v5038_v1 = vsel %vm2580_vm11, %v6524_v30, 0  ;;  %v5085_v59 = vsel %vm2534_vm12, %v5084_v10, %v5082_v54  ;;  %v6528_v43 = vld [vmem:[#allocation3 + $0x480] sm:$0xff]  }
 0x3fd   :  { %v5086_v39 = vpack.c.b16 %v5085_v59, %v5085_v59  ;;  %v6527_v63 = vld [vmem:[#allocation3 + $0x4e0] sm:$0xff]   ;;  %v4033_v50 = vld [vmem:[#allocation2 + $0x38] sm:$0x1] }
 0x3ff   :  { %6236 = vmatpush3.bf16.msra.mxu0 %v6508_v3  ;;  %6254 = vmatpush3.bf16.msra.mxu1 %v6509_v9  ;;  %v4994_v3 = vpack.c.b16 %v4993_v13, %v4993_v13  ;;  %v6529_v9 = vld [vmem:[#allocation3 + $0x4e8] sm:$0xff]  }
 0x400   :  { %6237 = vmatprep.subr.bf16.mxu0 %v6601_v8  ;;  %6255 = vmatprep.subr.bf16.mxu1 %v6601_v8 }
 0x403   :  { %6238 = vmatpush3.bf16.msra.mxu0 %v4854_v25  ;;  %6256 = vmatpush3.bf16.msra.mxu1 %v4946_v53  ;;  %v6533_v25 = vld [vmem:[#allocation3 + $0x4f8] sm:$0xff]   ;;  %v4035_v53 = vpack.c.bf16 %v4033_v50, %v4033_v50 }
 0x404   :  { %6261 = vmatprep.subr.bf16.mxu0 %v6601_v8  ;;  %6279 = vmatprep.subr.bf16.mxu1 %v6601_v8 }
 0x406   :  { %6240 = vmatmul.mubr.msk.bf16.vlgmr.msra.gmra.mrb[40].mxu0 %vm2576_vm13, %v4810_v61  ;;  %6258 = vmatmul.mubr.msk.bf16.vlgmr.msra.gmra.mrb[40].mxu1 %vm2576_vm13, %v4902_v24  ;;  %v4032_v61 = vld [vmem:[#allocation2 + $0x18] sm:$0x1] }
 0x407   :  { %6262 = vmatpush3.bf16.msra.mxu0 %v6512_v16  ;;  %6280 = vmatpush3.bf16.msra.mxu1 %v6513_v36  ;;  %v6534_v24 = vld [vmem:[#allocation3 + $0x498] sm:$0xff]   ;;  %v3906_v16 = vpack.c.bf16 %v3904_v0, %v3904_v0  ;;  %v5175_v36 = vunpack.c.l.b16 %v3907_v6 }
 0x408   :  { %6263 = vmatprep.subr.bf16.mxu0 %v6601_v8  ;;  %6281 = vmatprep.subr.bf16.mxu1 %v6601_v8 }
 0x409   :  { %6275 = vmatprep.mubr.msk.bf16.mxu0 %vm6602_vm10, %v6601_v8  ;;  %6293 = vmatprep.mubr.msk.bf16.mxu1 %vm6602_vm10, %v6601_v8  ;;  %v5174_v26 = vunpack.c.l.b16 %v3906_v16  ;;  %v5176_v49 = vrot.slane %v5175_v36, 7 }
 0x40b   :  { %6264 = vmatpush3.bf16.msra.mxu0 %v6514_v5  ;;  %6282 = vmatpush3.bf16.msra.mxu1 %v6515_v4  ;;  %v6535_v5 = vld [vmem:[#allocation3 + $0x500] sm:$0xff]   ;;  %v4034_v4 = vpack.c.bf16 %v4032_v61, %v4032_v61 }
 0x40c   :  { %6265 = vmatprep.subr.bf16.mxu0 %v6601_v8  ;;  %6283 = vmatprep.subr.bf16.mxu1 %v6601_v8 }
 0x40f   :  { %6266 = vmatpush3.bf16.msra.mxu0 %v6516_v27  ;;  %6284 = vmatpush3.bf16.msra.mxu1 %v6517_v17  ;;  %v5267_v27 = vunpack.c.l.b16 %v4035_v53 }
 0x410   :  { %6267 = vmatprep.subr.bf16.mxu0 %v6601_v8  ;;  %6285 = vmatprep.subr.bf16.mxu1 %v6601_v8 }
 0x411   :  { %v5268_v45 = vrot.slane %v5267_v27, 7 }
 0x413   :  { %6268 = vmatpush3.bf16.msra.mxu0 %v6518_v29  ;;  %6286 = vmatpush3.bf16.msra.mxu1 %v6519_v31  ;;  %v6536_v31 = vld [vmem:[#allocation3 + $0x4a0] sm:$0xff]  }
 0x414   :  { %6269 = vmatprep.subr.bf16.mxu0 %v6601_v8  ;;  %6287 = vmatprep.subr.bf16.mxu1 %v6601_v8 }
 0x415   :  { %v9065_v7 = vpop.f32.mrb[12].mxu0  ;;  %v9068_v48 = vpop.f32.mrb[12].mxu1 }
 0x416   :  { %v5989_v15 = vpop.f32.mrb[13].mxu0  ;;  %v6007_v47 = vpop.f32.mrb[13].mxu1 }
 0x417   :  { %v3389_v28 = vpop.f32.mrb[14].mxu0  ;;  %6270 = vmatpush3.bf16.msra.mxu0 %v6520_v56  ;;  %6288 = vmatpush3.bf16.msra.mxu1 %v6521_v42  ;;  %v3517_v58 = vpop.f32.mrb[14].mxu1  ;;  %v5266_v42 = vunpack.c.l.b16 %v4034_v4  ;;  %v6539_v15 = vld [vmem:[#allocation3 + $0x510] ss:$0 sps:$4 sm:$0xff]   ;;  %v5222_v47 = vsel %vm2580_vm11, %v6538_v14, 0 }
 0x418   :  { %v5990_v18 = vpop.f32.mrb[15].mxu0  ;;  %6271 = vmatprep.subr.bf16.mxu0 %v6601_v8  ;;  %v6008_v20 = vpop.f32.mrb[15].mxu1  ;;  %6289 = vmatprep.subr.bf16.mxu1 %v6601_v8  ;;  %v5177_v28 = vsel %vm2534_vm12, %v5176_v49, %v5174_v26  ;;  %v5314_v2 = vsel %vm2580_vm11, %v6539_v15, 0 }
 0x419   :  { %v5178_v55 = vpack.c.b16 %v5177_v28, %v5177_v28 }
 0x41b   :  { %6272 = vmatpush3.bf16.msra.mxu0 %v6522_v52  ;;  %6290 = vmatpush3.bf16.msra.mxu1 %v6523_v22  ;;  %v5269_v52 = vsel %vm2534_vm12, %v5268_v45, %v5266_v42 }
 0x41c   :  { %6273 = vmatprep.subr.bf16.mxu0 %v6601_v8  ;;  %6291 = vmatprep.subr.bf16.mxu1 %v6601_v8  ;;  %v5270_v18 = vpack.c.b16 %v5269_v52, %v5269_v52 }
 0x41f   :  { %6274 = vmatpush3.bf16.msra.mxu0 %v5038_v1  ;;  %6292 = vmatpush3.bf16.msra.mxu1 %v5130_v57 }
 0x420   :  { %6297 = vmatprep.subr.bf16.mxu0 %v6601_v8  ;;  %6315 = vmatprep.subr.bf16.mxu1 %v6601_v8 }
 0x422   :  { %6276 = vmatmul.mubr.msk.bf16.vlgmr.msra.gmra.mrb[44].mxu0 %vm2576_vm13, %v4994_v3  ;;  %6294 = vmatmul.mubr.msk.bf16.vlgmr.msra.gmra.mrb[44].mxu1 %vm2576_vm13, %v5086_v39 }
 0x423   :  { %6298 = vmatpush3.bf16.msra.mxu0 %v6526_v51  ;;  %6316 = vmatpush3.bf16.msra.mxu1 %v6527_v63 }
 0x424   :  { %6299 = vmatprep.subr.bf16.mxu0 %v6601_v8  ;;  %6317 = vmatprep.subr.bf16.mxu1 %v6601_v8 }
 0x425   :  { %6311 = vmatprep.mubr.msk.bf16.mxu0 %vm6602_vm10, %v6601_v8  ;;  %6329 = vmatprep.mubr.msk.bf16.mxu1 %vm6602_vm10, %v6601_v8 }
 0x427   :  { %6300 = vmatpush3.bf16.msra.mxu0 %v6528_v43  ;;  %6318 = vmatpush3.bf16.msra.mxu1 %v6529_v9 }
 0x428   :  { %6301 = vmatprep.subr.bf16.mxu0 %v6601_v8  ;;  %6319 = vmatprep.subr.bf16.mxu1 %v6601_v8 }
 0x42b   :  { %6302 = vmatpush3.bf16.msra.mxu0 %v6530_v11  ;;  %6320 = vmatpush3.bf16.msra.mxu1 %v6531_v33 }
 0x42c   :  { %6303 = vmatprep.subr.bf16.mxu0 %v6601_v8  ;;  %6321 = vmatprep.subr.bf16.mxu1 %v6601_v8 }
 0x42f   :  { %6304 = vmatpush3.bf16.msra.mxu0 %v6532_v21  ;;  %6322 = vmatpush3.bf16.msra.mxu1 %v6533_v25 }
 0x430   :  { %6305 = vmatprep.subr.bf16.mxu0 %v6601_v8  ;;  %6323 = vmatprep.subr.bf16.mxu1 %v6601_v8 }
 0x431   :  { %v9093_v17 = vpop.f32.mrb[16].mxu0  ;;  %v9096_v32 = vpop.f32.mrb[16].mxu1 }
 0x432   :  { %v6025_v44 = vpop.f32.mrb[17].mxu0  ;;  %v6043_v35 = vpop.f32.mrb[17].mxu1 }
 0x433   :  { %v3645_v29 = vpop.f32.mrb[18].mxu0  ;;  %6306 = vmatpush3.bf16.msra.mxu0 %v6534_v24  ;;  %6324 = vmatpush3.bf16.msra.mxu1 %v6535_v5  ;;  %v3773_v56 = vpop.f32.mrb[18].mxu1 }
 0x434   :  { %v6026_v34 = vpop.f32.mrb[19].mxu0  ;;  %6307 = vmatprep.subr.bf16.mxu0 %v6601_v8  ;;  %v6044_v41 = vpop.f32.mrb[19].mxu1  ;;  %6325 = vmatprep.subr.bf16.mxu1 %v6601_v8 }
 0x437   :  { %6308 = vmatpush3.bf16.msra.mxu0 %v6536_v31  ;;  %6326 = vmatpush3.bf16.msra.mxu1 %v6537_v37 }
 0x438   :  { %6309 = vmatprep.subr.bf16.mxu0 %v6601_v8  ;;  %6327 = vmatprep.subr.bf16.mxu1 %v6601_v8 }
 0x43b   :  { %6310 = vmatpush3.bf16.msra.mxu0 %v5222_v47  ;;  %6328 = vmatpush3.bf16.msra.mxu1 %v5314_v2 }
 0x43e   :  { %6312 = vmatmul.mubr.msk.bf16.vlgmr.msra.gmra.mrb[48].mxu0 %vm2576_vm13, %v5178_v55  ;;  %6330 = vmatmul.mubr.msk.bf16.vlgmr.msra.gmra.mrb[48].mxu1 %vm2576_vm13, %v5270_v18 }
 0x44d   :  { %v9108_v58 = vpop.f32.mrb[20].mxu0  ;;  %v9110_v30 = vpop.f32.mrb[20].mxu1 }
 0x44e   :  { %v6061_v22 = vpop.f32.mrb[21].mxu0  ;;  %v6079_v10 = vpop.f32.mrb[21].mxu1 }
 0x44f   :  { %v3901_v54 = vpop.f32.mrb[22].mxu0  ;;  %v4029_v46 = vpop.f32.mrb[22].mxu1 }
 0x450   :  { %v6062_v20 = vpop.f32.mrb[23].mxu0  ;;  %v6080_v8 = vpop.f32.mrb[23].mxu1 }
 0x469   :  { %v9112_v13 = vpop.f32.mrb[24].mxu0  ;;  %v4246_v1 = vpop.f32.mrb[24].mxu1 }
 0x46a   :  { %v6097_v59 = vpop.f32.mrb[25].mxu0  ;;  %v4247_v57 = vadd.f32 %v4246_v1, %v8981_v12  ;;  %v6115_v39 = vpop.f32.mrb[25].mxu1 }
 0x46b   :  { %v4157_v3 = vpop.f32.mrb[26].mxu0  ;;  %v4249_v63 = vpop.f32.mrb[26].mxu1 }
 0x46c   :  { %v6098_v51 = vpop.f32.mrb[27].mxu0  ;;  %v6116_v43 = vpop.f32.mrb[27].mxu1 }
 0x485   :  { %v4338_v9 = vpop.f32.mrb[28].mxu0  ;;  %v4430_v33 = vpop.f32.mrb[28].mxu1 }
 0x486   :  { %v4339_v11 = vadd.f32 %v4338_v9, %v8984_v40  ;;  %v6133_v38 = vpop.f32.mrb[29].mxu0  ;;  %v4431_v50 = vadd.f32 %v4430_v33, %v9009_v62  ;;  %v6151_v6 = vpop.f32.mrb[29].mxu1 }
 0x487   :  { %v4341_v21 = vpop.f32.mrb[30].mxu0  ;;  %v4433_v53 = vpop.f32.mrb[30].mxu1 }
 0x488   :  { %v5356_v25 = vadd.f32 %v4339_v11, %v4247_v57  ;;  %v6134_v0 = vpop.f32.mrb[31].mxu0  ;;  %v6152_v61 = vpop.f32.mrb[31].mxu1  ;;  %v5655_v53 = vld [vmem:[%s9146_s4] ss:$0 sm:$0xff] }
 0x4a1   :  { %v4522_v24 = vpop.f32.mrb[32].mxu0  ;;  %v4614_v16 = vpop.f32.mrb[32].mxu1 }
 0x4a2   :  { %v4523_v12 = vadd.f32 %v4522_v24, %v9012_v19  ;;  %v6169_v36 = vpop.f32.mrb[33].mxu0  ;;  %v4615_v5 = vadd.f32 %v4614_v16, %v9037_v23  ;;  %v6187_v27 = vpop.f32.mrb[33].mxu1 }
 0x4a3   :  { %v4525_v4 = vpop.f32.mrb[34].mxu0  ;;  %v4617_v29 = vpop.f32.mrb[34].mxu1 }
 0x4a4   :  { %v5357_v40 = vadd.f32 %v4523_v12, %v4431_v50  ;;  %v6170_v44 = vpop.f32.mrb[35].mxu0  ;;  %v6188_v35 = vpop.f32.mrb[35].mxu1 }
 0x4a6   :  { %v5362_v62 = vadd.f32 %v5357_v40, %v5356_v25 }
 0x4bd   :  { %v4706_v31 = vpop.f32.mrb[36].mxu0  ;;  %v4798_v49 = vpop.f32.mrb[36].mxu1 }
 0x4be   :  { %v4707_v26 = vadd.f32 %v4706_v31, %v9040_v60  ;;  %v6205_v34 = vpop.f32.mrb[37].mxu0  ;;  %v4799_v56 = vadd.f32 %v4798_v49, %v9065_v7  ;;  %v6223_v19 = vpop.f32.mrb[37].mxu1 }
 0x4bf   :  { %v4709_v37 = vpop.f32.mrb[38].mxu0  ;;  %v4801_v45 = vpop.f32.mrb[38].mxu1 }
 0x4c0   :  { %v5358_v14 = vadd.f32 %v4707_v26, %v4615_v5  ;;  %v6206_v42 = vpop.f32.mrb[39].mxu0  ;;  %v6224_v23 = vpop.f32.mrb[39].mxu1 }
 0x4d9   :  { %v4890_v41 = vpop.f32.mrb[40].mxu0  ;;  %v4982_v28 = vpop.f32.mrb[40].mxu1 }
 0x4da   :  { %v4891_v15 = vadd.f32 %v4890_v41, %v9068_v48  ;;  %v6241_v47 = vpop.f32.mrb[41].mxu0  ;;  %v4983_v52 = vadd.f32 %v4982_v28, %v9093_v17  ;;  %v6259_v55 = vpop.f32.mrb[41].mxu1 }
 0x4db   :  { %v4893_v2 = vpop.f32.mrb[42].mxu0  ;;  %v4985_v22 = vpop.f32.mrb[42].mxu1 }
 0x4dc   :  { %v5359_v60 = vadd.f32 %v4891_v15, %v4799_v56  ;;  %v6242_v18 = vpop.f32.mrb[43].mxu0  ;;  %v6260_v54 = vpop.f32.mrb[43].mxu1 }
 0x4de   :  { %v5363_v7 = vadd.f32 %v5359_v60, %v5358_v14 }
 0x4e0   :  { %v5365_v10 = vadd.f32 %v5363_v7, %v5362_v62 }
 0x4f5   :  { %v5074_v20 = vpop.f32.mrb[44].mxu0  ;;  %v5166_v8 = vpop.f32.mrb[44].mxu1 }
 0x4f6   :  { %v5075_v46 = vadd.f32 %v5074_v20, %v9096_v32  ;;  %v6277_v1 = vpop.f32.mrb[45].mxu0  ;;  %v5167_v59 = vadd.f32 %v5166_v8, %v9108_v58  ;;  %v6295_v57 = vpop.f32.mrb[45].mxu1 }
 0x4f7   :  { %v5077_v48 = vpop.f32.mrb[46].mxu0  ;;  %v5169_v17 = vpop.f32.mrb[46].mxu1 }
 0x4f8   :  { %v5360_v3 = vadd.f32 %v5075_v46, %v4983_v52  ;;  %v6278_v39 = vpop.f32.mrb[47].mxu0  ;;  %v6296_v51 = vpop.f32.mrb[47].mxu1 }
 0x511   :  { %v5258_v63 = vpop.f32.mrb[48].mxu0  ;;  %v5350_v9 = vpop.f32.mrb[48].mxu1 }
 0x512   :  { %v5259_v43 = vadd.f32 %v5258_v63, %v9110_v30  ;;  %v6313_v11 = vpop.f32.mrb[49].mxu0  ;;  %v5351_v33 = vadd.f32 %v5350_v9, %v9112_v13  ;;  %v6331_v50 = vpop.f32.mrb[49].mxu1 }
 0x513   :  { %v5261_v38 = vpop.f32.mrb[50].mxu0  ;;  %v5353_v6 = vpop.f32.mrb[50].mxu1 }
 0x514   :  { %v5361_v32 = vadd.f32 %v5259_v43, %v5167_v59  ;;  %v6314_v21 = vpop.f32.mrb[51].mxu0  ;;  %v6332_v25 = vpop.f32.mrb[51].mxu1 }
 0x516   :  { %v5364_v58 = vadd.f32 %v5361_v32, %v5360_v3 }
 0x518   :  { %v5366_v0 = vadd.f32 %v5364_v58, %v5351_v33 }
 0x51a   :  { %v5367_v61 = vadd.f32 %v5366_v0, %v5365_v10 }
 0x51c   :  { %v5375_v30 = vadd.f32 %v5655_v53, %v5367_v61 }
 0x51e   :  { %v5376_v24 = vmax.f32 %v5375_v30, 0.0 }
 0x520   :  { %5378 = vst.msk [vmem:[#allocation10] sm:$0x3] %vm5377_vm14, %v5376_v24 }
 0x521   :  { %6575 = shalt.err (!%p6572_p0)
}
 0x522   :  { %s6576_s1 = scalar_lea.hbm %s9147_s5, 32 }
 0x523   :  { %p6577_p1 = scmp.ne.s32.totalorder %s9147_s5, %s6576_s1  ;;  %p6580_p2 = scmp.lt.u32.totalorder %s6576_s1, %s9147_s5 }
 0x525   :  { %p6582_p3 = pnand %p6580_p2, %p6577_p1 }
 0x527   :  { %6585 = shalt.err (!%p6582_p3)
}
 0x528   :  { %5388 = dma.vmem_to_hbm [thread:$0]  %s5386_s24, 32, %s9147_s5, [#allocation6]  }
 0x529   :  { %6592 = dma.done.wait [#allocation6], 32  }
 0x52a   :  { %6593 = vsyncadd [#allocation6], 4294967264 }
 0x52b   :  { %5392 = vsyncpa [#allocation6], 1 }
 0x52c   :  { %5393 = vsyncpa [#allocation7], 1 }
 0x52d   :  { %5394 = vsyncpa [#allocation9], 1 }
 0x52e   :  { %5395 = vsyncmov [#allocation4] }
 0x531   :  { %s5396_s6 = vpop.sfrf %5395 }
 0x532   :  { %p5656_p4 = scmp.ne.s32.totalorder %s5396_s6, 0 }
 0x534   :  { %5400 = shalt.err (%p5656_p4)  }

</bundles_post_ra>
